<compile_context>
chip_gen: v7x
topology: tpu7x:2x2x1
jax: 0.10.0
libtpu: 0.0.40
codegen_flags: <defaults>
</compile_context>

<pallas_src>
import functools

import jax
import jax.numpy as jnp
from jax import lax
from jax.experimental import pallas as pl
from jax.experimental.pallas import tpu as pltpu

# Module constants (from Ensemble / Leaky defaults used by Network).
ENS_BETA = 0.9       # Ensemble membrane decay
LEAKY_ALPHA = 0.2    # Leaky (frequency tracker) alpha
LEAKY_BETA = 0.9     # Leaky (frequency tracker) beta

K_PAD = 128          # padded sensory dim (25 -> 128)
N_PAD = 128          # padded ensemble dim (2 -> 128)
N_REAL = 2           # real ensemble neurons live in lanes [0, 2)


def _snn_kernel(x_ref, w_ref, lat_diag_ref, lat_offd_ref,
                spk_out, act_out, frq_out,
                drive_ref, *, T, unroll):
    """Full T-step recurrent simulation in VMEM.

    x_ref        : (T_pad, K_PAD)   padded input spikes
    w_ref        : (K_PAD, N_PAD)   padded feed-forward weights
    lat_diag_ref : (1, N_PAD)       lane n -> L[n, n]       (zero in padded lanes)
    lat_offd_ref : (1, N_PAD)       lane n -> L[1-n, n]     (zero in padded lanes)
    *_out        : (T_pad, N_PAD)   per-step histories (rows [0, T) written)
    drive_ref    : (T_pad, N_PAD)   scratch for the hoisted feed-forward drive
    """
    # (1) Feed-forward matmul hoisted out of the recurrence: one MXU pass, no per-step MXU.
    drive_ref[...] = jnp.dot(x_ref[...], w_ref[...],
                             preferred_element_type=jnp.float32)

    # Loop-invariant lateral coefficient vectors (hoisted loads, stay in vregs).
    lat_diag = lat_diag_ref[...]
    lat_offd = lat_offd_ref[...]

    def step(t, carry):
        act, spk, frq = carry                               # (1, N_PAD) register state

        drive = drive_ref[pl.ds(t, 1), :]                   # one cheap VMEM row load

        # (2) lateral drive for the 2x2 matrix on XLU/VPU instead of MXU:
        #     lateral[n] = L[n,n]*spk[n] + L[1-n,n]*spk[1-n]
        # Lane swap via roll(+1)+roll(-1); padded lanes are killed by zero coefficients.
        swapped = (pltpu.roll(spk, 1, axis=1) +
                   pltpu.roll(spk, N_PAD - 1, axis=1))
        lateral = spk * lat_diag + swapped * lat_offd

        thr_prev = 1.0 + frq          # threshold from the previous step (init frq=0 -> 1)

        # Ensemble membrane update + spike against the *old* threshold (strict >)
        act = ENS_BETA * act + drive + lateral
        spikes = act > thr_prev
        spk = spikes.astype(jnp.float32)

        # Leaky frequency tracker: decay first, then (1 - decayed) * alpha * spike
        frq = LEAKY_BETA * frq
        frq = frq + (1.0 - frq) * LEAKY_ALPHA * spk

        # reset_mechanism == 'zero'
        act = jnp.where(spikes, 0.0, act)

        # record history (threshold history == 1 + frq, reconstructed outside the kernel)
        spk_out[pl.ds(t, 1), :] = spk
        act_out[pl.ds(t, 1), :] = act
        frq_out[pl.ds(t, 1), :] = frq
        return act, spk, frq

    zeros = jnp.zeros((1, N_PAD), jnp.float32)
    lax.fori_loop(0, T, step, (zeros, zeros, zeros), unroll=unroll)


def run_network(x_seq, weights, lateral):
    """x_seq: (T, 25) f32 input spikes, weights: (25, 2), lateral: (2, 2).
    Returns dict of (T, 2) histories: spikes / activation / threshold / frequency."""
    T, K = x_seq.shape
    _, N = weights.shape
    assert N == N_REAL, "kernel specializes the 2-neuron ensemble of Network"

    T_pad = max(8, ((T + 7) // 8) * 8)   # keep the sublane axis 8-aligned for the MXU pass

    x_p = jnp.zeros((T_pad, K_PAD), jnp.float32).at[:T, :K].set(x_seq.astype(jnp.float32))
    w_p = jnp.zeros((K_PAD, N_PAD), jnp.float32).at[:K, :N].set(weights.astype(jnp.float32))

    # Lateral 2x2 matrix packed as two lane-coefficient vectors (general for any 2x2 L).
    lat = lateral.astype(jnp.float32)
    lat_diag = (jnp.zeros((1, N_PAD), jnp.float32)
                .at[0, 0].set(lat[0, 0]).at[0, 1].set(lat[1, 1]))
    lat_offd = (jnp.zeros((1, N_PAD), jnp.float32)
                .at[0, 0].set(lat[1, 0]).at[0, 1].set(lat[0, 1]))

    # Unroll small loops fully; modest unroll for larger T when divisible.
    unroll = True if T <= 256 else (8 if T % 8 == 0 else False)

    vmem = pltpu.MemorySpace.VMEM
    out_shape = tuple(jax.ShapeDtypeStruct((T_pad, N_PAD), jnp.float32) for _ in range(3))

    spk, act, frq = pl.pallas_call(
        functools.partial(_snn_kernel, T=T, unroll=unroll),
        out_shape=out_shape,
        in_specs=[pl.BlockSpec(memory_space=vmem)] * 4,
        out_specs=tuple(pl.BlockSpec(memory_space=vmem) for _ in range(3)),
        scratch_shapes=[pltpu.VMEM((T_pad, N_PAD), jnp.float32)],   # hoisted FF drive
    )(x_p, w_p, lat_diag, lat_offd)

    frq_h = frq[:T, :N]
    return {
        "ensemble1_spikes": spk[:T, :N],
        "ensemble1_activation": act[:T, :N],
        "ensemble1_threshold": 1.0 + frq_h,      # threshold == 1 + frequency (exact)
        "ensemble1_frequency": frq_h,
    }


def build_inputs(key, time_steps):
    """Plain-JAX glue reproducing SensoryInput / the Network.forward input schedule
    (spikegen.rate == per-step Bernoulli with prob = signal)."""
    shape1 = (5, 5)
    num_steps = 100  # SensoryInput.num_steps
    k_sig1, k_sig2, k_sp1, k_sp2, k_noise = jax.random.split(key, 5)

    signal1 = jax.random.uniform(k_sig1, shape1)
    signal2 = jax.random.uniform(k_sig2, shape1)
    spike_data1 = (jax.random.uniform(k_sp1, (num_steps,) + shape1) < signal1).astype(jnp.float32)
    spike_data2 = (jax.random.uniform(k_sp2, (num_steps,) + shape1) < signal2).astype(jnp.float32)
    noise = (jax.random.uniform(k_noise, (time_steps,) + shape1) > 0.5).astype(jnp.float32)

    rows = []
    t2 = 0  # sensory_input2 internal counter (only advances when called)
    for step in range(time_steps):
        x = spike_data1[(step + 1) % num_steps]   # sensory_input.t pre-increments
        if step > time_steps * 3 // 4:
            x = noise[step]
        elif step > time_steps // 2:
            t2 += 1
            x = spike_data2[t2 % num_steps]
        elif step > time_steps // 4:
            x = 1.0 - x
        rows.append(x.reshape(-1))
    x_seq = jnp.stack(rows, axis=0)               # (T, 25)

    # Connection weights as overridden in Network.__init__:
    # col 0 = signal / sum(signal), col 1 = (1 - signal) / sum(1 - signal)
    s = signal1.reshape(-1)
    w0 = s / jnp.sum(s)
    w1 = (1.0 - s) / jnp.sum(1.0 - s)
    weights = jnp.stack([w0, w1], axis=1)         # (25, 2)

    lateral = jnp.array([[0.0, -1.0], [-1.0, 0.0]], dtype=jnp.float32)  # (2, 2)
    return x_seq, weights, lateral


if __name__ == "__main__":
    T = 32  # small time horizon (Network.forward default is 100)
    key = jax.random.PRNGKey(0)
    x_seq, weights, lateral = build_inputs(key, T)

    hist = jax.jit(run_network)(x_seq, weights, lateral)
    hist = jax.block_until_ready(hist)

    assert hist["ensemble1_spikes"].shape == (T, 2)
    assert hist["ensemble1_activation"].shape == (T, 2)
    assert hist["ensemble1_threshold"].shape == (T, 2)
    assert hist["ensemble1_frequency"].shape == (T, 2)
    assert bool(jnp.all(jnp.isfinite(hist["ensemble1_activation"])))
    assert bool(jnp.all(hist["ensemble1_threshold"] >= 1.0))
    print("KERNEL_OK")
</pallas_src>

<mosaic_0001>
module attributes {stable_mosaic.version = 11 : i64} {
  func.func @_snn_kernel(%arg0: memref<32x128xf32, #tpu.memory_space<vmem>>, %arg1: memref<128x128xf32, #tpu.memory_space<vmem>>, %arg2: memref<1x128xf32, #tpu.memory_space<vmem>>, %arg3: memref<1x128xf32, #tpu.memory_space<vmem>>, %arg4: memref<32x128xf32, #tpu.memory_space<vmem>>, %arg5: memref<32x128xf32, #tpu.memory_space<vmem>>, %arg6: memref<32x128xf32, #tpu.memory_space<vmem>>, %arg7: memref<32x128xf32, #tpu.memory_space<vmem>>) attributes {dimension_semantics = [], scalar_prefetch = 0 : i64, scratch_operands = 1 : i64, tpu.core_type = #tpu.core_type<tc>} {
    %c0 = arith.constant 0 : index
    %c0_0 = arith.constant 0 : index
    %0 = vector.load %arg0[%c0, %c0_0] : memref<32x128xf32, #tpu.memory_space<vmem>>, vector<32x128xf32>
    %c0_1 = arith.constant 0 : index
    %c0_2 = arith.constant 0 : index
    %1 = vector.load %arg1[%c0_1, %c0_2] : memref<128x128xf32, #tpu.memory_space<vmem>>, vector<128x128xf32>
    %cst = arith.constant dense<0.000000e+00> : vector<32x128xf32>
    %2 = tpu.matmul %0, %1, %cst {dimension_numbers = #tpu.dot_dimension_numbers<[1], [0], [0], [1], [0, 0, 1, 1], [], []>} : vector<32x128xf32>, vector<128x128xf32>, vector<32x128xf32> -> vector<32x128xf32>
    %c0_3 = arith.constant 0 : index
    %c0_4 = arith.constant 0 : index
    %3 = vector.load %arg7[%c0_3, %c0_4] : memref<32x128xf32, #tpu.memory_space<vmem>>, vector<32x128xf32>
    tpu.vector_store %arg7[%c0_3, %c0_4], %2 {strides = array<i32>} : memref<32x128xf32, #tpu.memory_space<vmem>>, vector<32x128xf32>,
    %c0_5 = arith.constant 0 : index
    %c0_6 = arith.constant 0 : index
    %4 = vector.load %arg2[%c0_5, %c0_6] : memref<1x128xf32, #tpu.memory_space<vmem>>, vector<1x128xf32>
    %c0_7 = arith.constant 0 : index
    %c0_8 = arith.constant 0 : index
    %5 = vector.load %arg3[%c0_7, %c0_8] : memref<1x128xf32, #tpu.memory_space<vmem>>, vector<1x128xf32>
    %cst_9 = arith.constant 0.000000e+00 : f32
    %6 = vector.broadcast %cst_9 : f32 to vector<1x128xf32>
    %c0_i32 = arith.constant 0 : i32
    %7 = arith.index_cast %c0_i32 : i32 to index
    %c0_10 = arith.constant 0 : index
    %8 = vector.load %arg7[%7, %c0_10] : memref<32x128xf32, #tpu.memory_space<vmem>>, vector<1x128xf32>
    %c1_i32 = arith.constant 1 : i32
    %9 = tpu.dynamic_rotate %6 by %c1_i32 dim 1 : vector<1x128xf32>, i32 -> vector<1x128xf32>
    %c127_i32 = arith.constant 127 : i32
    %10 = tpu.dynamic_rotate %6 by %c127_i32 dim 1 : vector<1x128xf32>, i32 -> vector<1x128xf32>
    %11 = arith.addf %9, %10 : vector<1x128xf32>
    %12 = arith.mulf %6, %4 : vector<1x128xf32>
    %13 = arith.mulf %11, %5 : vector<1x128xf32>
    %14 = arith.addf %12, %13 : vector<1x128xf32>
    %cst_11 = arith.constant 1.000000e+00 : f32
    %15 = vector.broadcast %cst_11 : f32 to vector<1x128xf32>
    %16 = arith.addf %15, %6 : vector<1x128xf32>
    %cst_12 = arith.constant 0.899999976 : f32
    %17 = vector.broadcast %cst_12 : f32 to vector<1x128xf32>
    %18 = arith.mulf %17, %6 : vector<1x128xf32>
    %19 = arith.addf %18, %8 : vector<1x128xf32>
    %20 = arith.addf %19, %14 : vector<1x128xf32>
    %21 = arith.cmpf ogt, %20, %16 : vector<1x128xf32>
    %22 = arith.extui %21 : vector<1x128xi1> to vector<1x128xi32>
    %23 = arith.sitofp %22 : vector<1x128xi32> to vector<1x128xf32>
    %cst_13 = arith.constant 0.899999976 : f32
    %24 = vector.broadcast %cst_13 : f32 to vector<1x128xf32>
    %25 = arith.mulf %24, %6 : vector<1x128xf32>
    %cst_14 = arith.constant 1.000000e+00 : f32
    %26 = vector.broadcast %cst_14 : f32 to vector<1x128xf32>
    %27 = arith.subf %26, %25 : vector<1x128xf32>
    %cst_15 = arith.constant 2.000000e-01 : f32
    %28 = vector.broadcast %cst_15 : f32 to vector<1x128xf32>
    %29 = arith.mulf %27, %28 : vector<1x128xf32>
    %30 = arith.mulf %29, %23 : vector<1x128xf32>
    %31 = arith.addf %25, %30 : vector<1x128xf32>
    %cst_16 = arith.constant 0.000000e+00 : f32
    %32 = vector.broadcast %cst_16 : f32 to vector<1x128xf32>
    %33 = arith.select %21, %32, %20 : vector<1x128xi1>, vector<1x128xf32>
    %34 = arith.index_cast %c0_i32 : i32 to index
    %c0_17 = arith.constant 0 : index
    %35 = vector.load %arg4[%34, %c0_17] : memref<32x128xf32, #tpu.memory_space<vmem>>, vector<1x128xf32>
    tpu.vector_store %arg4[%34, %c0_17], %23 {strides = array<i32>} : memref<32x128xf32, #tpu.memory_space<vmem>>, vector<1x128xf32>,
    %36 = arith.index_cast %c0_i32 : i32 to index
    %c0_18 = arith.constant 0 : index
    %37 = vector.load %arg5[%36, %c0_18] : memref<32x128xf32, #tpu.memory_space<vmem>>, vector<1x128xf32>
    tpu.vector_store %arg5[%36, %c0_18], %33 {strides = array<i32>} : memref<32x128xf32, #tpu.memory_space<vmem>>, vector<1x128xf32>,
    %38 = arith.index_cast %c0_i32 : i32 to index
    %c0_19 = arith.constant 0 : index
    %39 = vector.load %arg6[%38, %c0_19] : memref<32x128xf32, #tpu.memory_space<vmem>>, vector<1x128xf32>
    tpu.vector_store %arg6[%38, %c0_19], %31 {strides = array<i32>} : memref<32x128xf32, #tpu.memory_space<vmem>>, vector<1x128xf32>,
    %c1_i32_20 = arith.constant 1 : i32
    %40 = arith.index_cast %c1_i32_20 : i32 to index
    %c0_21 = arith.constant 0 : index
    %41 = vector.load %arg7[%40, %c0_21] : memref<32x128xf32, #tpu.memory_space<vmem>>, vector<1x128xf32>
    %c1_i32_22 = arith.constant 1 : i32
    %42 = tpu.dynamic_rotate %23 by %c1_i32_22 dim 1 : vector<1x128xf32>, i32 -> vector<1x128xf32>
    %c127_i32_23 = arith.constant 127 : i32
    %43 = tpu.dynamic_rotate %23 by %c127_i32_23 dim 1 : vector<1x128xf32>, i32 -> vector<1x128xf32>
    %44 = arith.addf %42, %43 : vector<1x128xf32>
    %45 = arith.mulf %23, %4 : vector<1x128xf32>
    %46 = arith.mulf %44, %5 : vector<1x128xf32>
    %47 = arith.addf %45, %46 : vector<1x128xf32>
    %cst_24 = arith.constant 1.000000e+00 : f32
    %48 = vector.broadcast %cst_24 : f32 to vector<1x128xf32>
    %49 = arith.addf %48, %31 : vector<1x128xf32>
    %cst_25 = arith.constant 0.899999976 : f32
    %50 = vector.broadcast %cst_25 : f32 to vector<1x128xf32>
    %51 = arith.mulf %50, %33 : vector<1x128xf32>
    %52 = arith.addf %51, %41 : vector<1x128xf32>
    %53 = arith.addf %52, %47 : vector<1x128xf32>
    %54 = arith.cmpf ogt, %53, %49 : vector<1x128xf32>
    %55 = arith.extui %54 : vector<1x128xi1> to vector<1x128xi32>
    %56 = arith.sitofp %55 : vector<1x128xi32> to vector<1x128xf32>
    %cst_26 = arith.constant 0.899999976 : f32
    %57 = vector.broadcast %cst_26 : f32 to vector<1x128xf32>
    %58 = arith.mulf %57, %31 : vector<1x128xf32>
    %cst_27 = arith.constant 1.000000e+00 : f32
    %59 = vector.broadcast %cst_27 : f32 to vector<1x128xf32>
    %60 = arith.subf %59, %58 : vector<1x128xf32>
    %cst_28 = arith.constant 2.000000e-01 : f32
    %61 = vector.broadcast %cst_28 : f32 to vector<1x128xf32>
    %62 = arith.mulf %60, %61 : vector<1x128xf32>
    %63 = arith.mulf %62, %56 : vector<1x128xf32>
    %64 = arith.addf %58, %63 : vector<1x128xf32>
    %cst_29 = arith.constant 0.000000e+00 : f32
    %65 = vector.broadcast %cst_29 : f32 to vector<1x128xf32>
    %66 = arith.select %54, %65, %53 : vector<1x128xi1>, vector<1x128xf32>
    %67 = arith.index_cast %c1_i32_20 : i32 to index
    %c0_30 = arith.constant 0 : index
    %68 = vector.load %arg4[%67, %c0_30] : memref<32x128xf32, #tpu.memory_space<vmem>>, vector<1x128xf32>
    tpu.vector_store %arg4[%67, %c0_30], %56 {strides = array<i32>} : memref<32x128xf32, #tpu.memory_space<vmem>>, vector<1x128xf32>,
    %69 = arith.index_cast %c1_i32_20 : i32 to index
    %c0_31 = arith.constant 0 : index
    %70 = vector.load %arg5[%69, %c0_31] : memref<32x128xf32, #tpu.memory_space<vmem>>, vector<1x128xf32>
    tpu.vector_store %arg5[%69, %c0_31], %66 {strides = array<i32>} : memref<32x128xf32, #tpu.memory_space<vmem>>, vector<1x128xf32>,
    %71 = arith.index_cast %c1_i32_20 : i32 to index
    %c0_32 = arith.constant 0 : index
    %72 = vector.load %arg6[%71, %c0_32] : memref<32x128xf32, #tpu.memory_space<vmem>>, vector<1x128xf32>
    tpu.vector_store %arg6[%71, %c0_32], %64 {strides = array<i32>} : memref<32x128xf32, #tpu.memory_space<vmem>>, vector<1x128xf32>,
    %c2_i32 = arith.constant 2 : i32
    %73 = arith.index_cast %c2_i32 : i32 to index
    %c0_33 = arith.constant 0 : index
    %74 = vector.load %arg7[%73, %c0_33] : memref<32x128xf32, #tpu.memory_space<vmem>>, vector<1x128xf32>
    %c1_i32_34 = arith.constant 1 : i32
    %75 = tpu.dynamic_rotate %56 by %c1_i32_34 dim 1 : vector<1x128xf32>, i32 -> vector<1x128xf32>
    %c127_i32_35 = arith.constant 127 : i32
    %76 = tpu.dynamic_rotate %56 by %c127_i32_35 dim 1 : vector<1x128xf32>, i32 -> vector<1x128xf32>
    %77 = arith.addf %75, %76 : vector<1x128xf32>
    %78 = arith.mulf %56, %4 : vector<1x128xf32>
    %79 = arith.mulf %77, %5 : vector<1x128xf32>
    %80 = arith.addf %78, %79 : vector<1x128xf32>
    %cst_36 = arith.constant 1.000000e+00 : f32
    %81 = vector.broadcast %cst_36 : f32 to vector<1x128xf32>
    %82 = arith.addf %81, %64 : vector<1x128xf32>
    %cst_37 = arith.constant 0.899999976 : f32
    %83 = vector.broadcast %cst_37 : f32 to vector<1x128xf32>
    %84 = arith.mulf %83, %66 : vector<1x128xf32>
    %85 = arith.addf %84, %74 : vector<1x128xf32>
    %86 = arith.addf %85, %80 : vector<1x128xf32>
    %87 = arith.cmpf ogt, %86, %82 : vector<1x128xf32>
    %88 = arith.extui %87 : vector<1x128xi1> to vector<1x128xi32>
    %89 = arith.sitofp %88 : vector<1x128xi32> to vector<1x128xf32>
    %cst_38 = arith.constant 0.899999976 : f32
    %90 = vector.broadcast %cst_38 : f32 to vector<1x128xf32>
    %91 = arith.mulf %90, %64 : vector<1x128xf32>
    %cst_39 = arith.constant 1.000000e+00 : f32
    %92 = vector.broadcast %cst_39 : f32 to vector<1x128xf32>
    %93 = arith.subf %92, %91 : vector<1x128xf32>
    %cst_40 = arith.constant 2.000000e-01 : f32
    %94 = vector.broadcast %cst_40 : f32 to vector<1x128xf32>
    %95 = arith.mulf %93, %94 : vector<1x128xf32>
    %96 = arith.mulf %95, %89 : vector<1x128xf32>
    %97 = arith.addf %91, %96 : vector<1x128xf32>
    %cst_41 = arith.constant 0.000000e+00 : f32
    %98 = vector.broadcast %cst_41 : f32 to vector<1x128xf32>
    %99 = arith.select %87, %98, %86 : vector<1x128xi1>, vector<1x128xf32>
    %100 = arith.index_cast %c2_i32 : i32 to index
    %c0_42 = arith.constant 0 : index
    %101 = vector.load %arg4[%100, %c0_42] : memref<32x128xf32, #tpu.memory_space<vmem>>, vector<1x128xf32>
    tpu.vector_store %arg4[%100, %c0_42], %89 {strides = array<i32>} : memref<32x128xf32, #tpu.memory_space<vmem>>, vector<1x128xf32>,
    %102 = arith.index_cast %c2_i32 : i32 to index
    %c0_43 = arith.constant 0 : index
    %103 = vector.load %arg5[%102, %c0_43] : memref<32x128xf32, #tpu.memory_space<vmem>>, vector<1x128xf32>
    tpu.vector_store %arg5[%102, %c0_43], %99 {strides = array<i32>} : memref<32x128xf32, #tpu.memory_space<vmem>>, vector<1x128xf32>,
    %104 = arith.index_cast %c2_i32 : i32 to index
    %c0_44 = arith.constant 0 : index
    %105 = vector.load %arg6[%104, %c0_44] : memref<32x128xf32, #tpu.memory_space<vmem>>, vector<1x128xf32>
    tpu.vector_store %arg6[%104, %c0_44], %97 {strides = array<i32>} : memref<32x128xf32, #tpu.memory_space<vmem>>, vector<1x128xf32>,
    %c3_i32 = arith.constant 3 : i32
    %106 = arith.index_cast %c3_i32 : i32 to index
    %c0_45 = arith.constant 0 : index
    %107 = vector.load %arg7[%106, %c0_45] : memref<32x128xf32, #tpu.memory_space<vmem>>, vector<1x128xf32>
    %c1_i32_46 = arith.constant 1 : i32
    %108 = tpu.dynamic_rotate %89 by %c1_i32_46 dim 1 : vector<1x128xf32>, i32 -> vector<1x128xf32>
    %c127_i32_47 = arith.constant 127 : i32
    %109 = tpu.dynamic_rotate %89 by %c127_i32_47 dim 1 : vector<1x128xf32>, i32 -> vector<1x128xf32>
    %110 = arith.addf %108, %109 : vector<1x128xf32>
    %111 = arith.mulf %89, %4 : vector<1x128xf32>
    %112 = arith.mulf %110, %5 : vector<1x128xf32>
    %113 = arith.addf %111, %112 : vector<1x128xf32>
    %cst_48 = arith.constant 1.000000e+00 : f32
    %114 = vector.broadcast %cst_48 : f32 to vector<1x128xf32>
    %115 = arith.addf %114, %97 : vector<1x128xf32>
    %cst_49 = arith.constant 0.899999976 : f32
    %116 = vector.broadcast %cst_49 : f32 to vector<1x128xf32>
    %117 = arith.mulf %116, %99 : vector<1x128xf32>
    %118 = arith.addf %117, %107 : vector<1x128xf32>
    %119 = arith.addf %118, %113 : vector<1x128xf32>
    %120 = arith.cmpf ogt, %119, %115 : vector<1x128xf32>
    %121 = arith.extui %120 : vector<1x128xi1> to vector<1x128xi32>
    %122 = arith.sitofp %121 : vector<1x128xi32> to vector<1x128xf32>
    %cst_50 = arith.constant 0.899999976 : f32
    %123 = vector.broadcast %cst_50 : f32 to vector<1x128xf32>
    %124 = arith.mulf %123, %97 : vector<1x128xf32>
    %cst_51 = arith.constant 1.000000e+00 : f32
    %125 = vector.broadcast %cst_51 : f32 to vector<1x128xf32>
    %126 = arith.subf %125, %124 : vector<1x128xf32>
    %cst_52 = arith.constant 2.000000e-01 : f32
    %127 = vector.broadcast %cst_52 : f32 to vector<1x128xf32>
    %128 = arith.mulf %126, %127 : vector<1x128xf32>
    %129 = arith.mulf %128, %122 : vector<1x128xf32>
    %130 = arith.addf %124, %129 : vector<1x128xf32>
    %cst_53 = arith.constant 0.000000e+00 : f32
    %131 = vector.broadcast %cst_53 : f32 to vector<1x128xf32>
    %132 = arith.select %120, %131, %119 : vector<1x128xi1>, vector<1x128xf32>
    %133 = arith.index_cast %c3_i32 : i32 to index
    %c0_54 = arith.constant 0 : index
    %134 = vector.load %arg4[%133, %c0_54] : memref<32x128xf32, #tpu.memory_space<vmem>>, vector<1x128xf32>
    tpu.vector_store %arg4[%133, %c0_54], %122 {strides = array<i32>} : memref<32x128xf32, #tpu.memory_space<vmem>>, vector<1x128xf32>,
    %135 = arith.index_cast %c3_i32 : i32 to index
    %c0_55 = arith.constant 0 : index
    %136 = vector.load %arg5[%135, %c0_55] : memref<32x128xf32, #tpu.memory_space<vmem>>, vector<1x128xf32>
    tpu.vector_store %arg5[%135, %c0_55], %132 {strides = array<i32>} : memref<32x128xf32, #tpu.memory_space<vmem>>, vector<1x128xf32>,
    %137 = arith.index_cast %c3_i32 : i32 to index
    %c0_56 = arith.constant 0 : index
    %138 = vector.load %arg6[%137, %c0_56] : memref<32x128xf32, #tpu.memory_space<vmem>>, vector<1x128xf32>
    tpu.vector_store %arg6[%137, %c0_56], %130 {strides = array<i32>} : memref<32x128xf32, #tpu.memory_space<vmem>>, vector<1x128xf32>,
    %c4_i32 = arith.constant 4 : i32
    %139 = arith.index_cast %c4_i32 : i32 to index
    %c0_57 = arith.constant 0 : index
    %140 = vector.load %arg7[%139, %c0_57] : memref<32x128xf32, #tpu.memory_space<vmem>>, vector<1x128xf32>
    %c1_i32_58 = arith.constant 1 : i32
    %141 = tpu.dynamic_rotate %122 by %c1_i32_58 dim 1 : vector<1x128xf32>, i32 -> vector<1x128xf32>
    %c127_i32_59 = arith.constant 127 : i32
    %142 = tpu.dynamic_rotate %122 by %c127_i32_59 dim 1 : vector<1x128xf32>, i32 -> vector<1x128xf32>
    %143 = arith.addf %141, %142 : vector<1x128xf32>
    %144 = arith.mulf %122, %4 : vector<1x128xf32>
    %145 = arith.mulf %143, %5 : vector<1x128xf32>
    %146 = arith.addf %144, %145 : vector<1x128xf32>
    %cst_60 = arith.constant 1.000000e+00 : f32
    %147 = vector.broadcast %cst_60 : f32 to vector<1x128xf32>
    %148 = arith.addf %147, %130 : vector<1x128xf32>
    %cst_61 = arith.constant 0.899999976 : f32
    %149 = vector.broadcast %cst_61 : f32 to vector<1x128xf32>
    %150 = arith.mulf %149, %132 : vector<1x128xf32>
    %151 = arith.addf %150, %140 : vector<1x128xf32>
    %152 = arith.addf %151, %146 : vector<1x128xf32>
    %153 = arith.cmpf ogt, %152, %148 : vector<1x128xf32>
    %154 = arith.extui %153 : vector<1x128xi1> to vector<1x128xi32>
    %155 = arith.sitofp %154 : vector<1x128xi32> to vector<1x128xf32>
    %cst_62 = arith.constant 0.899999976 : f32
    %156 = vector.broadcast %cst_62 : f32 to vector<1x128xf32>
    %157 = arith.mulf %156, %130 : vector<1x128xf32>
    %cst_63 = arith.constant 1.000000e+00 : f32
    %158 = vector.broadcast %cst_63 : f32 to vector<1x128xf32>
    %159 = arith.subf %158, %157 : vector<1x128xf32>
    %cst_64 = arith.constant 2.000000e-01 : f32
    %160 = vector.broadcast %cst_64 : f32 to vector<1x128xf32>
    %161 = arith.mulf %159, %160 : vector<1x128xf32>
    %162 = arith.mulf %161, %155 : vector<1x128xf32>
    %163 = arith.addf %157, %162 : vector<1x128xf32>
    %cst_65 = arith.constant 0.000000e+00 : f32
    %164 = vector.broadcast %cst_65 : f32 to vector<1x128xf32>
    %165 = arith.select %153, %164, %152 : vector<1x128xi1>, vector<1x128xf32>
    %166 = arith.index_cast %c4_i32 : i32 to index
    %c0_66 = arith.constant 0 : index
    %167 = vector.load %arg4[%166, %c0_66] : memref<32x128xf32, #tpu.memory_space<vmem>>, vector<1x128xf32>
    tpu.vector_store %arg4[%166, %c0_66], %155 {strides = array<i32>} : memref<32x128xf32, #tpu.memory_space<vmem>>, vector<1x128xf32>,
    %168 = arith.index_cast %c4_i32 : i32 to index
    %c0_67 = arith.constant 0 : index
    %169 = vector.load %arg5[%168, %c0_67] : memref<32x128xf32, #tpu.memory_space<vmem>>, vector<1x128xf32>
    tpu.vector_store %arg5[%168, %c0_67], %165 {strides = array<i32>} : memref<32x128xf32, #tpu.memory_space<vmem>>, vector<1x128xf32>,
    %170 = arith.index_cast %c4_i32 : i32 to index
    %c0_68 = arith.constant 0 : index
    %171 = vector.load %arg6[%170, %c0_68] : memref<32x128xf32, #tpu.memory_space<vmem>>, vector<1x128xf32>
    tpu.vector_store %arg6[%170, %c0_68], %163 {strides = array<i32>} : memref<32x128xf32, #tpu.memory_space<vmem>>, vector<1x128xf32>,
    %c5_i32 = arith.constant 5 : i32
    %172 = arith.index_cast %c5_i32 : i32 to index
    %c0_69 = arith.constant 0 : index
    %173 = vector.load %arg7[%172, %c0_69] : memref<32x128xf32, #tpu.memory_space<vmem>>, vector<1x128xf32>
    %c1_i32_70 = arith.constant 1 : i32
    %174 = tpu.dynamic_rotate %155 by %c1_i32_70 dim 1 : vector<1x128xf32>, i32 -> vector<1x128xf32>
    %c127_i32_71 = arith.constant 127 : i32
    %175 = tpu.dynamic_rotate %155 by %c127_i32_71 dim 1 : vector<1x128xf32>, i32 -> vector<1x128xf32>
    %176 = arith.addf %174, %175 : vector<1x128xf32>
    %177 = arith.mulf %155, %4 : vector<1x128xf32>
    %178 = arith.mulf %176, %5 : vector<1x128xf32>
    %179 = arith.addf %177, %178 : vector<1x128xf32>
    %cst_72 = arith.constant 1.000000e+00 : f32
    %180 = vector.broadcast %cst_72 : f32 to vector<1x128xf32>
    %181 = arith.addf %180, %163 : vector<1x128xf32>
    %cst_73 = arith.constant 0.899999976 : f32
    %182 = vector.broadcast %cst_73 : f32 to vector<1x128xf32>
    %183 = arith.mulf %182, %165 : vector<1x128xf32>
    %184 = arith.addf %183, %173 : vector<1x128xf32>
    %185 = arith.addf %184, %179 : vector<1x128xf32>
    %186 = arith.cmpf ogt, %185, %181 : vector<1x128xf32>
    %187 = arith.extui %186 : vector<1x128xi1> to vector<1x128xi32>
    %188 = arith.sitofp %187 : vector<1x128xi32> to vector<1x128xf32>
    %cst_74 = arith.constant 0.899999976 : f32
    %189 = vector.broadcast %cst_74 : f32 to vector<1x128xf32>
    %190 = arith.mulf %189, %163 : vector<1x128xf32>
    %cst_75 = arith.constant 1.000000e+00 : f32
    %191 = vector.broadcast %cst_75 : f32 to vector<1x128xf32>
    %192 = arith.subf %191, %190 : vector<1x128xf32>
    %cst_76 = arith.constant 2.000000e-01 : f32
    %193 = vector.broadcast %cst_76 : f32 to vector<1x128xf32>
    %194 = arith.mulf %192, %193 : vector<1x128xf32>
    %195 = arith.mulf %194, %188 : vector<1x128xf32>
    %196 = arith.addf %190, %195 : vector<1x128xf32>
    %cst_77 = arith.constant 0.000000e+00 : f32
    %197 = vector.broadcast %cst_77 : f32 to vector<1x128xf32>
    %198 = arith.select %186, %197, %185 : vector<1x128xi1>, vector<1x128xf32>
    %199 = arith.index_cast %c5_i32 : i32 to index
    %c0_78 = arith.constant 0 : index
    %200 = vector.load %arg4[%199, %c0_78] : memref<32x128xf32, #tpu.memory_space<vmem>>, vector<1x128xf32>
    tpu.vector_store %arg4[%199, %c0_78], %188 {strides = array<i32>} : memref<32x128xf32, #tpu.memory_space<vmem>>, vector<1x128xf32>,
    %201 = arith.index_cast %c5_i32 : i32 to index
    %c0_79 = arith.constant 0 : index
    %202 = vector.load %arg5[%201, %c0_79] : memref<32x128xf32, #tpu.memory_space<vmem>>, vector<1x128xf32>
    tpu.vector_store %arg5[%201, %c0_79], %198 {strides = array<i32>} : memref<32x128xf32, #tpu.memory_space<vmem>>, vector<1x128xf32>,
    %203 = arith.index_cast %c5_i32 : i32 to index
    %c0_80 = arith.constant 0 : index
    %204 = vector.load %arg6[%203, %c0_80] : memref<32x128xf32, #tpu.memory_space<vmem>>, vector<1x128xf32>
    tpu.vector_store %arg6[%203, %c0_80], %196 {strides = array<i32>} : memref<32x128xf32, #tpu.memory_space<vmem>>, vector<1x128xf32>,
    %c6_i32 = arith.constant 6 : i32
    %205 = arith.index_cast %c6_i32 : i32 to index
    %c0_81 = arith.constant 0 : index
    %206 = vector.load %arg7[%205, %c0_81] : memref<32x128xf32, #tpu.memory_space<vmem>>, vector<1x128xf32>
    %c1_i32_82 = arith.constant 1 : i32
    %207 = tpu.dynamic_rotate %188 by %c1_i32_82 dim 1 : vector<1x128xf32>, i32 -> vector<1x128xf32>
    %c127_i32_83 = arith.constant 127 : i32
    %208 = tpu.dynamic_rotate %188 by %c127_i32_83 dim 1 : vector<1x128xf32>, i32 -> vector<1x128xf32>
    %209 = arith.addf %207, %208 : vector<1x128xf32>
    %210 = arith.mulf %188, %4 : vector<1x128xf32>
    %211 = arith.mulf %209, %5 : vector<1x128xf32>
    %212 = arith.addf %210, %211 : vector<1x128xf32>
    %cst_84 = arith.constant 1.000000e+00 : f32
    %213 = vector.broadcast %cst_84 : f32 to vector<1x128xf32>
    %214 = arith.addf %213, %196 : vector<1x128xf32>
    %cst_85 = arith.constant 0.899999976 : f32
    %215 = vector.broadcast %cst_85 : f32 to vector<1x128xf32>
    %216 = arith.mulf %215, %198 : vector<1x128xf32>
    %217 = arith.addf %216, %206 : vector<1x128xf32>
    %218 = arith.addf %217, %212 : vector<1x128xf32>
    %219 = arith.cmpf ogt, %218, %214 : vector<1x128xf32>
    %220 = arith.extui %219 : vector<1x128xi1> to vector<1x128xi32>
    %221 = arith.sitofp %220 : vector<1x128xi32> to vector<1x128xf32>
    %cst_86 = arith.constant 0.899999976 : f32
    %222 = vector.broadcast %cst_86 : f32 to vector<1x128xf32>
    %223 = arith.mulf %222, %196 : vector<1x128xf32>
    %cst_87 = arith.constant 1.000000e+00 : f32
    %224 = vector.broadcast %cst_87 : f32 to vector<1x128xf32>
    %225 = arith.subf %224, %223 : vector<1x128xf32>
    %cst_88 = arith.constant 2.000000e-01 : f32
    %226 = vector.broadcast %cst_88 : f32 to vector<1x128xf32>
    %227 = arith.mulf %225, %226 : vector<1x128xf32>
    %228 = arith.mulf %227, %221 : vector<1x128xf32>
    %229 = arith.addf %223, %228 : vector<1x128xf32>
    %cst_89 = arith.constant 0.000000e+00 : f32
    %230 = vector.broadcast %cst_89 : f32 to vector<1x128xf32>
    %231 = arith.select %219, %230, %218 : vector<1x128xi1>, vector<1x128xf32>
    %232 = arith.index_cast %c6_i32 : i32 to index
    %c0_90 = arith.constant 0 : index
    %233 = vector.load %arg4[%232, %c0_90] : memref<32x128xf32, #tpu.memory_space<vmem>>, vector<1x128xf32>
    tpu.vector_store %arg4[%232, %c0_90], %221 {strides = array<i32>} : memref<32x128xf32, #tpu.memory_space<vmem>>, vector<1x128xf32>,
    %234 = arith.index_cast %c6_i32 : i32 to index
    %c0_91 = arith.constant 0 : index
    %235 = vector.load %arg5[%234, %c0_91] : memref<32x128xf32, #tpu.memory_space<vmem>>, vector<1x128xf32>
    tpu.vector_store %arg5[%234, %c0_91], %231 {strides = array<i32>} : memref<32x128xf32, #tpu.memory_space<vmem>>, vector<1x128xf32>,
    %236 = arith.index_cast %c6_i32 : i32 to index
    %c0_92 = arith.constant 0 : index
    %237 = vector.load %arg6[%236, %c0_92] : memref<32x128xf32, #tpu.memory_space<vmem>>, vector<1x128xf32>
    tpu.vector_store %arg6[%236, %c0_92], %229 {strides = array<i32>} : memref<32x128xf32, #tpu.memory_space<vmem>>, vector<1x128xf32>,
    %c7_i32 = arith.constant 7 : i32
    %238 = arith.index_cast %c7_i32 : i32 to index
    %c0_93 = arith.constant 0 : index
    %239 = vector.load %arg7[%238, %c0_93] : memref<32x128xf32, #tpu.memory_space<vmem>>, vector<1x128xf32>
    %c1_i32_94 = arith.constant 1 : i32
    %240 = tpu.dynamic_rotate %221 by %c1_i32_94 dim 1 : vector<1x128xf32>, i32 -> vector<1x128xf32>
    %c127_i32_95 = arith.constant 127 : i32
    %241 = tpu.dynamic_rotate %221 by %c127_i32_95 dim 1 : vector<1x128xf32>, i32 -> vector<1x128xf32>
    %242 = arith.addf %240, %241 : vector<1x128xf32>
    %243 = arith.mulf %221, %4 : vector<1x128xf32>
    %244 = arith.mulf %242, %5 : vector<1x128xf32>
    %245 = arith.addf %243, %244 : vector<1x128xf32>
    %cst_96 = arith.constant 1.000000e+00 : f32
    %246 = vector.broadcast %cst_96 : f32 to vector<1x128xf32>
    %247 = arith.addf %246, %229 : vector<1x128xf32>
    %cst_97 = arith.constant 0.899999976 : f32
    %248 = vector.broadcast %cst_97 : f32 to vector<1x128xf32>
    %249 = arith.mulf %248, %231 : vector<1x128xf32>
    %250 = arith.addf %249, %239 : vector<1x128xf32>
    %251 = arith.addf %250, %245 : vector<1x128xf32>
    %252 = arith.cmpf ogt, %251, %247 : vector<1x128xf32>
    %253 = arith.extui %252 : vector<1x128xi1> to vector<1x128xi32>
    %254 = arith.sitofp %253 : vector<1x128xi32> to vector<1x128xf32>
    %cst_98 = arith.constant 0.899999976 : f32
    %255 = vector.broadcast %cst_98 : f32 to vector<1x128xf32>
    %256 = arith.mulf %255, %229 : vector<1x128xf32>
    %cst_99 = arith.constant 1.000000e+00 : f32
    %257 = vector.broadcast %cst_99 : f32 to vector<1x128xf32>
    %258 = arith.subf %257, %256 : vector<1x128xf32>
    %cst_100 = arith.constant 2.000000e-01 : f32
    %259 = vector.broadcast %cst_100 : f32 to vector<1x128xf32>
    %260 = arith.mulf %258, %259 : vector<1x128xf32>
    %261 = arith.mulf %260, %254 : vector<1x128xf32>
    %262 = arith.addf %256, %261 : vector<1x128xf32>
    %cst_101 = arith.constant 0.000000e+00 : f32
    %263 = vector.broadcast %cst_101 : f32 to vector<1x128xf32>
    %264 = arith.select %252, %263, %251 : vector<1x128xi1>, vector<1x128xf32>
    %265 = arith.index_cast %c7_i32 : i32 to index
    %c0_102 = arith.constant 0 : index
    %266 = vector.load %arg4[%265, %c0_102] : memref<32x128xf32, #tpu.memory_space<vmem>>, vector<1x128xf32>
    tpu.vector_store %arg4[%265, %c0_102], %254 {strides = array<i32>} : memref<32x128xf32, #tpu.memory_space<vmem>>, vector<1x128xf32>,
    %267 = arith.index_cast %c7_i32 : i32 to index
    %c0_103 = arith.constant 0 : index
    %268 = vector.load %arg5[%267, %c0_103] : memref<32x128xf32, #tpu.memory_space<vmem>>, vector<1x128xf32>
    tpu.vector_store %arg5[%267, %c0_103], %264 {strides = array<i32>} : memref<32x128xf32, #tpu.memory_space<vmem>>, vector<1x128xf32>,
    %269 = arith.index_cast %c7_i32 : i32 to index
    %c0_104 = arith.constant 0 : index
    %270 = vector.load %arg6[%269, %c0_104] : memref<32x128xf32, #tpu.memory_space<vmem>>, vector<1x128xf32>
    tpu.vector_store %arg6[%269, %c0_104], %262 {strides = array<i32>} : memref<32x128xf32, #tpu.memory_space<vmem>>, vector<1x128xf32>,
    %c8_i32 = arith.constant 8 : i32
    %271 = arith.index_cast %c8_i32 : i32 to index
    %c0_105 = arith.constant 0 : index
    %272 = vector.load %arg7[%271, %c0_105] : memref<32x128xf32, #tpu.memory_space<vmem>>, vector<1x128xf32>
    %c1_i32_106 = arith.constant 1 : i32
    %273 = tpu.dynamic_rotate %254 by %c1_i32_106 dim 1 : vector<1x128xf32>, i32 -> vector<1x128xf32>
    %c127_i32_107 = arith.constant 127 : i32
    %274 = tpu.dynamic_rotate %254 by %c127_i32_107 dim 1 : vector<1x128xf32>, i32 -> vector<1x128xf32>
    %275 = arith.addf %273, %274 : vector<1x128xf32>
    %276 = arith.mulf %254, %4 : vector<1x128xf32>
    %277 = arith.mulf %275, %5 : vector<1x128xf32>
    %278 = arith.addf %276, %277 : vector<1x128xf32>
    %cst_108 = arith.constant 1.000000e+00 : f32
    %279 = vector.broadcast %cst_108 : f32 to vector<1x128xf32>
    %280 = arith.addf %279, %262 : vector<1x128xf32>
    %cst_109 = arith.constant 0.899999976 : f32
    %281 = vector.broadcast %cst_109 : f32 to vector<1x128xf32>
    %282 = arith.mulf %281, %264 : vector<1x128xf32>
    %283 = arith.addf %282, %272 : vector<1x128xf32>
    %284 = arith.addf %283, %278 : vector<1x128xf32>
    %285 = arith.cmpf ogt, %284, %280 : vector<1x128xf32>
    %286 = arith.extui %285 : vector<1x128xi1> to vector<1x128xi32>
    %287 = arith.sitofp %286 : vector<1x128xi32> to vector<1x128xf32>
    %cst_110 = arith.constant 0.899999976 : f32
    %288 = vector.broadcast %cst_110 : f32 to vector<1x128xf32>
    %289 = arith.mulf %288, %262 : vector<1x128xf32>
    %cst_111 = arith.constant 1.000000e+00 : f32
    %290 = vector.broadcast %cst_111 : f32 to vector<1x128xf32>
    %291 = arith.subf %290, %289 : vector<1x128xf32>
    %cst_112 = arith.constant 2.000000e-01 : f32
    %292 = vector.broadcast %cst_112 : f32 to vector<1x128xf32>
    %293 = arith.mulf %291, %292 : vector<1x128xf32>
    %294 = arith.mulf %293, %287 : vector<1x128xf32>
    %295 = arith.addf %289, %294 : vector<1x128xf32>
    %cst_113 = arith.constant 0.000000e+00 : f32
    %296 = vector.broadcast %cst_113 : f32 to vector<1x128xf32>
    %297 = arith.select %285, %296, %284 : vector<1x128xi1>, vector<1x128xf32>
    %298 = arith.index_cast %c8_i32 : i32 to index
    %c0_114 = arith.constant 0 : index
    %299 = vector.load %arg4[%298, %c0_114] : memref<32x128xf32, #tpu.memory_space<vmem>>, vector<1x128xf32>
    tpu.vector_store %arg4[%298, %c0_114], %287 {strides = array<i32>} : memref<32x128xf32, #tpu.memory_space<vmem>>, vector<1x128xf32>,
    %300 = arith.index_cast %c8_i32 : i32 to index
    %c0_115 = arith.constant 0 : index
    %301 = vector.load %arg5[%300, %c0_115] : memref<32x128xf32, #tpu.memory_space<vmem>>, vector<1x128xf32>
    tpu.vector_store %arg5[%300, %c0_115], %297 {strides = array<i32>} : memref<32x128xf32, #tpu.memory_space<vmem>>, vector<1x128xf32>,
    %302 = arith.index_cast %c8_i32 : i32 to index
    %c0_116 = arith.constant 0 : index
    %303 = vector.load %arg6[%302, %c0_116] : memref<32x128xf32, #tpu.memory_space<vmem>>, vector<1x128xf32>
    tpu.vector_store %arg6[%302, %c0_116], %295 {strides = array<i32>} : memref<32x128xf32, #tpu.memory_space<vmem>>, vector<1x128xf32>,
    %c9_i32 = arith.constant 9 : i32
    %304 = arith.index_cast %c9_i32 : i32 to index
    %c0_117 = arith.constant 0 : index
    %305 = vector.load %arg7[%304, %c0_117] : memref<32x128xf32, #tpu.memory_space<vmem>>, vector<1x128xf32>
    %c1_i32_118 = arith.constant 1 : i32
    %306 = tpu.dynamic_rotate %287 by %c1_i32_118 dim 1 : vector<1x128xf32>, i32 -> vector<1x128xf32>
    %c127_i32_119 = arith.constant 127 : i32
    %307 = tpu.dynamic_rotate %287 by %c127_i32_119 dim 1 : vector<1x128xf32>, i32 -> vector<1x128xf32>
    %308 = arith.addf %306, %307 : vector<1x128xf32>
    %309 = arith.mulf %287, %4 : vector<1x128xf32>
    %310 = arith.mulf %308, %5 : vector<1x128xf32>
    %311 = arith.addf %309, %310 : vector<1x128xf32>
    %cst_120 = arith.constant 1.000000e+00 : f32
    %312 = vector.broadcast %cst_120 : f32 to vector<1x128xf32>
    %313 = arith.addf %312, %295 : vector<1x128xf32>
    %cst_121 = arith.constant 0.899999976 : f32
    %314 = vector.broadcast %cst_121 : f32 to vector<1x128xf32>
    %315 = arith.mulf %314, %297 : vector<1x128xf32>
    %316 = arith.addf %315, %305 : vector<1x128xf32>
    %317 = arith.addf %316, %311 : vector<1x128xf32>
    %318 = arith.cmpf ogt, %317, %313 : vector<1x128xf32>
    %319 = arith.extui %318 : vector<1x128xi1> to vector<1x128xi32>
    %320 = arith.sitofp %319 : vector<1x128xi32> to vector<1x128xf32>
    %cst_122 = arith.constant 0.899999976 : f32
    %321 = vector.broadcast %cst_122 : f32 to vector<1x128xf32>
    %322 = arith.mulf %321, %295 : vector<1x128xf32>
    %cst_123 = arith.constant 1.000000e+00 : f32
    %323 = vector.broadcast %cst_123 : f32 to vector<1x128xf32>
    %324 = arith.subf %323, %322 : vector<1x128xf32>
    %cst_124 = arith.constant 2.000000e-01 : f32
    %325 = vector.broadcast %cst_124 : f32 to vector<1x128xf32>
    %326 = arith.mulf %324, %325 : vector<1x128xf32>
    %327 = arith.mulf %326, %320 : vector<1x128xf32>
    %328 = arith.addf %322, %327 : vector<1x128xf32>
    %cst_125 = arith.constant 0.000000e+00 : f32
    %329 = vector.broadcast %cst_125 : f32 to vector<1x128xf32>
    %330 = arith.select %318, %329, %317 : vector<1x128xi1>, vector<1x128xf32>
    %331 = arith.index_cast %c9_i32 : i32 to index
    %c0_126 = arith.constant 0 : index
    %332 = vector.load %arg4[%331, %c0_126] : memref<32x128xf32, #tpu.memory_space<vmem>>, vector<1x128xf32>
    tpu.vector_store %arg4[%331, %c0_126], %320 {strides = array<i32>} : memref<32x128xf32, #tpu.memory_space<vmem>>, vector<1x128xf32>,
    %333 = arith.index_cast %c9_i32 : i32 to index
    %c0_127 = arith.constant 0 : index
    %334 = vector.load %arg5[%333, %c0_127] : memref<32x128xf32, #tpu.memory_space<vmem>>, vector<1x128xf32>
    tpu.vector_store %arg5[%333, %c0_127], %330 {strides = array<i32>} : memref<32x128xf32, #tpu.memory_space<vmem>>, vector<1x128xf32>,
    %335 = arith.index_cast %c9_i32 : i32 to index
    %c0_128 = arith.constant 0 : index
    %336 = vector.load %arg6[%335, %c0_128] : memref<32x128xf32, #tpu.memory_space<vmem>>, vector<1x128xf32>
    tpu.vector_store %arg6[%335, %c0_128], %328 {strides = array<i32>} : memref<32x128xf32, #tpu.memory_space<vmem>>, vector<1x128xf32>,
    %c10_i32 = arith.constant 10 : i32
    %337 = arith.index_cast %c10_i32 : i32 to index
    %c0_129 = arith.constant 0 : index
    %338 = vector.load %arg7[%337, %c0_129] : memref<32x128xf32, #tpu.memory_space<vmem>>, vector<1x128xf32>
    %c1_i32_130 = arith.constant 1 : i32
    %339 = tpu.dynamic_rotate %320 by %c1_i32_130 dim 1 : vector<1x128xf32>, i32 -> vector<1x128xf32>
    %c127_i32_131 = arith.constant 127 : i32
    %340 = tpu.dynamic_rotate %320 by %c127_i32_131 dim 1 : vector<1x128xf32>, i32 -> vector<1x128xf32>
    %341 = arith.addf %339, %340 : vector<1x128xf32>
    %342 = arith.mulf %320, %4 : vector<1x128xf32>
    %343 = arith.mulf %341, %5 : vector<1x128xf32>
    %344 = arith.addf %342, %343 : vector<1x128xf32>
    %cst_132 = arith.constant 1.000000e+00 : f32
    %345 = vector.broadcast %cst_132 : f32 to vector<1x128xf32>
    %346 = arith.addf %345, %328 : vector<1x128xf32>
    %cst_133 = arith.constant 0.899999976 : f32
    %347 = vector.broadcast %cst_133 : f32 to vector<1x128xf32>
    %348 = arith.mulf %347, %330 : vector<1x128xf32>
    %349 = arith.addf %348, %338 : vector<1x128xf32>
    %350 = arith.addf %349, %344 : vector<1x128xf32>
    %351 = arith.cmpf ogt, %350, %346 : vector<1x128xf32>
    %352 = arith.extui %351 : vector<1x128xi1> to vector<1x128xi32>
    %353 = arith.sitofp %352 : vector<1x128xi32> to vector<1x128xf32>
    %cst_134 = arith.constant 0.899999976 : f32
    %354 = vector.broadcast %cst_134 : f32 to vector<1x128xf32>
    %355 = arith.mulf %354, %328 : vector<1x128xf32>
    %cst_135 = arith.constant 1.000000e+00 : f32
    %356 = vector.broadcast %cst_135 : f32 to vector<1x128xf32>
    %357 = arith.subf %356, %355 : vector<1x128xf32>
    %cst_136 = arith.constant 2.000000e-01 : f32
    %358 = vector.broadcast %cst_136 : f32 to vector<1x128xf32>
    %359 = arith.mulf %357, %358 : vector<1x128xf32>
    %360 = arith.mulf %359, %353 : vector<1x128xf32>
    %361 = arith.addf %355, %360 : vector<1x128xf32>
    %cst_137 = arith.constant 0.000000e+00 : f32
    %362 = vector.broadcast %cst_137 : f32 to vector<1x128xf32>
    %363 = arith.select %351, %362, %350 : vector<1x128xi1>, vector<1x128xf32>
    %364 = arith.index_cast %c10_i32 : i32 to index
    %c0_138 = arith.constant 0 : index
    %365 = vector.load %arg4[%364, %c0_138] : memref<32x128xf32, #tpu.memory_space<vmem>>, vector<1x128xf32>
    tpu.vector_store %arg4[%364, %c0_138], %353 {strides = array<i32>} : memref<32x128xf32, #tpu.memory_space<vmem>>, vector<1x128xf32>,
    %366 = arith.index_cast %c10_i32 : i32 to index
    %c0_139 = arith.constant 0 : index
    %367 = vector.load %arg5[%366, %c0_139] : memref<32x128xf32, #tpu.memory_space<vmem>>, vector<1x128xf32>
    tpu.vector_store %arg5[%366, %c0_139], %363 {strides = array<i32>} : memref<32x128xf32, #tpu.memory_space<vmem>>, vector<1x128xf32>,
    %368 = arith.index_cast %c10_i32 : i32 to index
    %c0_140 = arith.constant 0 : index
    %369 = vector.load %arg6[%368, %c0_140] : memref<32x128xf32, #tpu.memory_space<vmem>>, vector<1x128xf32>
    tpu.vector_store %arg6[%368, %c0_140], %361 {strides = array<i32>} : memref<32x128xf32, #tpu.memory_space<vmem>>, vector<1x128xf32>,
    %c11_i32 = arith.constant 11 : i32
    %370 = arith.index_cast %c11_i32 : i32 to index
    %c0_141 = arith.constant 0 : index
    %371 = vector.load %arg7[%370, %c0_141] : memref<32x128xf32, #tpu.memory_space<vmem>>, vector<1x128xf32>
    %c1_i32_142 = arith.constant 1 : i32
    %372 = tpu.dynamic_rotate %353 by %c1_i32_142 dim 1 : vector<1x128xf32>, i32 -> vector<1x128xf32>
    %c127_i32_143 = arith.constant 127 : i32
    %373 = tpu.dynamic_rotate %353 by %c127_i32_143 dim 1 : vector<1x128xf32>, i32 -> vector<1x128xf32>
    %374 = arith.addf %372, %373 : vector<1x128xf32>
    %375 = arith.mulf %353, %4 : vector<1x128xf32>
    %376 = arith.mulf %374, %5 : vector<1x128xf32>
    %377 = arith.addf %375, %376 : vector<1x128xf32>
    %cst_144 = arith.constant 1.000000e+00 : f32
    %378 = vector.broadcast %cst_144 : f32 to vector<1x128xf32>
    %379 = arith.addf %378, %361 : vector<1x128xf32>
    %cst_145 = arith.constant 0.899999976 : f32
    %380 = vector.broadcast %cst_145 : f32 to vector<1x128xf32>
    %381 = arith.mulf %380, %363 : vector<1x128xf32>
    %382 = arith.addf %381, %371 : vector<1x128xf32>
    %383 = arith.addf %382, %377 : vector<1x128xf32>
    %384 = arith.cmpf ogt, %383, %379 : vector<1x128xf32>
    %385 = arith.extui %384 : vector<1x128xi1> to vector<1x128xi32>
    %386 = arith.sitofp %385 : vector<1x128xi32> to vector<1x128xf32>
    %cst_146 = arith.constant 0.899999976 : f32
    %387 = vector.broadcast %cst_146 : f32 to vector<1x128xf32>
    %388 = arith.mulf %387, %361 : vector<1x128xf32>
    %cst_147 = arith.constant 1.000000e+00 : f32
    %389 = vector.broadcast %cst_147 : f32 to vector<1x128xf32>
    %390 = arith.subf %389, %388 : vector<1x128xf32>
    %cst_148 = arith.constant 2.000000e-01 : f32
    %391 = vector.broadcast %cst_148 : f32 to vector<1x128xf32>
    %392 = arith.mulf %390, %391 : vector<1x128xf32>
    %393 = arith.mulf %392, %386 : vector<1x128xf32>
    %394 = arith.addf %388, %393 : vector<1x128xf32>
    %cst_149 = arith.constant 0.000000e+00 : f32
    %395 = vector.broadcast %cst_149 : f32 to vector<1x128xf32>
    %396 = arith.select %384, %395, %383 : vector<1x128xi1>, vector<1x128xf32>
    %397 = arith.index_cast %c11_i32 : i32 to index
    %c0_150 = arith.constant 0 : index
    %398 = vector.load %arg4[%397, %c0_150] : memref<32x128xf32, #tpu.memory_space<vmem>>, vector<1x128xf32>
    tpu.vector_store %arg4[%397, %c0_150], %386 {strides = array<i32>} : memref<32x128xf32, #tpu.memory_space<vmem>>, vector<1x128xf32>,
    %399 = arith.index_cast %c11_i32 : i32 to index
    %c0_151 = arith.constant 0 : index
    %400 = vector.load %arg5[%399, %c0_151] : memref<32x128xf32, #tpu.memory_space<vmem>>, vector<1x128xf32>
    tpu.vector_store %arg5[%399, %c0_151], %396 {strides = array<i32>} : memref<32x128xf32, #tpu.memory_space<vmem>>, vector<1x128xf32>,
    %401 = arith.index_cast %c11_i32 : i32 to index
    %c0_152 = arith.constant 0 : index
    %402 = vector.load %arg6[%401, %c0_152] : memref<32x128xf32, #tpu.memory_space<vmem>>, vector<1x128xf32>
    tpu.vector_store %arg6[%401, %c0_152], %394 {strides = array<i32>} : memref<32x128xf32, #tpu.memory_space<vmem>>, vector<1x128xf32>,
    %c12_i32 = arith.constant 12 : i32
    %403 = arith.index_cast %c12_i32 : i32 to index
    %c0_153 = arith.constant 0 : index
    %404 = vector.load %arg7[%403, %c0_153] : memref<32x128xf32, #tpu.memory_space<vmem>>, vector<1x128xf32>
    %c1_i32_154 = arith.constant 1 : i32
    %405 = tpu.dynamic_rotate %386 by %c1_i32_154 dim 1 : vector<1x128xf32>, i32 -> vector<1x128xf32>
    %c127_i32_155 = arith.constant 127 : i32
    %406 = tpu.dynamic_rotate %386 by %c127_i32_155 dim 1 : vector<1x128xf32>, i32 -> vector<1x128xf32>
    %407 = arith.addf %405, %406 : vector<1x128xf32>
    %408 = arith.mulf %386, %4 : vector<1x128xf32>
    %409 = arith.mulf %407, %5 : vector<1x128xf32>
    %410 = arith.addf %408, %409 : vector<1x128xf32>
    %cst_156 = arith.constant 1.000000e+00 : f32
    %411 = vector.broadcast %cst_156 : f32 to vector<1x128xf32>
    %412 = arith.addf %411, %394 : vector<1x128xf32>
    %cst_157 = arith.constant 0.899999976 : f32
    %413 = vector.broadcast %cst_157 : f32 to vector<1x128xf32>
    %414 = arith.mulf %413, %396 : vector<1x128xf32>
    %415 = arith.addf %414, %404 : vector<1x128xf32>
    %416 = arith.addf %415, %410 : vector<1x128xf32>
    %417 = arith.cmpf ogt, %416, %412 : vector<1x128xf32>
    %418 = arith.extui %417 : vector<1x128xi1> to vector<1x128xi32>
    %419 = arith.sitofp %418 : vector<1x128xi32> to vector<1x128xf32>
    %cst_158 = arith.constant 0.899999976 : f32
    %420 = vector.broadcast %cst_158 : f32 to vector<1x128xf32>
    %421 = arith.mulf %420, %394 : vector<1x128xf32>
    %cst_159 = arith.constant 1.000000e+00 : f32
    %422 = vector.broadcast %cst_159 : f32 to vector<1x128xf32>
    %423 = arith.subf %422, %421 : vector<1x128xf32>
    %cst_160 = arith.constant 2.000000e-01 : f32
    %424 = vector.broadcast %cst_160 : f32 to vector<1x128xf32>
    %425 = arith.mulf %423, %424 : vector<1x128xf32>
    %426 = arith.mulf %425, %419 : vector<1x128xf32>
    %427 = arith.addf %421, %426 : vector<1x128xf32>
    %cst_161 = arith.constant 0.000000e+00 : f32
    %428 = vector.broadcast %cst_161 : f32 to vector<1x128xf32>
    %429 = arith.select %417, %428, %416 : vector<1x128xi1>, vector<1x128xf32>
    %430 = arith.index_cast %c12_i32 : i32 to index
    %c0_162 = arith.constant 0 : index
    %431 = vector.load %arg4[%430, %c0_162] : memref<32x128xf32, #tpu.memory_space<vmem>>, vector<1x128xf32>
    tpu.vector_store %arg4[%430, %c0_162], %419 {strides = array<i32>} : memref<32x128xf32, #tpu.memory_space<vmem>>, vector<1x128xf32>,
    %432 = arith.index_cast %c12_i32 : i32 to index
    %c0_163 = arith.constant 0 : index
    %433 = vector.load %arg5[%432, %c0_163] : memref<32x128xf32, #tpu.memory_space<vmem>>, vector<1x128xf32>
    tpu.vector_store %arg5[%432, %c0_163], %429 {strides = array<i32>} : memref<32x128xf32, #tpu.memory_space<vmem>>, vector<1x128xf32>,
    %434 = arith.index_cast %c12_i32 : i32 to index
    %c0_164 = arith.constant 0 : index
    %435 = vector.load %arg6[%434, %c0_164] : memref<32x128xf32, #tpu.memory_space<vmem>>, vector<1x128xf32>
    tpu.vector_store %arg6[%434, %c0_164], %427 {strides = array<i32>} : memref<32x128xf32, #tpu.memory_space<vmem>>, vector<1x128xf32>,
    %c13_i32 = arith.constant 13 : i32
    %436 = arith.index_cast %c13_i32 : i32 to index
    %c0_165 = arith.constant 0 : index
    %437 = vector.load %arg7[%436, %c0_165] : memref<32x128xf32, #tpu.memory_space<vmem>>, vector<1x128xf32>
    %c1_i32_166 = arith.constant 1 : i32
    %438 = tpu.dynamic_rotate %419 by %c1_i32_166 dim 1 : vector<1x128xf32>, i32 -> vector<1x128xf32>
    %c127_i32_167 = arith.constant 127 : i32
    %439 = tpu.dynamic_rotate %419 by %c127_i32_167 dim 1 : vector<1x128xf32>, i32 -> vector<1x128xf32>
    %440 = arith.addf %438, %439 : vector<1x128xf32>
    %441 = arith.mulf %419, %4 : vector<1x128xf32>
    %442 = arith.mulf %440, %5 : vector<1x128xf32>
    %443 = arith.addf %441, %442 : vector<1x128xf32>
    %cst_168 = arith.constant 1.000000e+00 : f32
    %444 = vector.broadcast %cst_168 : f32 to vector<1x128xf32>
    %445 = arith.addf %444, %427 : vector<1x128xf32>
    %cst_169 = arith.constant 0.899999976 : f32
    %446 = vector.broadcast %cst_169 : f32 to vector<1x128xf32>
    %447 = arith.mulf %446, %429 : vector<1x128xf32>
    %448 = arith.addf %447, %437 : vector<1x128xf32>
    %449 = arith.addf %448, %443 : vector<1x128xf32>
    %450 = arith.cmpf ogt, %449, %445 : vector<1x128xf32>
    %451 = arith.extui %450 : vector<1x128xi1> to vector<1x128xi32>
    %452 = arith.sitofp %451 : vector<1x128xi32> to vector<1x128xf32>
    %cst_170 = arith.constant 0.899999976 : f32
    %453 = vector.broadcast %cst_170 : f32 to vector<1x128xf32>
    %454 = arith.mulf %453, %427 : vector<1x128xf32>
    %cst_171 = arith.constant 1.000000e+00 : f32
    %455 = vector.broadcast %cst_171 : f32 to vector<1x128xf32>
    %456 = arith.subf %455, %454 : vector<1x128xf32>
    %cst_172 = arith.constant 2.000000e-01 : f32
    %457 = vector.broadcast %cst_172 : f32 to vector<1x128xf32>
    %458 = arith.mulf %456, %457 : vector<1x128xf32>
    %459 = arith.mulf %458, %452 : vector<1x128xf32>
    %460 = arith.addf %454, %459 : vector<1x128xf32>
    %cst_173 = arith.constant 0.000000e+00 : f32
    %461 = vector.broadcast %cst_173 : f32 to vector<1x128xf32>
    %462 = arith.select %450, %461, %449 : vector<1x128xi1>, vector<1x128xf32>
    %463 = arith.index_cast %c13_i32 : i32 to index
    %c0_174 = arith.constant 0 : index
    %464 = vector.load %arg4[%463, %c0_174] : memref<32x128xf32, #tpu.memory_space<vmem>>, vector<1x128xf32>
    tpu.vector_store %arg4[%463, %c0_174], %452 {strides = array<i32>} : memref<32x128xf32, #tpu.memory_space<vmem>>, vector<1x128xf32>,
    %465 = arith.index_cast %c13_i32 : i32 to index
    %c0_175 = arith.constant 0 : index
    %466 = vector.load %arg5[%465, %c0_175] : memref<32x128xf32, #tpu.memory_space<vmem>>, vector<1x128xf32>
    tpu.vector_store %arg5[%465, %c0_175], %462 {strides = array<i32>} : memref<32x128xf32, #tpu.memory_space<vmem>>, vector<1x128xf32>,
    %467 = arith.index_cast %c13_i32 : i32 to index
    %c0_176 = arith.constant 0 : index
    %468 = vector.load %arg6[%467, %c0_176] : memref<32x128xf32, #tpu.memory_space<vmem>>, vector<1x128xf32>
    tpu.vector_store %arg6[%467, %c0_176], %460 {strides = array<i32>} : memref<32x128xf32, #tpu.memory_space<vmem>>, vector<1x128xf32>,
    %c14_i32 = arith.constant 14 : i32
    %469 = arith.index_cast %c14_i32 : i32 to index
    %c0_177 = arith.constant 0 : index
    %470 = vector.load %arg7[%469, %c0_177] : memref<32x128xf32, #tpu.memory_space<vmem>>, vector<1x128xf32>
    %c1_i32_178 = arith.constant 1 : i32
    %471 = tpu.dynamic_rotate %452 by %c1_i32_178 dim 1 : vector<1x128xf32>, i32 -> vector<1x128xf32>
    %c127_i32_179 = arith.constant 127 : i32
    %472 = tpu.dynamic_rotate %452 by %c127_i32_179 dim 1 : vector<1x128xf32>, i32 -> vector<1x128xf32>
    %473 = arith.addf %471, %472 : vector<1x128xf32>
    %474 = arith.mulf %452, %4 : vector<1x128xf32>
    %475 = arith.mulf %473, %5 : vector<1x128xf32>
    %476 = arith.addf %474, %475 : vector<1x128xf32>
    %cst_180 = arith.constant 1.000000e+00 : f32
    %477 = vector.broadcast %cst_180 : f32 to vector<1x128xf32>
    %478 = arith.addf %477, %460 : vector<1x128xf32>
    %cst_181 = arith.constant 0.899999976 : f32
    %479 = vector.broadcast %cst_181 : f32 to vector<1x128xf32>
    %480 = arith.mulf %479, %462 : vector<1x128xf32>
    %481 = arith.addf %480, %470 : vector<1x128xf32>
    %482 = arith.addf %481, %476 : vector<1x128xf32>
    %483 = arith.cmpf ogt, %482, %478 : vector<1x128xf32>
    %484 = arith.extui %483 : vector<1x128xi1> to vector<1x128xi32>
    %485 = arith.sitofp %484 : vector<1x128xi32> to vector<1x128xf32>
    %cst_182 = arith.constant 0.899999976 : f32
    %486 = vector.broadcast %cst_182 : f32 to vector<1x128xf32>
    %487 = arith.mulf %486, %460 : vector<1x128xf32>
    %cst_183 = arith.constant 1.000000e+00 : f32
    %488 = vector.broadcast %cst_183 : f32 to vector<1x128xf32>
    %489 = arith.subf %488, %487 : vector<1x128xf32>
    %cst_184 = arith.constant 2.000000e-01 : f32
    %490 = vector.broadcast %cst_184 : f32 to vector<1x128xf32>
    %491 = arith.mulf %489, %490 : vector<1x128xf32>
    %492 = arith.mulf %491, %485 : vector<1x128xf32>
    %493 = arith.addf %487, %492 : vector<1x128xf32>
    %cst_185 = arith.constant 0.000000e+00 : f32
    %494 = vector.broadcast %cst_185 : f32 to vector<1x128xf32>
    %495 = arith.select %483, %494, %482 : vector<1x128xi1>, vector<1x128xf32>
    %496 = arith.index_cast %c14_i32 : i32 to index
    %c0_186 = arith.constant 0 : index
    %497 = vector.load %arg4[%496, %c0_186] : memref<32x128xf32, #tpu.memory_space<vmem>>, vector<1x128xf32>
    tpu.vector_store %arg4[%496, %c0_186], %485 {strides = array<i32>} : memref<32x128xf32, #tpu.memory_space<vmem>>, vector<1x128xf32>,
    %498 = arith.index_cast %c14_i32 : i32 to index
    %c0_187 = arith.constant 0 : index
    %499 = vector.load %arg5[%498, %c0_187] : memref<32x128xf32, #tpu.memory_space<vmem>>, vector<1x128xf32>
    tpu.vector_store %arg5[%498, %c0_187], %495 {strides = array<i32>} : memref<32x128xf32, #tpu.memory_space<vmem>>, vector<1x128xf32>,
    %500 = arith.index_cast %c14_i32 : i32 to index
    %c0_188 = arith.constant 0 : index
    %501 = vector.load %arg6[%500, %c0_188] : memref<32x128xf32, #tpu.memory_space<vmem>>, vector<1x128xf32>
    tpu.vector_store %arg6[%500, %c0_188], %493 {strides = array<i32>} : memref<32x128xf32, #tpu.memory_space<vmem>>, vector<1x128xf32>,
    %c15_i32 = arith.constant 15 : i32
    %502 = arith.index_cast %c15_i32 : i32 to index
    %c0_189 = arith.constant 0 : index
    %503 = vector.load %arg7[%502, %c0_189] : memref<32x128xf32, #tpu.memory_space<vmem>>, vector<1x128xf32>
    %c1_i32_190 = arith.constant 1 : i32
    %504 = tpu.dynamic_rotate %485 by %c1_i32_190 dim 1 : vector<1x128xf32>, i32 -> vector<1x128xf32>
    %c127_i32_191 = arith.constant 127 : i32
    %505 = tpu.dynamic_rotate %485 by %c127_i32_191 dim 1 : vector<1x128xf32>, i32 -> vector<1x128xf32>
    %506 = arith.addf %504, %505 : vector<1x128xf32>
    %507 = arith.mulf %485, %4 : vector<1x128xf32>
    %508 = arith.mulf %506, %5 : vector<1x128xf32>
    %509 = arith.addf %507, %508 : vector<1x128xf32>
    %cst_192 = arith.constant 1.000000e+00 : f32
    %510 = vector.broadcast %cst_192 : f32 to vector<1x128xf32>
    %511 = arith.addf %510, %493 : vector<1x128xf32>
    %cst_193 = arith.constant 0.899999976 : f32
    %512 = vector.broadcast %cst_193 : f32 to vector<1x128xf32>
    %513 = arith.mulf %512, %495 : vector<1x128xf32>
    %514 = arith.addf %513, %503 : vector<1x128xf32>
    %515 = arith.addf %514, %509 : vector<1x128xf32>
    %516 = arith.cmpf ogt, %515, %511 : vector<1x128xf32>
    %517 = arith.extui %516 : vector<1x128xi1> to vector<1x128xi32>
    %518 = arith.sitofp %517 : vector<1x128xi32> to vector<1x128xf32>
    %cst_194 = arith.constant 0.899999976 : f32
    %519 = vector.broadcast %cst_194 : f32 to vector<1x128xf32>
    %520 = arith.mulf %519, %493 : vector<1x128xf32>
    %cst_195 = arith.constant 1.000000e+00 : f32
    %521 = vector.broadcast %cst_195 : f32 to vector<1x128xf32>
    %522 = arith.subf %521, %520 : vector<1x128xf32>
    %cst_196 = arith.constant 2.000000e-01 : f32
    %523 = vector.broadcast %cst_196 : f32 to vector<1x128xf32>
    %524 = arith.mulf %522, %523 : vector<1x128xf32>
    %525 = arith.mulf %524, %518 : vector<1x128xf32>
    %526 = arith.addf %520, %525 : vector<1x128xf32>
    %cst_197 = arith.constant 0.000000e+00 : f32
    %527 = vector.broadcast %cst_197 : f32 to vector<1x128xf32>
    %528 = arith.select %516, %527, %515 : vector<1x128xi1>, vector<1x128xf32>
    %529 = arith.index_cast %c15_i32 : i32 to index
    %c0_198 = arith.constant 0 : index
    %530 = vector.load %arg4[%529, %c0_198] : memref<32x128xf32, #tpu.memory_space<vmem>>, vector<1x128xf32>
    tpu.vector_store %arg4[%529, %c0_198], %518 {strides = array<i32>} : memref<32x128xf32, #tpu.memory_space<vmem>>, vector<1x128xf32>,
    %531 = arith.index_cast %c15_i32 : i32 to index
    %c0_199 = arith.constant 0 : index
    %532 = vector.load %arg5[%531, %c0_199] : memref<32x128xf32, #tpu.memory_space<vmem>>, vector<1x128xf32>
    tpu.vector_store %arg5[%531, %c0_199], %528 {strides = array<i32>} : memref<32x128xf32, #tpu.memory_space<vmem>>, vector<1x128xf32>,
    %533 = arith.index_cast %c15_i32 : i32 to index
    %c0_200 = arith.constant 0 : index
    %534 = vector.load %arg6[%533, %c0_200] : memref<32x128xf32, #tpu.memory_space<vmem>>, vector<1x128xf32>
    tpu.vector_store %arg6[%533, %c0_200], %526 {strides = array<i32>} : memref<32x128xf32, #tpu.memory_space<vmem>>, vector<1x128xf32>,
    %c16_i32 = arith.constant 16 : i32
    %535 = arith.index_cast %c16_i32 : i32 to index
    %c0_201 = arith.constant 0 : index
    %536 = vector.load %arg7[%535, %c0_201] : memref<32x128xf32, #tpu.memory_space<vmem>>, vector<1x128xf32>
    %c1_i32_202 = arith.constant 1 : i32
    %537 = tpu.dynamic_rotate %518 by %c1_i32_202 dim 1 : vector<1x128xf32>, i32 -> vector<1x128xf32>
    %c127_i32_203 = arith.constant 127 : i32
    %538 = tpu.dynamic_rotate %518 by %c127_i32_203 dim 1 : vector<1x128xf32>, i32 -> vector<1x128xf32>
    %539 = arith.addf %537, %538 : vector<1x128xf32>
    %540 = arith.mulf %518, %4 : vector<1x128xf32>
    %541 = arith.mulf %539, %5 : vector<1x128xf32>
    %542 = arith.addf %540, %541 : vector<1x128xf32>
    %cst_204 = arith.constant 1.000000e+00 : f32
    %543 = vector.broadcast %cst_204 : f32 to vector<1x128xf32>
    %544 = arith.addf %543, %526 : vector<1x128xf32>
    %cst_205 = arith.constant 0.899999976 : f32
    %545 = vector.broadcast %cst_205 : f32 to vector<1x128xf32>
    %546 = arith.mulf %545, %528 : vector<1x128xf32>
    %547 = arith.addf %546, %536 : vector<1x128xf32>
    %548 = arith.addf %547, %542 : vector<1x128xf32>
    %549 = arith.cmpf ogt, %548, %544 : vector<1x128xf32>
    %550 = arith.extui %549 : vector<1x128xi1> to vector<1x128xi32>
    %551 = arith.sitofp %550 : vector<1x128xi32> to vector<1x128xf32>
    %cst_206 = arith.constant 0.899999976 : f32
    %552 = vector.broadcast %cst_206 : f32 to vector<1x128xf32>
    %553 = arith.mulf %552, %526 : vector<1x128xf32>
    %cst_207 = arith.constant 1.000000e+00 : f32
    %554 = vector.broadcast %cst_207 : f32 to vector<1x128xf32>
    %555 = arith.subf %554, %553 : vector<1x128xf32>
    %cst_208 = arith.constant 2.000000e-01 : f32
    %556 = vector.broadcast %cst_208 : f32 to vector<1x128xf32>
    %557 = arith.mulf %555, %556 : vector<1x128xf32>
    %558 = arith.mulf %557, %551 : vector<1x128xf32>
    %559 = arith.addf %553, %558 : vector<1x128xf32>
    %cst_209 = arith.constant 0.000000e+00 : f32
    %560 = vector.broadcast %cst_209 : f32 to vector<1x128xf32>
    %561 = arith.select %549, %560, %548 : vector<1x128xi1>, vector<1x128xf32>
    %562 = arith.index_cast %c16_i32 : i32 to index
    %c0_210 = arith.constant 0 : index
    %563 = vector.load %arg4[%562, %c0_210] : memref<32x128xf32, #tpu.memory_space<vmem>>, vector<1x128xf32>
    tpu.vector_store %arg4[%562, %c0_210], %551 {strides = array<i32>} : memref<32x128xf32, #tpu.memory_space<vmem>>, vector<1x128xf32>,
    %564 = arith.index_cast %c16_i32 : i32 to index
    %c0_211 = arith.constant 0 : index
    %565 = vector.load %arg5[%564, %c0_211] : memref<32x128xf32, #tpu.memory_space<vmem>>, vector<1x128xf32>
    tpu.vector_store %arg5[%564, %c0_211], %561 {strides = array<i32>} : memref<32x128xf32, #tpu.memory_space<vmem>>, vector<1x128xf32>,
    %566 = arith.index_cast %c16_i32 : i32 to index
    %c0_212 = arith.constant 0 : index
    %567 = vector.load %arg6[%566, %c0_212] : memref<32x128xf32, #tpu.memory_space<vmem>>, vector<1x128xf32>
    tpu.vector_store %arg6[%566, %c0_212], %559 {strides = array<i32>} : memref<32x128xf32, #tpu.memory_space<vmem>>, vector<1x128xf32>,
    %c17_i32 = arith.constant 17 : i32
    %568 = arith.index_cast %c17_i32 : i32 to index
    %c0_213 = arith.constant 0 : index
    %569 = vector.load %arg7[%568, %c0_213] : memref<32x128xf32, #tpu.memory_space<vmem>>, vector<1x128xf32>
    %c1_i32_214 = arith.constant 1 : i32
    %570 = tpu.dynamic_rotate %551 by %c1_i32_214 dim 1 : vector<1x128xf32>, i32 -> vector<1x128xf32>
    %c127_i32_215 = arith.constant 127 : i32
    %571 = tpu.dynamic_rotate %551 by %c127_i32_215 dim 1 : vector<1x128xf32>, i32 -> vector<1x128xf32>
    %572 = arith.addf %570, %571 : vector<1x128xf32>
    %573 = arith.mulf %551, %4 : vector<1x128xf32>
    %574 = arith.mulf %572, %5 : vector<1x128xf32>
    %575 = arith.addf %573, %574 : vector<1x128xf32>
    %cst_216 = arith.constant 1.000000e+00 : f32
    %576 = vector.broadcast %cst_216 : f32 to vector<1x128xf32>
    %577 = arith.addf %576, %559 : vector<1x128xf32>
    %cst_217 = arith.constant 0.899999976 : f32
    %578 = vector.broadcast %cst_217 : f32 to vector<1x128xf32>
    %579 = arith.mulf %578, %561 : vector<1x128xf32>
    %580 = arith.addf %579, %569 : vector<1x128xf32>
    %581 = arith.addf %580, %575 : vector<1x128xf32>
    %582 = arith.cmpf ogt, %581, %577 : vector<1x128xf32>
    %583 = arith.extui %582 : vector<1x128xi1> to vector<1x128xi32>
    %584 = arith.sitofp %583 : vector<1x128xi32> to vector<1x128xf32>
    %cst_218 = arith.constant 0.899999976 : f32
    %585 = vector.broadcast %cst_218 : f32 to vector<1x128xf32>
    %586 = arith.mulf %585, %559 : vector<1x128xf32>
    %cst_219 = arith.constant 1.000000e+00 : f32
    %587 = vector.broadcast %cst_219 : f32 to vector<1x128xf32>
    %588 = arith.subf %587, %586 : vector<1x128xf32>
    %cst_220 = arith.constant 2.000000e-01 : f32
    %589 = vector.broadcast %cst_220 : f32 to vector<1x128xf32>
    %590 = arith.mulf %588, %589 : vector<1x128xf32>
    %591 = arith.mulf %590, %584 : vector<1x128xf32>
    %592 = arith.addf %586, %591 : vector<1x128xf32>
    %cst_221 = arith.constant 0.000000e+00 : f32
    %593 = vector.broadcast %cst_221 : f32 to vector<1x128xf32>
    %594 = arith.select %582, %593, %581 : vector<1x128xi1>, vector<1x128xf32>
    %595 = arith.index_cast %c17_i32 : i32 to index
    %c0_222 = arith.constant 0 : index
    %596 = vector.load %arg4[%595, %c0_222] : memref<32x128xf32, #tpu.memory_space<vmem>>, vector<1x128xf32>
    tpu.vector_store %arg4[%595, %c0_222], %584 {strides = array<i32>} : memref<32x128xf32, #tpu.memory_space<vmem>>, vector<1x128xf32>,
    %597 = arith.index_cast %c17_i32 : i32 to index
    %c0_223 = arith.constant 0 : index
    %598 = vector.load %arg5[%597, %c0_223] : memref<32x128xf32, #tpu.memory_space<vmem>>, vector<1x128xf32>
    tpu.vector_store %arg5[%597, %c0_223], %594 {strides = array<i32>} : memref<32x128xf32, #tpu.memory_space<vmem>>, vector<1x128xf32>,
    %599 = arith.index_cast %c17_i32 : i32 to index
    %c0_224 = arith.constant 0 : index
    %600 = vector.load %arg6[%599, %c0_224] : memref<32x128xf32, #tpu.memory_space<vmem>>, vector<1x128xf32>
    tpu.vector_store %arg6[%599, %c0_224], %592 {strides = array<i32>} : memref<32x128xf32, #tpu.memory_space<vmem>>, vector<1x128xf32>,
    %c18_i32 = arith.constant 18 : i32
    %601 = arith.index_cast %c18_i32 : i32 to index
    %c0_225 = arith.constant 0 : index
    %602 = vector.load %arg7[%601, %c0_225] : memref<32x128xf32, #tpu.memory_space<vmem>>, vector<1x128xf32>
    %c1_i32_226 = arith.constant 1 : i32
    %603 = tpu.dynamic_rotate %584 by %c1_i32_226 dim 1 : vector<1x128xf32>, i32 -> vector<1x128xf32>
    %c127_i32_227 = arith.constant 127 : i32
    %604 = tpu.dynamic_rotate %584 by %c127_i32_227 dim 1 : vector<1x128xf32>, i32 -> vector<1x128xf32>
    %605 = arith.addf %603, %604 : vector<1x128xf32>
    %606 = arith.mulf %584, %4 : vector<1x128xf32>
    %607 = arith.mulf %605, %5 : vector<1x128xf32>
    %608 = arith.addf %606, %607 : vector<1x128xf32>
    %cst_228 = arith.constant 1.000000e+00 : f32
    %609 = vector.broadcast %cst_228 : f32 to vector<1x128xf32>
    %610 = arith.addf %609, %592 : vector<1x128xf32>
    %cst_229 = arith.constant 0.899999976 : f32
    %611 = vector.broadcast %cst_229 : f32 to vector<1x128xf32>
    %612 = arith.mulf %611, %594 : vector<1x128xf32>
    %613 = arith.addf %612, %602 : vector<1x128xf32>
    %614 = arith.addf %613, %608 : vector<1x128xf32>
    %615 = arith.cmpf ogt, %614, %610 : vector<1x128xf32>
    %616 = arith.extui %615 : vector<1x128xi1> to vector<1x128xi32>
    %617 = arith.sitofp %616 : vector<1x128xi32> to vector<1x128xf32>
    %cst_230 = arith.constant 0.899999976 : f32
    %618 = vector.broadcast %cst_230 : f32 to vector<1x128xf32>
    %619 = arith.mulf %618, %592 : vector<1x128xf32>
    %cst_231 = arith.constant 1.000000e+00 : f32
    %620 = vector.broadcast %cst_231 : f32 to vector<1x128xf32>
    %621 = arith.subf %620, %619 : vector<1x128xf32>
    %cst_232 = arith.constant 2.000000e-01 : f32
    %622 = vector.broadcast %cst_232 : f32 to vector<1x128xf32>
    %623 = arith.mulf %621, %622 : vector<1x128xf32>
    %624 = arith.mulf %623, %617 : vector<1x128xf32>
    %625 = arith.addf %619, %624 : vector<1x128xf32>
    %cst_233 = arith.constant 0.000000e+00 : f32
    %626 = vector.broadcast %cst_233 : f32 to vector<1x128xf32>
    %627 = arith.select %615, %626, %614 : vector<1x128xi1>, vector<1x128xf32>
    %628 = arith.index_cast %c18_i32 : i32 to index
    %c0_234 = arith.constant 0 : index
    %629 = vector.load %arg4[%628, %c0_234] : memref<32x128xf32, #tpu.memory_space<vmem>>, vector<1x128xf32>
    tpu.vector_store %arg4[%628, %c0_234], %617 {strides = array<i32>} : memref<32x128xf32, #tpu.memory_space<vmem>>, vector<1x128xf32>,
    %630 = arith.index_cast %c18_i32 : i32 to index
    %c0_235 = arith.constant 0 : index
    %631 = vector.load %arg5[%630, %c0_235] : memref<32x128xf32, #tpu.memory_space<vmem>>, vector<1x128xf32>
    tpu.vector_store %arg5[%630, %c0_235], %627 {strides = array<i32>} : memref<32x128xf32, #tpu.memory_space<vmem>>, vector<1x128xf32>,
    %632 = arith.index_cast %c18_i32 : i32 to index
    %c0_236 = arith.constant 0 : index
    %633 = vector.load %arg6[%632, %c0_236] : memref<32x128xf32, #tpu.memory_space<vmem>>, vector<1x128xf32>
    tpu.vector_store %arg6[%632, %c0_236], %625 {strides = array<i32>} : memref<32x128xf32, #tpu.memory_space<vmem>>, vector<1x128xf32>,
    %c19_i32 = arith.constant 19 : i32
    %634 = arith.index_cast %c19_i32 : i32 to index
    %c0_237 = arith.constant 0 : index
    %635 = vector.load %arg7[%634, %c0_237] : memref<32x128xf32, #tpu.memory_space<vmem>>, vector<1x128xf32>
    %c1_i32_238 = arith.constant 1 : i32
    %636 = tpu.dynamic_rotate %617 by %c1_i32_238 dim 1 : vector<1x128xf32>, i32 -> vector<1x128xf32>
    %c127_i32_239 = arith.constant 127 : i32
    %637 = tpu.dynamic_rotate %617 by %c127_i32_239 dim 1 : vector<1x128xf32>, i32 -> vector<1x128xf32>
    %638 = arith.addf %636, %637 : vector<1x128xf32>
    %639 = arith.mulf %617, %4 : vector<1x128xf32>
    %640 = arith.mulf %638, %5 : vector<1x128xf32>
    %641 = arith.addf %639, %640 : vector<1x128xf32>
    %cst_240 = arith.constant 1.000000e+00 : f32
    %642 = vector.broadcast %cst_240 : f32 to vector<1x128xf32>
    %643 = arith.addf %642, %625 : vector<1x128xf32>
    %cst_241 = arith.constant 0.899999976 : f32
    %644 = vector.broadcast %cst_241 : f32 to vector<1x128xf32>
    %645 = arith.mulf %644, %627 : vector<1x128xf32>
    %646 = arith.addf %645, %635 : vector<1x128xf32>
    %647 = arith.addf %646, %641 : vector<1x128xf32>
    %648 = arith.cmpf ogt, %647, %643 : vector<1x128xf32>
    %649 = arith.extui %648 : vector<1x128xi1> to vector<1x128xi32>
    %650 = arith.sitofp %649 : vector<1x128xi32> to vector<1x128xf32>
    %cst_242 = arith.constant 0.899999976 : f32
    %651 = vector.broadcast %cst_242 : f32 to vector<1x128xf32>
    %652 = arith.mulf %651, %625 : vector<1x128xf32>
    %cst_243 = arith.constant 1.000000e+00 : f32
    %653 = vector.broadcast %cst_243 : f32 to vector<1x128xf32>
    %654 = arith.subf %653, %652 : vector<1x128xf32>
    %cst_244 = arith.constant 2.000000e-01 : f32
    %655 = vector.broadcast %cst_244 : f32 to vector<1x128xf32>
    %656 = arith.mulf %654, %655 : vector<1x128xf32>
    %657 = arith.mulf %656, %650 : vector<1x128xf32>
    %658 = arith.addf %652, %657 : vector<1x128xf32>
    %cst_245 = arith.constant 0.000000e+00 : f32
    %659 = vector.broadcast %cst_245 : f32 to vector<1x128xf32>
    %660 = arith.select %648, %659, %647 : vector<1x128xi1>, vector<1x128xf32>
    %661 = arith.index_cast %c19_i32 : i32 to index
    %c0_246 = arith.constant 0 : index
    %662 = vector.load %arg4[%661, %c0_246] : memref<32x128xf32, #tpu.memory_space<vmem>>, vector<1x128xf32>
    tpu.vector_store %arg4[%661, %c0_246], %650 {strides = array<i32>} : memref<32x128xf32, #tpu.memory_space<vmem>>, vector<1x128xf32>,
    %663 = arith.index_cast %c19_i32 : i32 to index
    %c0_247 = arith.constant 0 : index
    %664 = vector.load %arg5[%663, %c0_247] : memref<32x128xf32, #tpu.memory_space<vmem>>, vector<1x128xf32>
    tpu.vector_store %arg5[%663, %c0_247], %660 {strides = array<i32>} : memref<32x128xf32, #tpu.memory_space<vmem>>, vector<1x128xf32>,
    %665 = arith.index_cast %c19_i32 : i32 to index
    %c0_248 = arith.constant 0 : index
    %666 = vector.load %arg6[%665, %c0_248] : memref<32x128xf32, #tpu.memory_space<vmem>>, vector<1x128xf32>
    tpu.vector_store %arg6[%665, %c0_248], %658 {strides = array<i32>} : memref<32x128xf32, #tpu.memory_space<vmem>>, vector<1x128xf32>,
    %c20_i32 = arith.constant 20 : i32
    %667 = arith.index_cast %c20_i32 : i32 to index
    %c0_249 = arith.constant 0 : index
    %668 = vector.load %arg7[%667, %c0_249] : memref<32x128xf32, #tpu.memory_space<vmem>>, vector<1x128xf32>
    %c1_i32_250 = arith.constant 1 : i32
    %669 = tpu.dynamic_rotate %650 by %c1_i32_250 dim 1 : vector<1x128xf32>, i32 -> vector<1x128xf32>
    %c127_i32_251 = arith.constant 127 : i32
    %670 = tpu.dynamic_rotate %650 by %c127_i32_251 dim 1 : vector<1x128xf32>, i32 -> vector<1x128xf32>
    %671 = arith.addf %669, %670 : vector<1x128xf32>
    %672 = arith.mulf %650, %4 : vector<1x128xf32>
    %673 = arith.mulf %671, %5 : vector<1x128xf32>
    %674 = arith.addf %672, %673 : vector<1x128xf32>
    %cst_252 = arith.constant 1.000000e+00 : f32
    %675 = vector.broadcast %cst_252 : f32 to vector<1x128xf32>
    %676 = arith.addf %675, %658 : vector<1x128xf32>
    %cst_253 = arith.constant 0.899999976 : f32
    %677 = vector.broadcast %cst_253 : f32 to vector<1x128xf32>
    %678 = arith.mulf %677, %660 : vector<1x128xf32>
    %679 = arith.addf %678, %668 : vector<1x128xf32>
    %680 = arith.addf %679, %674 : vector<1x128xf32>
    %681 = arith.cmpf ogt, %680, %676 : vector<1x128xf32>
    %682 = arith.extui %681 : vector<1x128xi1> to vector<1x128xi32>
    %683 = arith.sitofp %682 : vector<1x128xi32> to vector<1x128xf32>
    %cst_254 = arith.constant 0.899999976 : f32
    %684 = vector.broadcast %cst_254 : f32 to vector<1x128xf32>
    %685 = arith.mulf %684, %658 : vector<1x128xf32>
    %cst_255 = arith.constant 1.000000e+00 : f32
    %686 = vector.broadcast %cst_255 : f32 to vector<1x128xf32>
    %687 = arith.subf %686, %685 : vector<1x128xf32>
    %cst_256 = arith.constant 2.000000e-01 : f32
    %688 = vector.broadcast %cst_256 : f32 to vector<1x128xf32>
    %689 = arith.mulf %687, %688 : vector<1x128xf32>
    %690 = arith.mulf %689, %683 : vector<1x128xf32>
    %691 = arith.addf %685, %690 : vector<1x128xf32>
    %cst_257 = arith.constant 0.000000e+00 : f32
    %692 = vector.broadcast %cst_257 : f32 to vector<1x128xf32>
    %693 = arith.select %681, %692, %680 : vector<1x128xi1>, vector<1x128xf32>
    %694 = arith.index_cast %c20_i32 : i32 to index
    %c0_258 = arith.constant 0 : index
    %695 = vector.load %arg4[%694, %c0_258] : memref<32x128xf32, #tpu.memory_space<vmem>>, vector<1x128xf32>
    tpu.vector_store %arg4[%694, %c0_258], %683 {strides = array<i32>} : memref<32x128xf32, #tpu.memory_space<vmem>>, vector<1x128xf32>,
    %696 = arith.index_cast %c20_i32 : i32 to index
    %c0_259 = arith.constant 0 : index
    %697 = vector.load %arg5[%696, %c0_259] : memref<32x128xf32, #tpu.memory_space<vmem>>, vector<1x128xf32>
    tpu.vector_store %arg5[%696, %c0_259], %693 {strides = array<i32>} : memref<32x128xf32, #tpu.memory_space<vmem>>, vector<1x128xf32>,
    %698 = arith.index_cast %c20_i32 : i32 to index
    %c0_260 = arith.constant 0 : index
    %699 = vector.load %arg6[%698, %c0_260] : memref<32x128xf32, #tpu.memory_space<vmem>>, vector<1x128xf32>
    tpu.vector_store %arg6[%698, %c0_260], %691 {strides = array<i32>} : memref<32x128xf32, #tpu.memory_space<vmem>>, vector<1x128xf32>,
    %c21_i32 = arith.constant 21 : i32
    %700 = arith.index_cast %c21_i32 : i32 to index
    %c0_261 = arith.constant 0 : index
    %701 = vector.load %arg7[%700, %c0_261] : memref<32x128xf32, #tpu.memory_space<vmem>>, vector<1x128xf32>
    %c1_i32_262 = arith.constant 1 : i32
    %702 = tpu.dynamic_rotate %683 by %c1_i32_262 dim 1 : vector<1x128xf32>, i32 -> vector<1x128xf32>
    %c127_i32_263 = arith.constant 127 : i32
    %703 = tpu.dynamic_rotate %683 by %c127_i32_263 dim 1 : vector<1x128xf32>, i32 -> vector<1x128xf32>
    %704 = arith.addf %702, %703 : vector<1x128xf32>
    %705 = arith.mulf %683, %4 : vector<1x128xf32>
    %706 = arith.mulf %704, %5 : vector<1x128xf32>
    %707 = arith.addf %705, %706 : vector<1x128xf32>
    %cst_264 = arith.constant 1.000000e+00 : f32
    %708 = vector.broadcast %cst_264 : f32 to vector<1x128xf32>
    %709 = arith.addf %708, %691 : vector<1x128xf32>
    %cst_265 = arith.constant 0.899999976 : f32
    %710 = vector.broadcast %cst_265 : f32 to vector<1x128xf32>
    %711 = arith.mulf %710, %693 : vector<1x128xf32>
    %712 = arith.addf %711, %701 : vector<1x128xf32>
    %713 = arith.addf %712, %707 : vector<1x128xf32>
    %714 = arith.cmpf ogt, %713, %709 : vector<1x128xf32>
    %715 = arith.extui %714 : vector<1x128xi1> to vector<1x128xi32>
    %716 = arith.sitofp %715 : vector<1x128xi32> to vector<1x128xf32>
    %cst_266 = arith.constant 0.899999976 : f32
    %717 = vector.broadcast %cst_266 : f32 to vector<1x128xf32>
    %718 = arith.mulf %717, %691 : vector<1x128xf32>
    %cst_267 = arith.constant 1.000000e+00 : f32
    %719 = vector.broadcast %cst_267 : f32 to vector<1x128xf32>
    %720 = arith.subf %719, %718 : vector<1x128xf32>
    %cst_268 = arith.constant 2.000000e-01 : f32
    %721 = vector.broadcast %cst_268 : f32 to vector<1x128xf32>
    %722 = arith.mulf %720, %721 : vector<1x128xf32>
    %723 = arith.mulf %722, %716 : vector<1x128xf32>
    %724 = arith.addf %718, %723 : vector<1x128xf32>
    %cst_269 = arith.constant 0.000000e+00 : f32
    %725 = vector.broadcast %cst_269 : f32 to vector<1x128xf32>
    %726 = arith.select %714, %725, %713 : vector<1x128xi1>, vector<1x128xf32>
    %727 = arith.index_cast %c21_i32 : i32 to index
    %c0_270 = arith.constant 0 : index
    %728 = vector.load %arg4[%727, %c0_270] : memref<32x128xf32, #tpu.memory_space<vmem>>, vector<1x128xf32>
    tpu.vector_store %arg4[%727, %c0_270], %716 {strides = array<i32>} : memref<32x128xf32, #tpu.memory_space<vmem>>, vector<1x128xf32>,
    %729 = arith.index_cast %c21_i32 : i32 to index
    %c0_271 = arith.constant 0 : index
    %730 = vector.load %arg5[%729, %c0_271] : memref<32x128xf32, #tpu.memory_space<vmem>>, vector<1x128xf32>
    tpu.vector_store %arg5[%729, %c0_271], %726 {strides = array<i32>} : memref<32x128xf32, #tpu.memory_space<vmem>>, vector<1x128xf32>,
    %731 = arith.index_cast %c21_i32 : i32 to index
    %c0_272 = arith.constant 0 : index
    %732 = vector.load %arg6[%731, %c0_272] : memref<32x128xf32, #tpu.memory_space<vmem>>, vector<1x128xf32>
    tpu.vector_store %arg6[%731, %c0_272], %724 {strides = array<i32>} : memref<32x128xf32, #tpu.memory_space<vmem>>, vector<1x128xf32>,
    %c22_i32 = arith.constant 22 : i32
    %733 = arith.index_cast %c22_i32 : i32 to index
    %c0_273 = arith.constant 0 : index
    %734 = vector.load %arg7[%733, %c0_273] : memref<32x128xf32, #tpu.memory_space<vmem>>, vector<1x128xf32>
    %c1_i32_274 = arith.constant 1 : i32
    %735 = tpu.dynamic_rotate %716 by %c1_i32_274 dim 1 : vector<1x128xf32>, i32 -> vector<1x128xf32>
    %c127_i32_275 = arith.constant 127 : i32
    %736 = tpu.dynamic_rotate %716 by %c127_i32_275 dim 1 : vector<1x128xf32>, i32 -> vector<1x128xf32>
    %737 = arith.addf %735, %736 : vector<1x128xf32>
    %738 = arith.mulf %716, %4 : vector<1x128xf32>
    %739 = arith.mulf %737, %5 : vector<1x128xf32>
    %740 = arith.addf %738, %739 : vector<1x128xf32>
    %cst_276 = arith.constant 1.000000e+00 : f32
    %741 = vector.broadcast %cst_276 : f32 to vector<1x128xf32>
    %742 = arith.addf %741, %724 : vector<1x128xf32>
    %cst_277 = arith.constant 0.899999976 : f32
    %743 = vector.broadcast %cst_277 : f32 to vector<1x128xf32>
    %744 = arith.mulf %743, %726 : vector<1x128xf32>
    %745 = arith.addf %744, %734 : vector<1x128xf32>
    %746 = arith.addf %745, %740 : vector<1x128xf32>
    %747 = arith.cmpf ogt, %746, %742 : vector<1x128xf32>
    %748 = arith.extui %747 : vector<1x128xi1> to vector<1x128xi32>
    %749 = arith.sitofp %748 : vector<1x128xi32> to vector<1x128xf32>
    %cst_278 = arith.constant 0.899999976 : f32
    %750 = vector.broadcast %cst_278 : f32 to vector<1x128xf32>
    %751 = arith.mulf %750, %724 : vector<1x128xf32>
    %cst_279 = arith.constant 1.000000e+00 : f32
    %752 = vector.broadcast %cst_279 : f32 to vector<1x128xf32>
    %753 = arith.subf %752, %751 : vector<1x128xf32>
    %cst_280 = arith.constant 2.000000e-01 : f32
    %754 = vector.broadcast %cst_280 : f32 to vector<1x128xf32>
    %755 = arith.mulf %753, %754 : vector<1x128xf32>
    %756 = arith.mulf %755, %749 : vector<1x128xf32>
    %757 = arith.addf %751, %756 : vector<1x128xf32>
    %cst_281 = arith.constant 0.000000e+00 : f32
    %758 = vector.broadcast %cst_281 : f32 to vector<1x128xf32>
    %759 = arith.select %747, %758, %746 : vector<1x128xi1>, vector<1x128xf32>
    %760 = arith.index_cast %c22_i32 : i32 to index
    %c0_282 = arith.constant 0 : index
    %761 = vector.load %arg4[%760, %c0_282] : memref<32x128xf32, #tpu.memory_space<vmem>>, vector<1x128xf32>
    tpu.vector_store %arg4[%760, %c0_282], %749 {strides = array<i32>} : memref<32x128xf32, #tpu.memory_space<vmem>>, vector<1x128xf32>,
    %762 = arith.index_cast %c22_i32 : i32 to index
    %c0_283 = arith.constant 0 : index
    %763 = vector.load %arg5[%762, %c0_283] : memref<32x128xf32, #tpu.memory_space<vmem>>, vector<1x128xf32>
    tpu.vector_store %arg5[%762, %c0_283], %759 {strides = array<i32>} : memref<32x128xf32, #tpu.memory_space<vmem>>, vector<1x128xf32>,
    %764 = arith.index_cast %c22_i32 : i32 to index
    %c0_284 = arith.constant 0 : index
    %765 = vector.load %arg6[%764, %c0_284] : memref<32x128xf32, #tpu.memory_space<vmem>>, vector<1x128xf32>
    tpu.vector_store %arg6[%764, %c0_284], %757 {strides = array<i32>} : memref<32x128xf32, #tpu.memory_space<vmem>>, vector<1x128xf32>,
    %c23_i32 = arith.constant 23 : i32
    %766 = arith.index_cast %c23_i32 : i32 to index
    %c0_285 = arith.constant 0 : index
    %767 = vector.load %arg7[%766, %c0_285] : memref<32x128xf32, #tpu.memory_space<vmem>>, vector<1x128xf32>
    %c1_i32_286 = arith.constant 1 : i32
    %768 = tpu.dynamic_rotate %749 by %c1_i32_286 dim 1 : vector<1x128xf32>, i32 -> vector<1x128xf32>
    %c127_i32_287 = arith.constant 127 : i32
    %769 = tpu.dynamic_rotate %749 by %c127_i32_287 dim 1 : vector<1x128xf32>, i32 -> vector<1x128xf32>
    %770 = arith.addf %768, %769 : vector<1x128xf32>
    %771 = arith.mulf %749, %4 : vector<1x128xf32>
    %772 = arith.mulf %770, %5 : vector<1x128xf32>
    %773 = arith.addf %771, %772 : vector<1x128xf32>
    %cst_288 = arith.constant 1.000000e+00 : f32
    %774 = vector.broadcast %cst_288 : f32 to vector<1x128xf32>
    %775 = arith.addf %774, %757 : vector<1x128xf32>
    %cst_289 = arith.constant 0.899999976 : f32
    %776 = vector.broadcast %cst_289 : f32 to vector<1x128xf32>
    %777 = arith.mulf %776, %759 : vector<1x128xf32>
    %778 = arith.addf %777, %767 : vector<1x128xf32>
    %779 = arith.addf %778, %773 : vector<1x128xf32>
    %780 = arith.cmpf ogt, %779, %775 : vector<1x128xf32>
    %781 = arith.extui %780 : vector<1x128xi1> to vector<1x128xi32>
    %782 = arith.sitofp %781 : vector<1x128xi32> to vector<1x128xf32>
    %cst_290 = arith.constant 0.899999976 : f32
    %783 = vector.broadcast %cst_290 : f32 to vector<1x128xf32>
    %784 = arith.mulf %783, %757 : vector<1x128xf32>
    %cst_291 = arith.constant 1.000000e+00 : f32
    %785 = vector.broadcast %cst_291 : f32 to vector<1x128xf32>
    %786 = arith.subf %785, %784 : vector<1x128xf32>
    %cst_292 = arith.constant 2.000000e-01 : f32
    %787 = vector.broadcast %cst_292 : f32 to vector<1x128xf32>
    %788 = arith.mulf %786, %787 : vector<1x128xf32>
    %789 = arith.mulf %788, %782 : vector<1x128xf32>
    %790 = arith.addf %784, %789 : vector<1x128xf32>
    %cst_293 = arith.constant 0.000000e+00 : f32
    %791 = vector.broadcast %cst_293 : f32 to vector<1x128xf32>
    %792 = arith.select %780, %791, %779 : vector<1x128xi1>, vector<1x128xf32>
    %793 = arith.index_cast %c23_i32 : i32 to index
    %c0_294 = arith.constant 0 : index
    %794 = vector.load %arg4[%793, %c0_294] : memref<32x128xf32, #tpu.memory_space<vmem>>, vector<1x128xf32>
    tpu.vector_store %arg4[%793, %c0_294], %782 {strides = array<i32>} : memref<32x128xf32, #tpu.memory_space<vmem>>, vector<1x128xf32>,
    %795 = arith.index_cast %c23_i32 : i32 to index
    %c0_295 = arith.constant 0 : index
    %796 = vector.load %arg5[%795, %c0_295] : memref<32x128xf32, #tpu.memory_space<vmem>>, vector<1x128xf32>
    tpu.vector_store %arg5[%795, %c0_295], %792 {strides = array<i32>} : memref<32x128xf32, #tpu.memory_space<vmem>>, vector<1x128xf32>,
    %797 = arith.index_cast %c23_i32 : i32 to index
    %c0_296 = arith.constant 0 : index
    %798 = vector.load %arg6[%797, %c0_296] : memref<32x128xf32, #tpu.memory_space<vmem>>, vector<1x128xf32>
    tpu.vector_store %arg6[%797, %c0_296], %790 {strides = array<i32>} : memref<32x128xf32, #tpu.memory_space<vmem>>, vector<1x128xf32>,
    %c24_i32 = arith.constant 24 : i32
    %799 = arith.index_cast %c24_i32 : i32 to index
    %c0_297 = arith.constant 0 : index
    %800 = vector.load %arg7[%799, %c0_297] : memref<32x128xf32, #tpu.memory_space<vmem>>, vector<1x128xf32>
    %c1_i32_298 = arith.constant 1 : i32
    %801 = tpu.dynamic_rotate %782 by %c1_i32_298 dim 1 : vector<1x128xf32>, i32 -> vector<1x128xf32>
    %c127_i32_299 = arith.constant 127 : i32
    %802 = tpu.dynamic_rotate %782 by %c127_i32_299 dim 1 : vector<1x128xf32>, i32 -> vector<1x128xf32>
    %803 = arith.addf %801, %802 : vector<1x128xf32>
    %804 = arith.mulf %782, %4 : vector<1x128xf32>
    %805 = arith.mulf %803, %5 : vector<1x128xf32>
    %806 = arith.addf %804, %805 : vector<1x128xf32>
    %cst_300 = arith.constant 1.000000e+00 : f32
    %807 = vector.broadcast %cst_300 : f32 to vector<1x128xf32>
    %808 = arith.addf %807, %790 : vector<1x128xf32>
    %cst_301 = arith.constant 0.899999976 : f32
    %809 = vector.broadcast %cst_301 : f32 to vector<1x128xf32>
    %810 = arith.mulf %809, %792 : vector<1x128xf32>
    %811 = arith.addf %810, %800 : vector<1x128xf32>
    %812 = arith.addf %811, %806 : vector<1x128xf32>
    %813 = arith.cmpf ogt, %812, %808 : vector<1x128xf32>
    %814 = arith.extui %813 : vector<1x128xi1> to vector<1x128xi32>
    %815 = arith.sitofp %814 : vector<1x128xi32> to vector<1x128xf32>
    %cst_302 = arith.constant 0.899999976 : f32
    %816 = vector.broadcast %cst_302 : f32 to vector<1x128xf32>
    %817 = arith.mulf %816, %790 : vector<1x128xf32>
    %cst_303 = arith.constant 1.000000e+00 : f32
    %818 = vector.broadcast %cst_303 : f32 to vector<1x128xf32>
    %819 = arith.subf %818, %817 : vector<1x128xf32>
    %cst_304 = arith.constant 2.000000e-01 : f32
    %820 = vector.broadcast %cst_304 : f32 to vector<1x128xf32>
    %821 = arith.mulf %819, %820 : vector<1x128xf32>
    %822 = arith.mulf %821, %815 : vector<1x128xf32>
    %823 = arith.addf %817, %822 : vector<1x128xf32>
    %cst_305 = arith.constant 0.000000e+00 : f32
    %824 = vector.broadcast %cst_305 : f32 to vector<1x128xf32>
    %825 = arith.select %813, %824, %812 : vector<1x128xi1>, vector<1x128xf32>
    %826 = arith.index_cast %c24_i32 : i32 to index
    %c0_306 = arith.constant 0 : index
    %827 = vector.load %arg4[%826, %c0_306] : memref<32x128xf32, #tpu.memory_space<vmem>>, vector<1x128xf32>
    tpu.vector_store %arg4[%826, %c0_306], %815 {strides = array<i32>} : memref<32x128xf32, #tpu.memory_space<vmem>>, vector<1x128xf32>,
    %828 = arith.index_cast %c24_i32 : i32 to index
    %c0_307 = arith.constant 0 : index
    %829 = vector.load %arg5[%828, %c0_307] : memref<32x128xf32, #tpu.memory_space<vmem>>, vector<1x128xf32>
    tpu.vector_store %arg5[%828, %c0_307], %825 {strides = array<i32>} : memref<32x128xf32, #tpu.memory_space<vmem>>, vector<1x128xf32>,
    %830 = arith.index_cast %c24_i32 : i32 to index
    %c0_308 = arith.constant 0 : index
    %831 = vector.load %arg6[%830, %c0_308] : memref<32x128xf32, #tpu.memory_space<vmem>>, vector<1x128xf32>
    tpu.vector_store %arg6[%830, %c0_308], %823 {strides = array<i32>} : memref<32x128xf32, #tpu.memory_space<vmem>>, vector<1x128xf32>,
    %c25_i32 = arith.constant 25 : i32
    %832 = arith.index_cast %c25_i32 : i32 to index
    %c0_309 = arith.constant 0 : index
    %833 = vector.load %arg7[%832, %c0_309] : memref<32x128xf32, #tpu.memory_space<vmem>>, vector<1x128xf32>
    %c1_i32_310 = arith.constant 1 : i32
    %834 = tpu.dynamic_rotate %815 by %c1_i32_310 dim 1 : vector<1x128xf32>, i32 -> vector<1x128xf32>
    %c127_i32_311 = arith.constant 127 : i32
    %835 = tpu.dynamic_rotate %815 by %c127_i32_311 dim 1 : vector<1x128xf32>, i32 -> vector<1x128xf32>
    %836 = arith.addf %834, %835 : vector<1x128xf32>
    %837 = arith.mulf %815, %4 : vector<1x128xf32>
    %838 = arith.mulf %836, %5 : vector<1x128xf32>
    %839 = arith.addf %837, %838 : vector<1x128xf32>
    %cst_312 = arith.constant 1.000000e+00 : f32
    %840 = vector.broadcast %cst_312 : f32 to vector<1x128xf32>
    %841 = arith.addf %840, %823 : vector<1x128xf32>
    %cst_313 = arith.constant 0.899999976 : f32
    %842 = vector.broadcast %cst_313 : f32 to vector<1x128xf32>
    %843 = arith.mulf %842, %825 : vector<1x128xf32>
    %844 = arith.addf %843, %833 : vector<1x128xf32>
    %845 = arith.addf %844, %839 : vector<1x128xf32>
    %846 = arith.cmpf ogt, %845, %841 : vector<1x128xf32>
    %847 = arith.extui %846 : vector<1x128xi1> to vector<1x128xi32>
    %848 = arith.sitofp %847 : vector<1x128xi32> to vector<1x128xf32>
    %cst_314 = arith.constant 0.899999976 : f32
    %849 = vector.broadcast %cst_314 : f32 to vector<1x128xf32>
    %850 = arith.mulf %849, %823 : vector<1x128xf32>
    %cst_315 = arith.constant 1.000000e+00 : f32
    %851 = vector.broadcast %cst_315 : f32 to vector<1x128xf32>
    %852 = arith.subf %851, %850 : vector<1x128xf32>
    %cst_316 = arith.constant 2.000000e-01 : f32
    %853 = vector.broadcast %cst_316 : f32 to vector<1x128xf32>
    %854 = arith.mulf %852, %853 : vector<1x128xf32>
    %855 = arith.mulf %854, %848 : vector<1x128xf32>
    %856 = arith.addf %850, %855 : vector<1x128xf32>
    %cst_317 = arith.constant 0.000000e+00 : f32
    %857 = vector.broadcast %cst_317 : f32 to vector<1x128xf32>
    %858 = arith.select %846, %857, %845 : vector<1x128xi1>, vector<1x128xf32>
    %859 = arith.index_cast %c25_i32 : i32 to index
    %c0_318 = arith.constant 0 : index
    %860 = vector.load %arg4[%859, %c0_318] : memref<32x128xf32, #tpu.memory_space<vmem>>, vector<1x128xf32>
    tpu.vector_store %arg4[%859, %c0_318], %848 {strides = array<i32>} : memref<32x128xf32, #tpu.memory_space<vmem>>, vector<1x128xf32>,
    %861 = arith.index_cast %c25_i32 : i32 to index
    %c0_319 = arith.constant 0 : index
    %862 = vector.load %arg5[%861, %c0_319] : memref<32x128xf32, #tpu.memory_space<vmem>>, vector<1x128xf32>
    tpu.vector_store %arg5[%861, %c0_319], %858 {strides = array<i32>} : memref<32x128xf32, #tpu.memory_space<vmem>>, vector<1x128xf32>,
    %863 = arith.index_cast %c25_i32 : i32 to index
    %c0_320 = arith.constant 0 : index
    %864 = vector.load %arg6[%863, %c0_320] : memref<32x128xf32, #tpu.memory_space<vmem>>, vector<1x128xf32>
    tpu.vector_store %arg6[%863, %c0_320], %856 {strides = array<i32>} : memref<32x128xf32, #tpu.memory_space<vmem>>, vector<1x128xf32>,
    %c26_i32 = arith.constant 26 : i32
    %865 = arith.index_cast %c26_i32 : i32 to index
    %c0_321 = arith.constant 0 : index
    %866 = vector.load %arg7[%865, %c0_321] : memref<32x128xf32, #tpu.memory_space<vmem>>, vector<1x128xf32>
    %c1_i32_322 = arith.constant 1 : i32
    %867 = tpu.dynamic_rotate %848 by %c1_i32_322 dim 1 : vector<1x128xf32>, i32 -> vector<1x128xf32>
    %c127_i32_323 = arith.constant 127 : i32
    %868 = tpu.dynamic_rotate %848 by %c127_i32_323 dim 1 : vector<1x128xf32>, i32 -> vector<1x128xf32>
    %869 = arith.addf %867, %868 : vector<1x128xf32>
    %870 = arith.mulf %848, %4 : vector<1x128xf32>
    %871 = arith.mulf %869, %5 : vector<1x128xf32>
    %872 = arith.addf %870, %871 : vector<1x128xf32>
    %cst_324 = arith.constant 1.000000e+00 : f32
    %873 = vector.broadcast %cst_324 : f32 to vector<1x128xf32>
    %874 = arith.addf %873, %856 : vector<1x128xf32>
    %cst_325 = arith.constant 0.899999976 : f32
    %875 = vector.broadcast %cst_325 : f32 to vector<1x128xf32>
    %876 = arith.mulf %875, %858 : vector<1x128xf32>
    %877 = arith.addf %876, %866 : vector<1x128xf32>
    %878 = arith.addf %877, %872 : vector<1x128xf32>
    %879 = arith.cmpf ogt, %878, %874 : vector<1x128xf32>
    %880 = arith.extui %879 : vector<1x128xi1> to vector<1x128xi32>
    %881 = arith.sitofp %880 : vector<1x128xi32> to vector<1x128xf32>
    %cst_326 = arith.constant 0.899999976 : f32
    %882 = vector.broadcast %cst_326 : f32 to vector<1x128xf32>
    %883 = arith.mulf %882, %856 : vector<1x128xf32>
    %cst_327 = arith.constant 1.000000e+00 : f32
    %884 = vector.broadcast %cst_327 : f32 to vector<1x128xf32>
    %885 = arith.subf %884, %883 : vector<1x128xf32>
    %cst_328 = arith.constant 2.000000e-01 : f32
    %886 = vector.broadcast %cst_328 : f32 to vector<1x128xf32>
    %887 = arith.mulf %885, %886 : vector<1x128xf32>
    %888 = arith.mulf %887, %881 : vector<1x128xf32>
    %889 = arith.addf %883, %888 : vector<1x128xf32>
    %cst_329 = arith.constant 0.000000e+00 : f32
    %890 = vector.broadcast %cst_329 : f32 to vector<1x128xf32>
    %891 = arith.select %879, %890, %878 : vector<1x128xi1>, vector<1x128xf32>
    %892 = arith.index_cast %c26_i32 : i32 to index
    %c0_330 = arith.constant 0 : index
    %893 = vector.load %arg4[%892, %c0_330] : memref<32x128xf32, #tpu.memory_space<vmem>>, vector<1x128xf32>
    tpu.vector_store %arg4[%892, %c0_330], %881 {strides = array<i32>} : memref<32x128xf32, #tpu.memory_space<vmem>>, vector<1x128xf32>,
    %894 = arith.index_cast %c26_i32 : i32 to index
    %c0_331 = arith.constant 0 : index
    %895 = vector.load %arg5[%894, %c0_331] : memref<32x128xf32, #tpu.memory_space<vmem>>, vector<1x128xf32>
    tpu.vector_store %arg5[%894, %c0_331], %891 {strides = array<i32>} : memref<32x128xf32, #tpu.memory_space<vmem>>, vector<1x128xf32>,
    %896 = arith.index_cast %c26_i32 : i32 to index
    %c0_332 = arith.constant 0 : index
    %897 = vector.load %arg6[%896, %c0_332] : memref<32x128xf32, #tpu.memory_space<vmem>>, vector<1x128xf32>
    tpu.vector_store %arg6[%896, %c0_332], %889 {strides = array<i32>} : memref<32x128xf32, #tpu.memory_space<vmem>>, vector<1x128xf32>,
    %c27_i32 = arith.constant 27 : i32
    %898 = arith.index_cast %c27_i32 : i32 to index
    %c0_333 = arith.constant 0 : index
    %899 = vector.load %arg7[%898, %c0_333] : memref<32x128xf32, #tpu.memory_space<vmem>>, vector<1x128xf32>
    %c1_i32_334 = arith.constant 1 : i32
    %900 = tpu.dynamic_rotate %881 by %c1_i32_334 dim 1 : vector<1x128xf32>, i32 -> vector<1x128xf32>
    %c127_i32_335 = arith.constant 127 : i32
    %901 = tpu.dynamic_rotate %881 by %c127_i32_335 dim 1 : vector<1x128xf32>, i32 -> vector<1x128xf32>
    %902 = arith.addf %900, %901 : vector<1x128xf32>
    %903 = arith.mulf %881, %4 : vector<1x128xf32>
    %904 = arith.mulf %902, %5 : vector<1x128xf32>
    %905 = arith.addf %903, %904 : vector<1x128xf32>
    %cst_336 = arith.constant 1.000000e+00 : f32
    %906 = vector.broadcast %cst_336 : f32 to vector<1x128xf32>
    %907 = arith.addf %906, %889 : vector<1x128xf32>
    %cst_337 = arith.constant 0.899999976 : f32
    %908 = vector.broadcast %cst_337 : f32 to vector<1x128xf32>
    %909 = arith.mulf %908, %891 : vector<1x128xf32>
    %910 = arith.addf %909, %899 : vector<1x128xf32>
    %911 = arith.addf %910, %905 : vector<1x128xf32>
    %912 = arith.cmpf ogt, %911, %907 : vector<1x128xf32>
    %913 = arith.extui %912 : vector<1x128xi1> to vector<1x128xi32>
    %914 = arith.sitofp %913 : vector<1x128xi32> to vector<1x128xf32>
    %cst_338 = arith.constant 0.899999976 : f32
    %915 = vector.broadcast %cst_338 : f32 to vector<1x128xf32>
    %916 = arith.mulf %915, %889 : vector<1x128xf32>
    %cst_339 = arith.constant 1.000000e+00 : f32
    %917 = vector.broadcast %cst_339 : f32 to vector<1x128xf32>
    %918 = arith.subf %917, %916 : vector<1x128xf32>
    %cst_340 = arith.constant 2.000000e-01 : f32
    %919 = vector.broadcast %cst_340 : f32 to vector<1x128xf32>
    %920 = arith.mulf %918, %919 : vector<1x128xf32>
    %921 = arith.mulf %920, %914 : vector<1x128xf32>
    %922 = arith.addf %916, %921 : vector<1x128xf32>
    %cst_341 = arith.constant 0.000000e+00 : f32
    %923 = vector.broadcast %cst_341 : f32 to vector<1x128xf32>
    %924 = arith.select %912, %923, %911 : vector<1x128xi1>, vector<1x128xf32>
    %925 = arith.index_cast %c27_i32 : i32 to index
    %c0_342 = arith.constant 0 : index
    %926 = vector.load %arg4[%925, %c0_342] : memref<32x128xf32, #tpu.memory_space<vmem>>, vector<1x128xf32>
    tpu.vector_store %arg4[%925, %c0_342], %914 {strides = array<i32>} : memref<32x128xf32, #tpu.memory_space<vmem>>, vector<1x128xf32>,
    %927 = arith.index_cast %c27_i32 : i32 to index
    %c0_343 = arith.constant 0 : index
    %928 = vector.load %arg5[%927, %c0_343] : memref<32x128xf32, #tpu.memory_space<vmem>>, vector<1x128xf32>
    tpu.vector_store %arg5[%927, %c0_343], %924 {strides = array<i32>} : memref<32x128xf32, #tpu.memory_space<vmem>>, vector<1x128xf32>,
    %929 = arith.index_cast %c27_i32 : i32 to index
    %c0_344 = arith.constant 0 : index
    %930 = vector.load %arg6[%929, %c0_344] : memref<32x128xf32, #tpu.memory_space<vmem>>, vector<1x128xf32>
    tpu.vector_store %arg6[%929, %c0_344], %922 {strides = array<i32>} : memref<32x128xf32, #tpu.memory_space<vmem>>, vector<1x128xf32>,
    %c28_i32 = arith.constant 28 : i32
    %931 = arith.index_cast %c28_i32 : i32 to index
    %c0_345 = arith.constant 0 : index
    %932 = vector.load %arg7[%931, %c0_345] : memref<32x128xf32, #tpu.memory_space<vmem>>, vector<1x128xf32>
    %c1_i32_346 = arith.constant 1 : i32
    %933 = tpu.dynamic_rotate %914 by %c1_i32_346 dim 1 : vector<1x128xf32>, i32 -> vector<1x128xf32>
    %c127_i32_347 = arith.constant 127 : i32
    %934 = tpu.dynamic_rotate %914 by %c127_i32_347 dim 1 : vector<1x128xf32>, i32 -> vector<1x128xf32>
    %935 = arith.addf %933, %934 : vector<1x128xf32>
    %936 = arith.mulf %914, %4 : vector<1x128xf32>
    %937 = arith.mulf %935, %5 : vector<1x128xf32>
    %938 = arith.addf %936, %937 : vector<1x128xf32>
    %cst_348 = arith.constant 1.000000e+00 : f32
    %939 = vector.broadcast %cst_348 : f32 to vector<1x128xf32>
    %940 = arith.addf %939, %922 : vector<1x128xf32>
    %cst_349 = arith.constant 0.899999976 : f32
    %941 = vector.broadcast %cst_349 : f32 to vector<1x128xf32>
    %942 = arith.mulf %941, %924 : vector<1x128xf32>
    %943 = arith.addf %942, %932 : vector<1x128xf32>
    %944 = arith.addf %943, %938 : vector<1x128xf32>
    %945 = arith.cmpf ogt, %944, %940 : vector<1x128xf32>
    %946 = arith.extui %945 : vector<1x128xi1> to vector<1x128xi32>
    %947 = arith.sitofp %946 : vector<1x128xi32> to vector<1x128xf32>
    %cst_350 = arith.constant 0.899999976 : f32
    %948 = vector.broadcast %cst_350 : f32 to vector<1x128xf32>
    %949 = arith.mulf %948, %922 : vector<1x128xf32>
    %cst_351 = arith.constant 1.000000e+00 : f32
    %950 = vector.broadcast %cst_351 : f32 to vector<1x128xf32>
    %951 = arith.subf %950, %949 : vector<1x128xf32>
    %cst_352 = arith.constant 2.000000e-01 : f32
    %952 = vector.broadcast %cst_352 : f32 to vector<1x128xf32>
    %953 = arith.mulf %951, %952 : vector<1x128xf32>
    %954 = arith.mulf %953, %947 : vector<1x128xf32>
    %955 = arith.addf %949, %954 : vector<1x128xf32>
    %cst_353 = arith.constant 0.000000e+00 : f32
    %956 = vector.broadcast %cst_353 : f32 to vector<1x128xf32>
    %957 = arith.select %945, %956, %944 : vector<1x128xi1>, vector<1x128xf32>
    %958 = arith.index_cast %c28_i32 : i32 to index
    %c0_354 = arith.constant 0 : index
    %959 = vector.load %arg4[%958, %c0_354] : memref<32x128xf32, #tpu.memory_space<vmem>>, vector<1x128xf32>
    tpu.vector_store %arg4[%958, %c0_354], %947 {strides = array<i32>} : memref<32x128xf32, #tpu.memory_space<vmem>>, vector<1x128xf32>,
    %960 = arith.index_cast %c28_i32 : i32 to index
    %c0_355 = arith.constant 0 : index
    %961 = vector.load %arg5[%960, %c0_355] : memref<32x128xf32, #tpu.memory_space<vmem>>, vector<1x128xf32>
    tpu.vector_store %arg5[%960, %c0_355], %957 {strides = array<i32>} : memref<32x128xf32, #tpu.memory_space<vmem>>, vector<1x128xf32>,
    %962 = arith.index_cast %c28_i32 : i32 to index
    %c0_356 = arith.constant 0 : index
    %963 = vector.load %arg6[%962, %c0_356] : memref<32x128xf32, #tpu.memory_space<vmem>>, vector<1x128xf32>
    tpu.vector_store %arg6[%962, %c0_356], %955 {strides = array<i32>} : memref<32x128xf32, #tpu.memory_space<vmem>>, vector<1x128xf32>,
    %c29_i32 = arith.constant 29 : i32
    %964 = arith.index_cast %c29_i32 : i32 to index
    %c0_357 = arith.constant 0 : index
    %965 = vector.load %arg7[%964, %c0_357] : memref<32x128xf32, #tpu.memory_space<vmem>>, vector<1x128xf32>
    %c1_i32_358 = arith.constant 1 : i32
    %966 = tpu.dynamic_rotate %947 by %c1_i32_358 dim 1 : vector<1x128xf32>, i32 -> vector<1x128xf32>
    %c127_i32_359 = arith.constant 127 : i32
    %967 = tpu.dynamic_rotate %947 by %c127_i32_359 dim 1 : vector<1x128xf32>, i32 -> vector<1x128xf32>
    %968 = arith.addf %966, %967 : vector<1x128xf32>
    %969 = arith.mulf %947, %4 : vector<1x128xf32>
    %970 = arith.mulf %968, %5 : vector<1x128xf32>
    %971 = arith.addf %969, %970 : vector<1x128xf32>
    %cst_360 = arith.constant 1.000000e+00 : f32
    %972 = vector.broadcast %cst_360 : f32 to vector<1x128xf32>
    %973 = arith.addf %972, %955 : vector<1x128xf32>
    %cst_361 = arith.constant 0.899999976 : f32
    %974 = vector.broadcast %cst_361 : f32 to vector<1x128xf32>
    %975 = arith.mulf %974, %957 : vector<1x128xf32>
    %976 = arith.addf %975, %965 : vector<1x128xf32>
    %977 = arith.addf %976, %971 : vector<1x128xf32>
    %978 = arith.cmpf ogt, %977, %973 : vector<1x128xf32>
    %979 = arith.extui %978 : vector<1x128xi1> to vector<1x128xi32>
    %980 = arith.sitofp %979 : vector<1x128xi32> to vector<1x128xf32>
    %cst_362 = arith.constant 0.899999976 : f32
    %981 = vector.broadcast %cst_362 : f32 to vector<1x128xf32>
    %982 = arith.mulf %981, %955 : vector<1x128xf32>
    %cst_363 = arith.constant 1.000000e+00 : f32
    %983 = vector.broadcast %cst_363 : f32 to vector<1x128xf32>
    %984 = arith.subf %983, %982 : vector<1x128xf32>
    %cst_364 = arith.constant 2.000000e-01 : f32
    %985 = vector.broadcast %cst_364 : f32 to vector<1x128xf32>
    %986 = arith.mulf %984, %985 : vector<1x128xf32>
    %987 = arith.mulf %986, %980 : vector<1x128xf32>
    %988 = arith.addf %982, %987 : vector<1x128xf32>
    %cst_365 = arith.constant 0.000000e+00 : f32
    %989 = vector.broadcast %cst_365 : f32 to vector<1x128xf32>
    %990 = arith.select %978, %989, %977 : vector<1x128xi1>, vector<1x128xf32>
    %991 = arith.index_cast %c29_i32 : i32 to index
    %c0_366 = arith.constant 0 : index
    %992 = vector.load %arg4[%991, %c0_366] : memref<32x128xf32, #tpu.memory_space<vmem>>, vector<1x128xf32>
    tpu.vector_store %arg4[%991, %c0_366], %980 {strides = array<i32>} : memref<32x128xf32, #tpu.memory_space<vmem>>, vector<1x128xf32>,
    %993 = arith.index_cast %c29_i32 : i32 to index
    %c0_367 = arith.constant 0 : index
    %994 = vector.load %arg5[%993, %c0_367] : memref<32x128xf32, #tpu.memory_space<vmem>>, vector<1x128xf32>
    tpu.vector_store %arg5[%993, %c0_367], %990 {strides = array<i32>} : memref<32x128xf32, #tpu.memory_space<vmem>>, vector<1x128xf32>,
    %995 = arith.index_cast %c29_i32 : i32 to index
    %c0_368 = arith.constant 0 : index
    %996 = vector.load %arg6[%995, %c0_368] : memref<32x128xf32, #tpu.memory_space<vmem>>, vector<1x128xf32>
    tpu.vector_store %arg6[%995, %c0_368], %988 {strides = array<i32>} : memref<32x128xf32, #tpu.memory_space<vmem>>, vector<1x128xf32>,
    %c30_i32 = arith.constant 30 : i32
    %997 = arith.index_cast %c30_i32 : i32 to index
    %c0_369 = arith.constant 0 : index
    %998 = vector.load %arg7[%997, %c0_369] : memref<32x128xf32, #tpu.memory_space<vmem>>, vector<1x128xf32>
    %c1_i32_370 = arith.constant 1 : i32
    %999 = tpu.dynamic_rotate %980 by %c1_i32_370 dim 1 : vector<1x128xf32>, i32 -> vector<1x128xf32>
    %c127_i32_371 = arith.constant 127 : i32
    %1000 = tpu.dynamic_rotate %980 by %c127_i32_371 dim 1 : vector<1x128xf32>, i32 -> vector<1x128xf32>
    %1001 = arith.addf %999, %1000 : vector<1x128xf32>
    %1002 = arith.mulf %980, %4 : vector<1x128xf32>
    %1003 = arith.mulf %1001, %5 : vector<1x128xf32>
    %1004 = arith.addf %1002, %1003 : vector<1x128xf32>
    %cst_372 = arith.constant 1.000000e+00 : f32
    %1005 = vector.broadcast %cst_372 : f32 to vector<1x128xf32>
    %1006 = arith.addf %1005, %988 : vector<1x128xf32>
    %cst_373 = arith.constant 0.899999976 : f32
    %1007 = vector.broadcast %cst_373 : f32 to vector<1x128xf32>
    %1008 = arith.mulf %1007, %990 : vector<1x128xf32>
    %1009 = arith.addf %1008, %998 : vector<1x128xf32>
    %1010 = arith.addf %1009, %1004 : vector<1x128xf32>
    %1011 = arith.cmpf ogt, %1010, %1006 : vector<1x128xf32>
    %1012 = arith.extui %1011 : vector<1x128xi1> to vector<1x128xi32>
    %1013 = arith.sitofp %1012 : vector<1x128xi32> to vector<1x128xf32>
    %cst_374 = arith.constant 0.899999976 : f32
    %1014 = vector.broadcast %cst_374 : f32 to vector<1x128xf32>
    %1015 = arith.mulf %1014, %988 : vector<1x128xf32>
    %cst_375 = arith.constant 1.000000e+00 : f32
    %1016 = vector.broadcast %cst_375 : f32 to vector<1x128xf32>
    %1017 = arith.subf %1016, %1015 : vector<1x128xf32>
    %cst_376 = arith.constant 2.000000e-01 : f32
    %1018 = vector.broadcast %cst_376 : f32 to vector<1x128xf32>
    %1019 = arith.mulf %1017, %1018 : vector<1x128xf32>
    %1020 = arith.mulf %1019, %1013 : vector<1x128xf32>
    %1021 = arith.addf %1015, %1020 : vector<1x128xf32>
    %cst_377 = arith.constant 0.000000e+00 : f32
    %1022 = vector.broadcast %cst_377 : f32 to vector<1x128xf32>
    %1023 = arith.select %1011, %1022, %1010 : vector<1x128xi1>, vector<1x128xf32>
    %1024 = arith.index_cast %c30_i32 : i32 to index
    %c0_378 = arith.constant 0 : index
    %1025 = vector.load %arg4[%1024, %c0_378] : memref<32x128xf32, #tpu.memory_space<vmem>>, vector<1x128xf32>
    tpu.vector_store %arg4[%1024, %c0_378], %1013 {strides = array<i32>} : memref<32x128xf32, #tpu.memory_space<vmem>>, vector<1x128xf32>,
    %1026 = arith.index_cast %c30_i32 : i32 to index
    %c0_379 = arith.constant 0 : index
    %1027 = vector.load %arg5[%1026, %c0_379] : memref<32x128xf32, #tpu.memory_space<vmem>>, vector<1x128xf32>
    tpu.vector_store %arg5[%1026, %c0_379], %1023 {strides = array<i32>} : memref<32x128xf32, #tpu.memory_space<vmem>>, vector<1x128xf32>,
    %1028 = arith.index_cast %c30_i32 : i32 to index
    %c0_380 = arith.constant 0 : index
    %1029 = vector.load %arg6[%1028, %c0_380] : memref<32x128xf32, #tpu.memory_space<vmem>>, vector<1x128xf32>
    tpu.vector_store %arg6[%1028, %c0_380], %1021 {strides = array<i32>} : memref<32x128xf32, #tpu.memory_space<vmem>>, vector<1x128xf32>,
    %c31_i32 = arith.constant 31 : i32
    %1030 = arith.index_cast %c31_i32 : i32 to index
    %c0_381 = arith.constant 0 : index
    %1031 = vector.load %arg7[%1030, %c0_381] : memref<32x128xf32, #tpu.memory_space<vmem>>, vector<1x128xf32>
    %c1_i32_382 = arith.constant 1 : i32
    %1032 = tpu.dynamic_rotate %1013 by %c1_i32_382 dim 1 : vector<1x128xf32>, i32 -> vector<1x128xf32>
    %c127_i32_383 = arith.constant 127 : i32
    %1033 = tpu.dynamic_rotate %1013 by %c127_i32_383 dim 1 : vector<1x128xf32>, i32 -> vector<1x128xf32>
    %1034 = arith.addf %1032, %1033 : vector<1x128xf32>
    %1035 = arith.mulf %1013, %4 : vector<1x128xf32>
    %1036 = arith.mulf %1034, %5 : vector<1x128xf32>
    %1037 = arith.addf %1035, %1036 : vector<1x128xf32>
    %cst_384 = arith.constant 1.000000e+00 : f32
    %1038 = vector.broadcast %cst_384 : f32 to vector<1x128xf32>
    %1039 = arith.addf %1038, %1021 : vector<1x128xf32>
    %cst_385 = arith.constant 0.899999976 : f32
    %1040 = vector.broadcast %cst_385 : f32 to vector<1x128xf32>
    %1041 = arith.mulf %1040, %1023 : vector<1x128xf32>
    %1042 = arith.addf %1041, %1031 : vector<1x128xf32>
    %1043 = arith.addf %1042, %1037 : vector<1x128xf32>
    %1044 = arith.cmpf ogt, %1043, %1039 : vector<1x128xf32>
    %1045 = arith.extui %1044 : vector<1x128xi1> to vector<1x128xi32>
    %1046 = arith.sitofp %1045 : vector<1x128xi32> to vector<1x128xf32>
    %cst_386 = arith.constant 0.899999976 : f32
    %1047 = vector.broadcast %cst_386 : f32 to vector<1x128xf32>
    %1048 = arith.mulf %1047, %1021 : vector<1x128xf32>
    %cst_387 = arith.constant 1.000000e+00 : f32
    %1049 = vector.broadcast %cst_387 : f32 to vector<1x128xf32>
    %1050 = arith.subf %1049, %1048 : vector<1x128xf32>
    %cst_388 = arith.constant 2.000000e-01 : f32
    %1051 = vector.broadcast %cst_388 : f32 to vector<1x128xf32>
    %1052 = arith.mulf %1050, %1051 : vector<1x128xf32>
    %1053 = arith.mulf %1052, %1046 : vector<1x128xf32>
    %1054 = arith.addf %1048, %1053 : vector<1x128xf32>
    %cst_389 = arith.constant 0.000000e+00 : f32
    %1055 = vector.broadcast %cst_389 : f32 to vector<1x128xf32>
    %1056 = arith.select %1044, %1055, %1043 : vector<1x128xi1>, vector<1x128xf32>
    %1057 = arith.index_cast %c31_i32 : i32 to index
    %c0_390 = arith.constant 0 : index
    %1058 = vector.load %arg4[%1057, %c0_390] : memref<32x128xf32, #tpu.memory_space<vmem>>, vector<1x128xf32>
    tpu.vector_store %arg4[%1057, %c0_390], %1046 {strides = array<i32>} : memref<32x128xf32, #tpu.memory_space<vmem>>, vector<1x128xf32>,
    %1059 = arith.index_cast %c31_i32 : i32 to index
    %c0_391 = arith.constant 0 : index
    %1060 = vector.load %arg5[%1059, %c0_391] : memref<32x128xf32, #tpu.memory_space<vmem>>, vector<1x128xf32>
    tpu.vector_store %arg5[%1059, %c0_391], %1056 {strides = array<i32>} : memref<32x128xf32, #tpu.memory_space<vmem>>, vector<1x128xf32>,
    %1061 = arith.index_cast %c31_i32 : i32 to index
    %c0_392 = arith.constant 0 : index
    %1062 = vector.load %arg6[%1061, %c0_392] : memref<32x128xf32, #tpu.memory_space<vmem>>, vector<1x128xf32>
    tpu.vector_store %arg6[%1061, %c0_392], %1054 {strides = array<i32>} : memref<32x128xf32, #tpu.memory_space<vmem>>, vector<1x128xf32>,
    %c32_i32 = arith.constant 32 : i32
    return
  }
}

</mosaic_0001>

<bundles_post_ra>
// kernel: run_network.1
= control target key start
LH: loop header
LB: loop body
LE: loop exit
PB: predicated region body
PF: predicated region fallthrough
CT: control target
= control target key end

     0   :  { %v1081_v3 = vmov 0.0   ;;  %s1082_s27 = smov 1   ;;  %s1083_s10 = smov 127   ;;  %s1649_s1 = inlined_call_operand.vmem [shape: f32[128,128], index: 1, kind: input, shape index: {}]   ;;  %s1650_s0 = inlined_call_operand.vmem [shape: f32[32,128], index: 0, kind: input, shape index: {}]   ;;  %s1651_s2 = inlined_call_operand.vmem [shape: f32[1,128], index: 2, kind: input, shape index: {}]   ;;  %s1652_s3 = inlined_call_operand.vmem [shape: f32[1,128], index: 3, kind: input, shape index: {}]   ;;  %s1653_s4 = inlined_call_operand.vmem [shape: f32[32,128], index: 4, kind: output, shape index: {0}]   ;;  %s1654_s5 = inlined_call_operand.vmem [shape: f32[32,128], index: 5, kind: output, shape index: {1}]   ;;  %s1655_s6 = inlined_call_operand.vmem [shape: f32[32,128], index: 6, kind: output, shape index: {2}]  }
   0x1   :  { %v24_v0 = vld [vmem:[%s1649_s1] sm:$0xff]  ;;  %v25_v1 = vld [vmem:[%s1649_s1 + $0x8] sm:$0xff]  ;;  %v26_v2 = vld [vmem:[%s1649_s1 + $0x10] sm:$0xff]  ;;  %132 = vrot.lane.b32.xlu0 %v1081_v3, %s1082_s27 }
   0x2   :  { %v1028_v4 = vpack.c.bf16 %v25_v1, %v24_v0  ;;  %v27_v5 = vld [vmem:[%s1649_s1 + $0x18] sm:$0xff]  ;;  %v28_v7 = vld [vmem:[%s1649_s1 + $0x20] sm:$0xff]  ;;  %v29_v8 = vld [vmem:[%s1649_s1 + $0x28] sm:$0xff] }
   0x3   :  { %v1032_v6 = vpack.c.bf16 %v27_v5, %v26_v2  ;;  %v1036_v9 = vpack.c.bf16 %v29_v8, %v28_v7  ;;  %v20_v10 = vld [vmem:[%s1650_s0] sm:$0xff]  ;;  %v30_v11 = vld [vmem:[%s1649_s1 + $0x30] sm:$0xff]  ;;  %v31_v12 = vld [vmem:[%s1649_s1 + $0x38] sm:$0xff] }
   0x4   :  { %1029 = vmatprep.subr.bf16.mxu0 %v1028_v4  ;;  %1060 = vmatprep.subr.bf16.mxu1 %v1028_v4  ;;  %v1040_v13 = vpack.c.bf16 %v31_v12, %v30_v11  ;;  %v32_v14 = vld [vmem:[%s1649_s1 + $0x40] sm:$0xff]  ;;  %v33_v15 = vld [vmem:[%s1649_s1 + $0x48] sm:$0xff]  ;;  %v34_v17 = vld [vmem:[%s1649_s1 + $0x50] sm:$0xff] }
   0x5   :  { %1031 = vmatpush3.bf16.msra.mxu0 %v1028_v4  ;;  %134 = vrot.lane.b32.xlu0 %v1081_v3, %s1083_s10  ;;  %v1044_v16 = vpack.c.bf16 %v33_v15, %v32_v14  ;;  %v35_v18 = vld [vmem:[%s1649_s1 + $0x58] sm:$0xff]  ;;  %v36_v20 = vld [vmem:[%s1649_s1 + $0x60] sm:$0xff]  ;;  %v37_v21 = vld [vmem:[%s1649_s1 + $0x68] sm:$0xff] }
   0x6   :  { %1033 = vmatprep.subr.bf16.mxu0 %v1032_v6  ;;  %1068 = vmatpush3.bf16.msra.mxu1 %v1028_v4  ;;  %v1048_v19 = vpack.c.bf16 %v35_v18, %v34_v17  ;;  %v1052_v22 = vpack.c.bf16 %v37_v21, %v36_v20  ;;  %v38_v23 = vld [vmem:[%s1649_s1 + $0x70] sm:$0xff]  ;;  %v39_v24 = vld [vmem:[%s1649_s1 + $0x78] sm:$0xff]  ;;  %v21_v26 = vld [vmem:[%s1650_s0 + $0x8] sm:$0xff] }
   0x7   :  { %1022 = vmatprep.mubr.f32.mxu0 %v20_v10  ;;  %1061 = vmatprep.subr.bf16.mxu1 %v1032_v6  ;;  %v1056_v25 = vpack.c.bf16 %v39_v24, %v38_v23  ;;  %v1180_v31 = vld [vmem:[%s1651_s2] sm:$0x1] }
   0x8   :  { %v1185_v32 = vld [vmem:[%s1652_s3] sm:$0x1]  ;;  %v137_v34 = vmul.f32 0.0, %v1180_v31 }
   0x9   :  { %1035 = vmatpush3.bf16.msra.mxu0 %v1032_v6 }
   0xa   :  { %1037 = vmatprep.subr.bf16.mxu0 %v1036_v9  ;;  %1069 = vmatpush3.bf16.msra.mxu1 %v1032_v6 }
   0xb   :  { %1062 = vmatprep.subr.bf16.mxu1 %v1036_v9 }
   0xd   :  { %1039 = vmatpush3.bf16.msra.mxu0 %v1036_v9 }
   0xe   :  { %1041 = vmatprep.subr.bf16.mxu0 %v1040_v13  ;;  %1070 = vmatpush3.bf16.msra.mxu1 %v1036_v9 }
   0xf   :  { %1063 = vmatprep.subr.bf16.mxu1 %v1040_v13 }
  0x11   :  { %1043 = vmatpush3.bf16.msra.mxu0 %v1040_v13 }
  0x12   :  { %1045 = vmatprep.subr.bf16.mxu0 %v1044_v16  ;;  %1071 = vmatpush3.bf16.msra.mxu1 %v1040_v13 }
  0x13   :  { %1064 = vmatprep.subr.bf16.mxu1 %v1044_v16 }
  0x15   :  { %1047 = vmatpush3.bf16.msra.mxu0 %v1044_v16 }
  0x16   :  { %1049 = vmatprep.subr.bf16.mxu0 %v1048_v19  ;;  %1072 = vmatpush3.bf16.msra.mxu1 %v1044_v16 }
  0x17   :  { %1065 = vmatprep.subr.bf16.mxu1 %v1048_v19 }
  0x19   :  { %1051 = vmatpush3.bf16.msra.mxu0 %v1048_v19 }
  0x1a   :  { %1053 = vmatprep.subr.bf16.mxu0 %v1052_v22  ;;  %1073 = vmatpush3.bf16.msra.mxu1 %v1048_v19 }
  0x1b   :  { %1066 = vmatprep.subr.bf16.mxu1 %v1052_v22 }
  0x1d   :  { %1055 = vmatpush3.bf16.msra.mxu0 %v1052_v22 }
  0x1e   :  { %1057 = vmatprep.subr.bf16.mxu0 %v1056_v25  ;;  %1074 = vmatpush3.bf16.msra.mxu1 %v1052_v22 }
  0x1f   :  { %1067 = vmatprep.subr.bf16.mxu1 %v1056_v25 }
  0x21   :  { %1059 = vmatpush3.bf16.msra.mxu0 %v1056_v25 }
  0x22   :  { %1075 = vmatpush3.bf16.msra.mxu1 %v1056_v25 }
  0x24   :  { %1023 = vmatmul.mubr.f32.vlgmr.msra.gmra.mrb[0].mxu0 %v21_v26 }
  0x73   :  { %v133_v27 = vpop.permute.xlu0 %132 }
  0x77   :  { %v135_v28 = vpop.permute.xlu0 %134 }
  0x78   :  { %v136_v29 = vadd.f32 %v135_v28, %v133_v27 }
  0x7a   :  { %v138_v35 = vmul.f32 %v136_v29, %v1185_v32 }
  0x7c   :  { %v139_v36 = vadd.f32 %v138_v35, %v137_v34 }
  0xf7   :  { %v1024_v30 = vpop.f32.mrb[0].mxu0 }
  0xf8   :  { %126 = vst [vmem:[#allocation2 + $0x8] sm:$0xff] %v1024_v30  ;;  %v106_v33 = vpop.f32.mrb[1].mxu0 }
  0xf9   :  { %125 = vst [vmem:[#allocation2] sm:$0xff] %v106_v33 }
 0x100   :  { %v131_v37 = vld [vmem:[#allocation2] sm:$0x1]  ;;  %v151_v49 = vld [vmem:[#allocation2 + $0x1] sm:$0x1]  ;;  %v176_v4 = vld [vmem:[#allocation2 + $0x2] sm:$0x1] }
 0x101   :  { %v141_v38 = vadd.f32 %v139_v36, %v131_v37  ;;  %v201_v22 = vld [vmem:[#allocation2 + $0x3] sm:$0x1] }
 0x103   :  { %vm142_vm0 = vcmp.gt.f32.partialorder %v141_v38, 1.0 }
 0x104   :  { %v938_v39 = vsel %vm142_vm0, 1.0, %v1081_v3  ;;  %v147_v40 = vsel %vm142_vm0, 0.0, %v141_v38 }
 0x105   :  { %149 = vst [vmem:[%s1654_s5] sm:$0x1] %v147_v40  ;;  %152 = vrot.lane.b32.xlu1 %v938_v39, %s1082_s27  ;;  %v145_v41 = vmul.f32 0.2, %v938_v39  ;;  %148 = vst [vmem:[%s1653_s4] sm:$0x1] %v938_v39  ;;  %v161_v44 = vmul.f32 0.9, %v147_v40  ;;  %v157_v47 = vmul.f32 %v938_v39, %v1180_v31 }
 0x107   :  { %150 = vst [vmem:[%s1655_s6] sm:$0x1] %v145_v41  ;;  %v167_v46 = vmul.f32 0.9, %v145_v41  ;;  %v162_v50 = vadd.f32 %v161_v44, %v151_v49  ;;  %v160_v54 = vadd.f32 1.0, %v145_v41 }
 0x109   :  { %154 = vrot.lane.b32.xlu1 %v938_v39, %s1083_s10  ;;  %v168_v52 = vsub.f32 1.0, %v167_v46 }
 0x10b   :  { %v169_v55 = vmul.f32 0.2, %v168_v52 }
 0x177   :  { %v153_v42 = vpop.permute.xlu1 %152 }
 0x17b   :  { %v155_v43 = vpop.permute.xlu1 %154 }
 0x17c   :  { %v156_v45 = vadd.f32 %v155_v43, %v153_v42  ;;  %v226_v42 = vld [vmem:[#allocation2 + $0x4] sm:$0x1] }
 0x17e   :  { %v158_v48 = vmul.f32 %v156_v45, %v1185_v32 }
 0x180   :  { %v159_v51 = vadd.f32 %v158_v48, %v157_v47 }
 0x182   :  { %v163_v53 = vadd.f32 %v162_v50, %v159_v51 }
 0x184   :  { %vm164_vm1 = vcmp.gt.f32.partialorder %v163_v53, %v160_v54 }
 0x185   :  { %v939_v56 = vsel %vm164_vm1, 1.0, %v1081_v3  ;;  %v172_v57 = vsel %vm164_vm1, 0.0, %v163_v53 }
 0x186   :  { %174 = vst [vmem:[%s1654_s5 + $0x1] sm:$0x1] %v172_v57  ;;  %179 = vrot.lane.b32.xlu1 %v939_v56, %s1083_s10  ;;  %v170_v58 = vmul.f32 %v939_v56, %v169_v55  ;;  %173 = vst [vmem:[%s1653_s4 + $0x1] sm:$0x1] %v939_v56  ;;  %177 = vrot.lane.b32.xlu0 %v939_v56, %s1082_s27  ;;  %v186_v62 = vmul.f32 0.9, %v172_v57  ;;  %v182_v1 = vmul.f32 %v939_v56, %v1180_v31 }
 0x188   :  { %v171_v59 = vadd.f32 %v170_v58, %v167_v46  ;;  %v187_v5 = vadd.f32 %v186_v62, %v176_v4 }
 0x18a   :  { %175 = vst [vmem:[%s1655_s6 + $0x1] sm:$0x1] %v171_v59  ;;  %v192_v0 = vmul.f32 0.9, %v171_v59  ;;  %v185_v9 = vadd.f32 1.0, %v171_v59 }
 0x18c   :  { %v193_v7 = vsub.f32 1.0, %v192_v0 }
 0x18e   :  { %v194_v10 = vmul.f32 0.2, %v193_v7 }
 0x1f8   :  { %v180_v60 = vpop.permute.xlu1 %179  ;;  %v178_v61 = vpop.permute.xlu0 %177 }
 0x1f9   :  { %v181_v63 = vadd.f32 %v180_v60, %v178_v61  ;;  %v251_v60 = vld [vmem:[#allocation2 + $0x5] sm:$0x1] }
 0x1fb   :  { %v183_v2 = vmul.f32 %v181_v63, %v1185_v32 }
 0x1fd   :  { %v184_v6 = vadd.f32 %v183_v2, %v182_v1 }
 0x1ff   :  { %v188_v8 = vadd.f32 %v187_v5, %v184_v6 }
 0x201   :  { %vm189_vm2 = vcmp.gt.f32.partialorder %v188_v8, %v185_v9 }
 0x202   :  { %v940_v11 = vsel %vm189_vm2, 1.0, %v1081_v3  ;;  %v197_v12 = vsel %vm189_vm2, 0.0, %v188_v8 }
 0x203   :  { %199 = vst [vmem:[%s1654_s5 + $0x2] sm:$0x1] %v197_v12  ;;  %204 = vrot.lane.b32.xlu1 %v940_v11, %s1083_s10  ;;  %v195_v13 = vmul.f32 %v940_v11, %v194_v10  ;;  %198 = vst [vmem:[%s1653_s4 + $0x2] sm:$0x1] %v940_v11  ;;  %202 = vrot.lane.b32.xlu0 %v940_v11, %s1082_s27  ;;  %v211_v17 = vmul.f32 0.9, %v197_v12  ;;  %v207_v20 = vmul.f32 %v940_v11, %v1180_v31 }
 0x205   :  { %v196_v14 = vadd.f32 %v195_v13, %v192_v0  ;;  %v212_v23 = vadd.f32 %v211_v17, %v201_v22 }
 0x207   :  { %200 = vst [vmem:[%s1655_s6 + $0x2] sm:$0x1] %v196_v14  ;;  %v217_v19 = vmul.f32 0.9, %v196_v14  ;;  %v210_v27 = vadd.f32 1.0, %v196_v14 }
 0x209   :  { %v218_v25 = vsub.f32 1.0, %v217_v19 }
 0x20b   :  { %v219_v28 = vmul.f32 0.2, %v218_v25 }
 0x275   :  { %v205_v15 = vpop.permute.xlu1 %204  ;;  %v203_v16 = vpop.permute.xlu0 %202 }
 0x276   :  { %v206_v18 = vadd.f32 %v205_v15, %v203_v16  ;;  %v276_v15 = vld [vmem:[#allocation2 + $0x6] sm:$0x1] }
 0x278   :  { %v208_v21 = vmul.f32 %v206_v18, %v1185_v32 }
 0x27a   :  { %v209_v24 = vadd.f32 %v208_v21, %v207_v20 }
 0x27c   :  { %v213_v26 = vadd.f32 %v212_v23, %v209_v24 }
 0x27e   :  { %vm214_vm3 = vcmp.gt.f32.partialorder %v213_v26, %v210_v27 }
 0x27f   :  { %v941_v29 = vsel %vm214_vm3, 1.0, %v1081_v3  ;;  %v222_v30 = vsel %vm214_vm3, 0.0, %v213_v26 }
 0x280   :  { %224 = vst [vmem:[%s1654_s5 + $0x3] sm:$0x1] %v222_v30  ;;  %229 = vrot.lane.b32.xlu1 %v941_v29, %s1083_s10  ;;  %v220_v33 = vmul.f32 %v941_v29, %v219_v28  ;;  %223 = vst [vmem:[%s1653_s4 + $0x3] sm:$0x1] %v941_v29  ;;  %227 = vrot.lane.b32.xlu0 %v941_v29, %s1082_s27  ;;  %v236_v37 = vmul.f32 0.9, %v222_v30  ;;  %v232_v40 = vmul.f32 %v941_v29, %v1180_v31 }
 0x282   :  { %v221_v34 = vadd.f32 %v220_v33, %v217_v19  ;;  %v237_v43 = vadd.f32 %v236_v37, %v226_v42 }
 0x284   :  { %225 = vst [vmem:[%s1655_s6 + $0x3] sm:$0x1] %v221_v34  ;;  %v242_v39 = vmul.f32 0.9, %v221_v34  ;;  %v235_v47 = vadd.f32 1.0, %v221_v34 }
 0x286   :  { %v243_v45 = vsub.f32 1.0, %v242_v39 }
 0x288   :  { %v244_v48 = vmul.f32 0.2, %v243_v45 }
 0x2f2   :  { %v230_v35 = vpop.permute.xlu1 %229  ;;  %v228_v36 = vpop.permute.xlu0 %227 }
 0x2f3   :  { %v231_v38 = vadd.f32 %v230_v35, %v228_v36  ;;  %v301_v35 = vld [vmem:[#allocation2 + $0x7] sm:$0x1] }
 0x2f5   :  { %v233_v41 = vmul.f32 %v231_v38, %v1185_v32 }
 0x2f7   :  { %v234_v44 = vadd.f32 %v233_v41, %v232_v40 }
 0x2f9   :  { %v238_v46 = vadd.f32 %v237_v43, %v234_v44 }
 0x2fb   :  { %vm239_vm4 = vcmp.gt.f32.partialorder %v238_v46, %v235_v47 }
 0x2fc   :  { %v942_v49 = vsel %vm239_vm4, 1.0, %v1081_v3  ;;  %v247_v50 = vsel %vm239_vm4, 0.0, %v238_v46 }
 0x2fd   :  { %249 = vst [vmem:[%s1654_s5 + $0x4] sm:$0x1] %v247_v50  ;;  %254 = vrot.lane.b32.xlu1 %v942_v49, %s1083_s10  ;;  %v245_v51 = vmul.f32 %v942_v49, %v244_v48  ;;  %248 = vst [vmem:[%s1653_s4 + $0x4] sm:$0x1] %v942_v49  ;;  %252 = vrot.lane.b32.xlu0 %v942_v49, %s1082_s27  ;;  %v261_v55 = vmul.f32 0.9, %v247_v50  ;;  %v257_v58 = vmul.f32 %v942_v49, %v1180_v31 }
 0x2ff   :  { %v246_v52 = vadd.f32 %v245_v51, %v242_v39  ;;  %v262_v61 = vadd.f32 %v261_v55, %v251_v60 }
 0x301   :  { %250 = vst [vmem:[%s1655_s6 + $0x4] sm:$0x1] %v246_v52  ;;  %v267_v57 = vmul.f32 0.9, %v246_v52  ;;  %v260_v1 = vadd.f32 1.0, %v246_v52 }
 0x303   :  { %v268_v63 = vsub.f32 1.0, %v267_v57 }
 0x305   :  { %v269_v2 = vmul.f32 0.2, %v268_v63 }
 0x36f   :  { %v255_v53 = vpop.permute.xlu1 %254  ;;  %v253_v54 = vpop.permute.xlu0 %252 }
 0x370   :  { %v256_v56 = vadd.f32 %v255_v53, %v253_v54  ;;  %v326_v53 = vld [vmem:[#allocation2 + $0x8] sm:$0x1] }
 0x372   :  { %v258_v59 = vmul.f32 %v256_v56, %v1185_v32 }
 0x374   :  { %v259_v62 = vadd.f32 %v258_v59, %v257_v58 }
 0x376   :  { %v263_v0 = vadd.f32 %v262_v61, %v259_v62 }
 0x378   :  { %vm264_vm5 = vcmp.gt.f32.partialorder %v263_v0, %v260_v1 }
 0x379   :  { %v943_v4 = vsel %vm264_vm5, 1.0, %v1081_v3  ;;  %v272_v5 = vsel %vm264_vm5, 0.0, %v263_v0 }
 0x37a   :  { %274 = vst [vmem:[%s1654_s5 + $0x5] sm:$0x1] %v272_v5  ;;  %279 = vrot.lane.b32.xlu1 %v943_v4, %s1083_s10  ;;  %v270_v6 = vmul.f32 %v943_v4, %v269_v2  ;;  %273 = vst [vmem:[%s1653_s4 + $0x5] sm:$0x1] %v943_v4  ;;  %277 = vrot.lane.b32.xlu0 %v943_v4, %s1082_s27  ;;  %v286_v10 = vmul.f32 0.9, %v272_v5  ;;  %v282_v13 = vmul.f32 %v943_v4, %v1180_v31 }
 0x37c   :  { %v271_v7 = vadd.f32 %v270_v6, %v267_v57  ;;  %v287_v16 = vadd.f32 %v286_v10, %v276_v15 }
 0x37e   :  { %275 = vst [vmem:[%s1655_s6 + $0x5] sm:$0x1] %v271_v7  ;;  %v292_v12 = vmul.f32 0.9, %v271_v7  ;;  %v285_v20 = vadd.f32 1.0, %v271_v7 }
 0x380   :  { %v293_v18 = vsub.f32 1.0, %v292_v12 }
 0x382   :  { %v294_v21 = vmul.f32 0.2, %v293_v18 }
 0x3ec   :  { %v280_v8 = vpop.permute.xlu1 %279  ;;  %v278_v9 = vpop.permute.xlu0 %277 }
 0x3ed   :  { %v281_v11 = vadd.f32 %v280_v8, %v278_v9  ;;  %v351_v8 = vld [vmem:[#allocation2 + $0x9] sm:$0x1] }
 0x3ef   :  { %v283_v14 = vmul.f32 %v281_v11, %v1185_v32 }
 0x3f1   :  { %v284_v17 = vadd.f32 %v283_v14, %v282_v13 }
 0x3f3   :  { %v288_v19 = vadd.f32 %v287_v16, %v284_v17 }
 0x3f5   :  { %vm289_vm6 = vcmp.gt.f32.partialorder %v288_v19, %v285_v20 }
 0x3f6   :  { %v944_v22 = vsel %vm289_vm6, 1.0, %v1081_v3  ;;  %v297_v23 = vsel %vm289_vm6, 0.0, %v288_v19 }
 0x3f7   :  { %299 = vst [vmem:[%s1654_s5 + $0x6] sm:$0x1] %v297_v23  ;;  %304 = vrot.lane.b32.xlu1 %v944_v22, %s1083_s10  ;;  %v295_v24 = vmul.f32 %v944_v22, %v294_v21  ;;  %298 = vst [vmem:[%s1653_s4 + $0x6] sm:$0x1] %v944_v22  ;;  %302 = vrot.lane.b32.xlu0 %v944_v22, %s1082_s27  ;;  %v311_v28 = vmul.f32 0.9, %v297_v23  ;;  %v307_v33 = vmul.f32 %v944_v22, %v1180_v31 }
 0x3f9   :  { %v296_v25 = vadd.f32 %v295_v24, %v292_v12  ;;  %v312_v36 = vadd.f32 %v311_v28, %v301_v35 }
 0x3fb   :  { %300 = vst [vmem:[%s1655_s6 + $0x6] sm:$0x1] %v296_v25  ;;  %v317_v30 = vmul.f32 0.9, %v296_v25  ;;  %v310_v40 = vadd.f32 1.0, %v296_v25 }
 0x3fd   :  { %v318_v38 = vsub.f32 1.0, %v317_v30 }
 0x3ff   :  { %v319_v41 = vmul.f32 0.2, %v318_v38 }
 0x469   :  { %v305_v26 = vpop.permute.xlu1 %304  ;;  %v303_v27 = vpop.permute.xlu0 %302 }
 0x46a   :  { %v306_v29 = vadd.f32 %v305_v26, %v303_v27  ;;  %v376_v26 = vld [vmem:[#allocation2 + $0xa] sm:$0x1] }
 0x46c   :  { %v308_v34 = vmul.f32 %v306_v29, %v1185_v32 }
 0x46e   :  { %v309_v37 = vadd.f32 %v308_v34, %v307_v33 }
 0x470   :  { %v313_v39 = vadd.f32 %v312_v36, %v309_v37 }
 0x472   :  { %vm314_vm7 = vcmp.gt.f32.partialorder %v313_v39, %v310_v40 }
 0x473   :  { %v945_v42 = vsel %vm314_vm7, 1.0, %v1081_v3  ;;  %v322_v43 = vsel %vm314_vm7, 0.0, %v313_v39 }
 0x474   :  { %324 = vst [vmem:[%s1654_s5 + $0x7] sm:$0x1] %v322_v43  ;;  %329 = vrot.lane.b32.xlu1 %v945_v42, %s1083_s10  ;;  %v320_v44 = vmul.f32 %v945_v42, %v319_v41  ;;  %323 = vst [vmem:[%s1653_s4 + $0x7] sm:$0x1] %v945_v42  ;;  %327 = vrot.lane.b32.xlu0 %v945_v42, %s1082_s27  ;;  %v336_v48 = vmul.f32 0.9, %v322_v43  ;;  %v332_v51 = vmul.f32 %v945_v42, %v1180_v31 }
 0x476   :  { %v321_v45 = vadd.f32 %v320_v44, %v317_v30  ;;  %v337_v54 = vadd.f32 %v336_v48, %v326_v53 }
 0x478   :  { %325 = vst [vmem:[%s1655_s6 + $0x7] sm:$0x1] %v321_v45  ;;  %v342_v50 = vmul.f32 0.9, %v321_v45  ;;  %v335_v58 = vadd.f32 1.0, %v321_v45 }
 0x47a   :  { %v343_v56 = vsub.f32 1.0, %v342_v50 }
 0x47c   :  { %v344_v59 = vmul.f32 0.2, %v343_v56 }
 0x4e6   :  { %v330_v46 = vpop.permute.xlu1 %329  ;;  %v328_v47 = vpop.permute.xlu0 %327 }
 0x4e7   :  { %v331_v49 = vadd.f32 %v330_v46, %v328_v47  ;;  %v401_v46 = vld [vmem:[#allocation2 + $0xb] sm:$0x1] }
 0x4e9   :  { %v333_v52 = vmul.f32 %v331_v49, %v1185_v32 }
 0x4eb   :  { %v334_v55 = vadd.f32 %v333_v52, %v332_v51 }
 0x4ed   :  { %v338_v57 = vadd.f32 %v337_v54, %v334_v55 }
 0x4ef   :  { %vm339_vm8 = vcmp.gt.f32.partialorder %v338_v57, %v335_v58 }
 0x4f0   :  { %v946_v60 = vsel %vm339_vm8, 1.0, %v1081_v3  ;;  %v347_v61 = vsel %vm339_vm8, 0.0, %v338_v57 }
 0x4f1   :  { %349 = vst [vmem:[%s1654_s5 + $0x8] sm:$0x1] %v347_v61  ;;  %354 = vrot.lane.b32.xlu1 %v946_v60, %s1083_s10  ;;  %v345_v62 = vmul.f32 %v946_v60, %v344_v59  ;;  %348 = vst [vmem:[%s1653_s4 + $0x8] sm:$0x1] %v946_v60  ;;  %352 = vrot.lane.b32.xlu0 %v946_v60, %s1082_s27  ;;  %v361_v2 = vmul.f32 0.9, %v347_v61  ;;  %v357_v6 = vmul.f32 %v946_v60, %v1180_v31 }
 0x4f3   :  { %v346_v63 = vadd.f32 %v345_v62, %v342_v50  ;;  %v362_v9 = vadd.f32 %v361_v2, %v351_v8  ;;  %v23_v8 = vld [vmem:[%s1650_s0 + $0x18] sm:$0xff] }
 0x4f5   :  { %350 = vst [vmem:[%s1655_s6 + $0x8] sm:$0x1] %v346_v63  ;;  %v367_v5 = vmul.f32 0.9, %v346_v63  ;;  %v360_v13 = vadd.f32 1.0, %v346_v63 }
 0x4f7   :  { %v368_v11 = vsub.f32 1.0, %v367_v5 }
 0x4f9   :  { %v369_v14 = vmul.f32 0.2, %v368_v11 }
 0x563   :  { %v355_v0 = vpop.permute.xlu1 %354  ;;  %v353_v1 = vpop.permute.xlu0 %352 }
 0x564   :  { %v356_v4 = vadd.f32 %v355_v0, %v353_v1  ;;  %v426_v0 = vld [vmem:[#allocation2 + $0xc] sm:$0x1] }
 0x566   :  { %v358_v7 = vmul.f32 %v356_v4, %v1185_v32 }
 0x568   :  { %v359_v10 = vadd.f32 %v358_v7, %v357_v6  ;;  %v22_v7 = vld [vmem:[%s1650_s0 + $0x10] sm:$0xff] }
 0x569   :  { %1025 = vmatprep.mubr.f32.mxu1 %v22_v7 }
 0x56a   :  { %v363_v12 = vadd.f32 %v362_v9, %v359_v10  ;;  %1026 = vmatmul.mubr.f32.vlgmr.msra.gmra.mrb[0].mxu1 %v23_v8 }
 0x56c   :  { %vm364_vm9 = vcmp.gt.f32.partialorder %v363_v12, %v360_v13 }
 0x56d   :  { %v947_v15 = vsel %vm364_vm9, 1.0, %v1081_v3  ;;  %v372_v16 = vsel %vm364_vm9, 0.0, %v363_v12 }
 0x56e   :  { %374 = vst [vmem:[%s1654_s5 + $0x9] sm:$0x1] %v372_v16  ;;  %379 = vrot.lane.b32.xlu1 %v947_v15, %s1083_s10  ;;  %v370_v17 = vmul.f32 %v947_v15, %v369_v14  ;;  %373 = vst [vmem:[%s1653_s4 + $0x9] sm:$0x1] %v947_v15  ;;  %377 = vrot.lane.b32.xlu0 %v947_v15, %s1082_s27  ;;  %v386_v21 = vmul.f32 0.9, %v372_v16  ;;  %v382_v24 = vmul.f32 %v947_v15, %v1180_v31 }
 0x570   :  { %v371_v18 = vadd.f32 %v370_v17, %v367_v5  ;;  %v387_v27 = vadd.f32 %v386_v21, %v376_v26  ;;  %v451_v21 = vld [vmem:[#allocation2 + $0xd] sm:$0x1] }
 0x572   :  { %375 = vst [vmem:[%s1655_s6 + $0x9] sm:$0x1] %v371_v18  ;;  %v392_v23 = vmul.f32 0.9, %v371_v18  ;;  %v385_v33 = vadd.f32 1.0, %v371_v18 }
 0x574   :  { %v393_v29 = vsub.f32 1.0, %v392_v23 }
 0x576   :  { %v394_v34 = vmul.f32 0.2, %v393_v29 }
 0x5e0   :  { %v380_v19 = vpop.permute.xlu1 %379  ;;  %v378_v20 = vpop.permute.xlu0 %377 }
 0x5e1   :  { %v381_v22 = vadd.f32 %v380_v19, %v378_v20 }
 0x5e3   :  { %v383_v25 = vmul.f32 %v381_v22, %v1185_v32 }
 0x5e5   :  { %v384_v28 = vadd.f32 %v383_v25, %v382_v24 }
 0x5e7   :  { %v388_v30 = vadd.f32 %v387_v27, %v384_v28 }
 0x5e9   :  { %vm389_vm10 = vcmp.gt.f32.partialorder %v388_v30, %v385_v33 }
 0x5ea   :  { %v948_v35 = vsel %vm389_vm10, 1.0, %v1081_v3  ;;  %v397_v36 = vsel %vm389_vm10, 0.0, %v388_v30 }
 0x5eb   :  { %399 = vst [vmem:[%s1654_s5 + $0xa] sm:$0x1] %v397_v36  ;;  %404 = vrot.lane.b32.xlu1 %v948_v35, %s1083_s10  ;;  %v395_v37 = vmul.f32 %v948_v35, %v394_v34  ;;  %398 = vst [vmem:[%s1653_s4 + $0xa] sm:$0x1] %v948_v35  ;;  %402 = vrot.lane.b32.xlu0 %v948_v35, %s1082_s27  ;;  %v411_v41 = vmul.f32 0.9, %v397_v36  ;;  %v407_v44 = vmul.f32 %v948_v35, %v1180_v31 }
 0x5ed   :  { %v396_v38 = vadd.f32 %v395_v37, %v392_v23  ;;  %v412_v47 = vadd.f32 %v411_v41, %v401_v46  ;;  %v476_v41 = vld [vmem:[#allocation2 + $0xe] sm:$0x1] }
 0x5ef   :  { %400 = vst [vmem:[%s1655_s6 + $0xa] sm:$0x1] %v396_v38  ;;  %v417_v43 = vmul.f32 0.9, %v396_v38  ;;  %v410_v51 = vadd.f32 1.0, %v396_v38 }
 0x5f1   :  { %v418_v49 = vsub.f32 1.0, %v417_v43 }
 0x5f3   :  { %v419_v52 = vmul.f32 0.2, %v418_v49 }
 0x65d   :  { %v405_v39 = vpop.permute.xlu1 %404  ;;  %v403_v40 = vpop.permute.xlu0 %402 }
 0x65e   :  { %v406_v42 = vadd.f32 %v405_v39, %v403_v40 }
 0x660   :  { %v408_v45 = vmul.f32 %v406_v42, %v1185_v32  ;;  %v1027_v42 = vpop.f32.mrb[0].mxu1 }
 0x661   :  { %128 = vst [vmem:[#allocation2 + $0x18] sm:$0xff] %v1027_v42  ;;  %v116_v46 = vpop.f32.mrb[1].mxu1 }
 0x662   :  { %v409_v48 = vadd.f32 %v408_v45, %v407_v44  ;;  %127 = vst [vmem:[#allocation2 + $0x10] sm:$0xff] %v116_v46 }
 0x664   :  { %v413_v50 = vadd.f32 %v412_v47, %v409_v48 }
 0x666   :  { %vm414_vm11 = vcmp.gt.f32.partialorder %v413_v50, %v410_v51 }
 0x667   :  { %v949_v53 = vsel %vm414_vm11, 1.0, %v1081_v3  ;;  %v422_v54 = vsel %vm414_vm11, 0.0, %v413_v50 }
 0x668   :  { %424 = vst [vmem:[%s1654_s5 + $0xb] sm:$0x1] %v422_v54  ;;  %429 = vrot.lane.b32.xlu1 %v949_v53, %s1083_s10  ;;  %v420_v55 = vmul.f32 %v949_v53, %v419_v52  ;;  %423 = vst [vmem:[%s1653_s4 + $0xb] sm:$0x1] %v949_v53  ;;  %427 = vrot.lane.b32.xlu0 %v949_v53, %s1082_s27  ;;  %v436_v59 = vmul.f32 0.9, %v422_v54  ;;  %v432_v62 = vmul.f32 %v949_v53, %v1180_v31 }
 0x66a   :  { %v421_v56 = vadd.f32 %v420_v55, %v417_v43  ;;  %v437_v1 = vadd.f32 %v436_v59, %v426_v0 }
 0x66c   :  { %425 = vst [vmem:[%s1655_s6 + $0xb] sm:$0x1] %v421_v56  ;;  %v442_v61 = vmul.f32 0.9, %v421_v56  ;;  %v435_v6 = vadd.f32 1.0, %v421_v56 }
 0x66e   :  { %v443_v4 = vsub.f32 1.0, %v442_v61 }
 0x670   :  { %v444_v9 = vmul.f32 0.2, %v443_v4 }
 0x6da   :  { %v430_v57 = vpop.permute.xlu1 %429  ;;  %v428_v58 = vpop.permute.xlu0 %427 }
 0x6db   :  { %v431_v60 = vadd.f32 %v430_v57, %v428_v58 }
 0x6dd   :  { %v433_v63 = vmul.f32 %v431_v60, %v1185_v32 }
 0x6df   :  { %v434_v2 = vadd.f32 %v433_v63, %v432_v62 }
 0x6e1   :  { %v438_v5 = vadd.f32 %v437_v1, %v434_v2 }
 0x6e3   :  { %vm439_vm12 = vcmp.gt.f32.partialorder %v438_v5, %v435_v6 }
 0x6e4   :  { %v950_v10 = vsel %vm439_vm12, 1.0, %v1081_v3  ;;  %v447_v11 = vsel %vm439_vm12, 0.0, %v438_v5 }
 0x6e5   :  { %449 = vst [vmem:[%s1654_s5 + $0xc] sm:$0x1] %v447_v11  ;;  %454 = vrot.lane.b32.xlu1 %v950_v10, %s1083_s10  ;;  %v445_v12 = vmul.f32 %v950_v10, %v444_v9  ;;  %448 = vst [vmem:[%s1653_s4 + $0xc] sm:$0x1] %v950_v10  ;;  %452 = vrot.lane.b32.xlu0 %v950_v10, %s1082_s27  ;;  %v461_v16 = vmul.f32 0.9, %v447_v11  ;;  %v457_v19 = vmul.f32 %v950_v10, %v1180_v31 }
 0x6e7   :  { %v446_v13 = vadd.f32 %v445_v12, %v442_v61  ;;  %v462_v22 = vadd.f32 %v461_v16, %v451_v21  ;;  %v501_v61 = vld [vmem:[#allocation2 + $0xf] sm:$0x1] }
 0x6e9   :  { %450 = vst [vmem:[%s1655_s6 + $0xc] sm:$0x1] %v446_v13  ;;  %v467_v18 = vmul.f32 0.9, %v446_v13  ;;  %v460_v26 = vadd.f32 1.0, %v446_v13 }
 0x6eb   :  { %v468_v24 = vsub.f32 1.0, %v467_v18 }
 0x6ed   :  { %v469_v27 = vmul.f32 0.2, %v468_v24 }
 0x757   :  { %v455_v14 = vpop.permute.xlu1 %454  ;;  %v453_v15 = vpop.permute.xlu0 %452 }
 0x758   :  { %v456_v17 = vadd.f32 %v455_v14, %v453_v15  ;;  %v526_v14 = vld [vmem:[#allocation2 + $0x10] sm:$0x1] }
 0x75a   :  { %v458_v20 = vmul.f32 %v456_v17, %v1185_v32 }
 0x75c   :  { %v459_v23 = vadd.f32 %v458_v20, %v457_v19 }
 0x75e   :  { %v463_v25 = vadd.f32 %v462_v22, %v459_v23 }
 0x760   :  { %vm464_vm13 = vcmp.gt.f32.partialorder %v463_v25, %v460_v26 }
 0x761   :  { %v951_v28 = vsel %vm464_vm13, 1.0, %v1081_v3  ;;  %v472_v29 = vsel %vm464_vm13, 0.0, %v463_v25 }
 0x762   :  { %474 = vst [vmem:[%s1654_s5 + $0xd] sm:$0x1] %v472_v29  ;;  %479 = vrot.lane.b32.xlu1 %v951_v28, %s1083_s10  ;;  %v470_v30 = vmul.f32 %v951_v28, %v469_v27  ;;  %473 = vst [vmem:[%s1653_s4 + $0xd] sm:$0x1] %v951_v28  ;;  %477 = vrot.lane.b32.xlu0 %v951_v28, %s1082_s27  ;;  %v486_v36 = vmul.f32 0.9, %v472_v29  ;;  %v482_v39 = vmul.f32 %v951_v28, %v1180_v31 }
 0x764   :  { %v471_v33 = vadd.f32 %v470_v30, %v467_v18  ;;  %v487_v43 = vadd.f32 %v486_v36, %v476_v41  ;;  %v551_v36 = vld [vmem:[#allocation2 + $0x11] sm:$0x1] }
 0x766   :  { %475 = vst [vmem:[%s1655_s6 + $0xd] sm:$0x1] %v471_v33  ;;  %v492_v38 = vmul.f32 0.9, %v471_v33  ;;  %v485_v48 = vadd.f32 1.0, %v471_v33 }
 0x768   :  { %v493_v45 = vsub.f32 1.0, %v492_v38 }
 0x76a   :  { %v494_v49 = vmul.f32 0.2, %v493_v45 }
 0x7d4   :  { %v480_v34 = vpop.permute.xlu1 %479  ;;  %v478_v35 = vpop.permute.xlu0 %477 }
 0x7d5   :  { %v481_v37 = vadd.f32 %v480_v34, %v478_v35 }
 0x7d7   :  { %v483_v40 = vmul.f32 %v481_v37, %v1185_v32 }
 0x7d9   :  { %v484_v44 = vadd.f32 %v483_v40, %v482_v39 }
 0x7db   :  { %v488_v47 = vadd.f32 %v487_v43, %v484_v44 }
 0x7dd   :  { %vm489_vm14 = vcmp.gt.f32.partialorder %v488_v47, %v485_v48 }
 0x7de   :  { %v952_v50 = vsel %vm489_vm14, 1.0, %v1081_v3  ;;  %v497_v51 = vsel %vm489_vm14, 0.0, %v488_v47 }
 0x7df   :  { %499 = vst [vmem:[%s1654_s5 + $0xe] sm:$0x1] %v497_v51  ;;  %504 = vrot.lane.b32.xlu1 %v952_v50, %s1083_s10  ;;  %v495_v52 = vmul.f32 %v952_v50, %v494_v49  ;;  %498 = vst [vmem:[%s1653_s4 + $0xe] sm:$0x1] %v952_v50  ;;  %502 = vrot.lane.b32.xlu0 %v952_v50, %s1082_s27  ;;  %v511_v56 = vmul.f32 0.9, %v497_v51  ;;  %v507_v59 = vmul.f32 %v952_v50, %v1180_v31 }
 0x7e1   :  { %v496_v53 = vadd.f32 %v495_v52, %v492_v38  ;;  %v512_v62 = vadd.f32 %v511_v56, %v501_v61 }
 0x7e3   :  { %500 = vst [vmem:[%s1655_s6 + $0xe] sm:$0x1] %v496_v53  ;;  %v517_v58 = vmul.f32 0.9, %v496_v53  ;;  %v510_v2 = vadd.f32 1.0, %v496_v53 }
 0x7e5   :  { %v518_v0 = vsub.f32 1.0, %v517_v58 }
 0x7e7   :  { %v519_v4 = vmul.f32 0.2, %v518_v0 }
 0x851   :  { %v505_v54 = vpop.permute.xlu1 %504  ;;  %v503_v55 = vpop.permute.xlu0 %502 }
 0x852   :  { %v506_v57 = vadd.f32 %v505_v54, %v503_v55  ;;  %v576_v54 = vld [vmem:[#allocation2 + $0x12] sm:$0x1] }
 0x854   :  { %v508_v60 = vmul.f32 %v506_v57, %v1185_v32 }
 0x856   :  { %v509_v63 = vadd.f32 %v508_v60, %v507_v59 }
 0x858   :  { %v513_v1 = vadd.f32 %v512_v62, %v509_v63 }
 0x85a   :  { %vm514_vm15 = vcmp.gt.f32.partialorder %v513_v1, %v510_v2 }
 0x85b   :  { %v953_v5 = vsel %vm514_vm15, 1.0, %v1081_v3  ;;  %v522_v6 = vsel %vm514_vm15, 0.0, %v513_v1 }
 0x85c   :  { %524 = vst [vmem:[%s1654_s5 + $0xf] sm:$0x1] %v522_v6  ;;  %529 = vrot.lane.b32.xlu1 %v953_v5, %s1083_s10  ;;  %v520_v7 = vmul.f32 %v953_v5, %v519_v4  ;;  %523 = vst [vmem:[%s1653_s4 + $0xf] sm:$0x1] %v953_v5  ;;  %527 = vrot.lane.b32.xlu0 %v953_v5, %s1082_s27  ;;  %v536_v11 = vmul.f32 0.9, %v522_v6  ;;  %v532_v15 = vmul.f32 %v953_v5, %v1180_v31 }
 0x85e   :  { %v521_v8 = vadd.f32 %v520_v7, %v517_v58  ;;  %v537_v17 = vadd.f32 %v536_v11, %v526_v14 }
 0x860   :  { %525 = vst [vmem:[%s1655_s6 + $0xf] sm:$0x1] %v521_v8  ;;  %v542_v13 = vmul.f32 0.9, %v521_v8  ;;  %v535_v21 = vadd.f32 1.0, %v521_v8 }
 0x862   :  { %v543_v19 = vsub.f32 1.0, %v542_v13 }
 0x864   :  { %v544_v22 = vmul.f32 0.2, %v543_v19 }
 0x8ce   :  { %v530_v9 = vpop.permute.xlu1 %529  ;;  %v528_v10 = vpop.permute.xlu0 %527 }
 0x8cf   :  { %v531_v12 = vadd.f32 %v530_v9, %v528_v10  ;;  %v601_v9 = vld [vmem:[#allocation2 + $0x13] sm:$0x1] }
 0x8d1   :  { %v533_v16 = vmul.f32 %v531_v12, %v1185_v32 }
 0x8d3   :  { %v534_v18 = vadd.f32 %v533_v16, %v532_v15 }
 0x8d5   :  { %v538_v20 = vadd.f32 %v537_v17, %v534_v18 }
 0x8d7   :  { %vm539_vm0 = vcmp.gt.f32.partialorder %v538_v20, %v535_v21 }
 0x8d8   :  { %v954_v23 = vsel %vm539_vm0, 1.0, %v1081_v3  ;;  %v547_v24 = vsel %vm539_vm0, 0.0, %v538_v20 }
 0x8d9   :  { %549 = vst [vmem:[%s1654_s5 + $0x10] sm:$0x1] %v547_v24  ;;  %554 = vrot.lane.b32.xlu1 %v954_v23, %s1083_s10  ;;  %v545_v25 = vmul.f32 %v954_v23, %v544_v22  ;;  %548 = vst [vmem:[%s1653_s4 + $0x10] sm:$0x1] %v954_v23  ;;  %552 = vrot.lane.b32.xlu0 %v954_v23, %s1082_s27  ;;  %v561_v29 = vmul.f32 0.9, %v547_v24  ;;  %v557_v34 = vmul.f32 %v954_v23, %v1180_v31 }
 0x8db   :  { %v546_v26 = vadd.f32 %v545_v25, %v542_v13  ;;  %v562_v37 = vadd.f32 %v561_v29, %v551_v36 }
 0x8dd   :  { %550 = vst [vmem:[%s1655_s6 + $0x10] sm:$0x1] %v546_v26  ;;  %v567_v33 = vmul.f32 0.9, %v546_v26  ;;  %v560_v41 = vadd.f32 1.0, %v546_v26 }
 0x8df   :  { %v568_v39 = vsub.f32 1.0, %v567_v33 }
 0x8e1   :  { %v569_v42 = vmul.f32 0.2, %v568_v39 }
 0x94b   :  { %v555_v27 = vpop.permute.xlu1 %554  ;;  %v553_v28 = vpop.permute.xlu0 %552 }
 0x94c   :  { %v556_v30 = vadd.f32 %v555_v27, %v553_v28  ;;  %v626_v27 = vld [vmem:[#allocation2 + $0x14] sm:$0x1] }
 0x94e   :  { %v558_v35 = vmul.f32 %v556_v30, %v1185_v32 }
 0x950   :  { %v559_v38 = vadd.f32 %v558_v35, %v557_v34 }
 0x952   :  { %v563_v40 = vadd.f32 %v562_v37, %v559_v38 }
 0x954   :  { %vm564_vm1 = vcmp.gt.f32.partialorder %v563_v40, %v560_v41 }
 0x955   :  { %v955_v43 = vsel %vm564_vm1, 1.0, %v1081_v3  ;;  %v572_v44 = vsel %vm564_vm1, 0.0, %v563_v40 }
 0x956   :  { %574 = vst [vmem:[%s1654_s5 + $0x11] sm:$0x1] %v572_v44  ;;  %579 = vrot.lane.b32.xlu1 %v955_v43, %s1083_s10  ;;  %v570_v45 = vmul.f32 %v955_v43, %v569_v42  ;;  %573 = vst [vmem:[%s1653_s4 + $0x11] sm:$0x1] %v955_v43  ;;  %577 = vrot.lane.b32.xlu0 %v955_v43, %s1082_s27  ;;  %v586_v49 = vmul.f32 0.9, %v572_v44  ;;  %v582_v52 = vmul.f32 %v955_v43, %v1180_v31 }
 0x957   :  { %v1490_v43 = vld [vmem:[%s1651_s2] sm:$0x1] }
 0x958   :  { %v571_v46 = vadd.f32 %v570_v45, %v567_v33  ;;  %v587_v55 = vadd.f32 %v586_v49, %v576_v54  ;;  %v1496_v45 = vld [vmem:[%s1652_s3] sm:$0x1] }
 0x95a   :  { %575 = vst [vmem:[%s1655_s6 + $0x11] sm:$0x1] %v571_v46  ;;  %v592_v51 = vmul.f32 0.9, %v571_v46  ;;  %v585_v59 = vadd.f32 1.0, %v571_v46 }
 0x95c   :  { %v593_v57 = vsub.f32 1.0, %v592_v51 }
 0x95e   :  { %v594_v60 = vmul.f32 0.2, %v593_v57 }
 0x9c8   :  { %v580_v47 = vpop.permute.xlu1 %579  ;;  %v578_v48 = vpop.permute.xlu0 %577 }
 0x9c9   :  { %v581_v50 = vadd.f32 %v580_v47, %v578_v48  ;;  %v651_v47 = vld [vmem:[#allocation2 + $0x15] sm:$0x1] }
 0x9cb   :  { %v583_v53 = vmul.f32 %v581_v50, %v1185_v32 }
 0x9cd   :  { %v584_v56 = vadd.f32 %v583_v53, %v582_v52 }
 0x9cf   :  { %v588_v58 = vadd.f32 %v587_v55, %v584_v56 }
 0x9d1   :  { %vm589_vm2 = vcmp.gt.f32.partialorder %v588_v58, %v585_v59 }
 0x9d2   :  { %v956_v61 = vsel %vm589_vm2, 1.0, %v1081_v3  ;;  %v597_v62 = vsel %vm589_vm2, 0.0, %v588_v58 }
 0x9d3   :  { %599 = vst [vmem:[%s1654_s5 + $0x12] sm:$0x1] %v597_v62  ;;  %604 = vrot.lane.b32.xlu1 %v956_v61, %s1083_s10  ;;  %v595_v63 = vmul.f32 %v956_v61, %v594_v60  ;;  %598 = vst [vmem:[%s1653_s4 + $0x12] sm:$0x1] %v956_v61  ;;  %602 = vrot.lane.b32.xlu0 %v956_v61, %s1082_s27  ;;  %v611_v4 = vmul.f32 0.9, %v597_v62  ;;  %v607_v7 = vmul.f32 %v956_v61, %v1180_v31 }
 0x9d5   :  { %v596_v0 = vadd.f32 %v595_v63, %v592_v51  ;;  %v612_v10 = vadd.f32 %v611_v4, %v601_v9 }
 0x9d7   :  { %600 = vst [vmem:[%s1655_s6 + $0x12] sm:$0x1] %v596_v0  ;;  %v617_v6 = vmul.f32 0.9, %v596_v0  ;;  %v610_v14 = vadd.f32 1.0, %v596_v0 }
 0x9d9   :  { %v618_v12 = vsub.f32 1.0, %v617_v6 }
 0x9db   :  { %v619_v15 = vmul.f32 0.2, %v618_v12 }
 0xa45   :  { %v605_v1 = vpop.permute.xlu1 %604  ;;  %v603_v2 = vpop.permute.xlu0 %602 }
 0xa46   :  { %v606_v5 = vadd.f32 %v605_v1, %v603_v2  ;;  %v676_v1 = vld [vmem:[#allocation2 + $0x16] sm:$0x1] }
 0xa48   :  { %v608_v8 = vmul.f32 %v606_v5, %v1185_v32 }
 0xa4a   :  { %v609_v11 = vadd.f32 %v608_v8, %v607_v7 }
 0xa4c   :  { %v613_v13 = vadd.f32 %v612_v10, %v609_v11 }
 0xa4e   :  { %vm614_vm3 = vcmp.gt.f32.partialorder %v613_v13, %v610_v14 }
 0xa4f   :  { %v957_v16 = vsel %vm614_vm3, 1.0, %v1081_v3  ;;  %v622_v17 = vsel %vm614_vm3, 0.0, %v613_v13 }
 0xa50   :  { %624 = vst [vmem:[%s1654_s5 + $0x13] sm:$0x1] %v622_v17  ;;  %629 = vrot.lane.b32.xlu1 %v957_v16, %s1083_s10  ;;  %v620_v18 = vmul.f32 %v957_v16, %v619_v15  ;;  %623 = vst [vmem:[%s1653_s4 + $0x13] sm:$0x1] %v957_v16  ;;  %627 = vrot.lane.b32.xlu0 %v957_v16, %s1082_s27  ;;  %v636_v22 = vmul.f32 0.9, %v622_v17  ;;  %v632_v25 = vmul.f32 %v957_v16, %v1180_v31 }
 0xa52   :  { %v621_v19 = vadd.f32 %v620_v18, %v617_v6  ;;  %v637_v28 = vadd.f32 %v636_v22, %v626_v27 }
 0xa54   :  { %625 = vst [vmem:[%s1655_s6 + $0x13] sm:$0x1] %v621_v19  ;;  %v642_v24 = vmul.f32 0.9, %v621_v19  ;;  %v635_v34 = vadd.f32 1.0, %v621_v19 }
 0xa56   :  { %v643_v30 = vsub.f32 1.0, %v642_v24 }
 0xa58   :  { %v644_v35 = vmul.f32 0.2, %v643_v30 }
 0xac2   :  { %v630_v20 = vpop.permute.xlu1 %629  ;;  %v628_v21 = vpop.permute.xlu0 %627 }
 0xac3   :  { %v631_v23 = vadd.f32 %v630_v20, %v628_v21  ;;  %v701_v20 = vld [vmem:[#allocation2 + $0x17] sm:$0x1] }
 0xac5   :  { %v633_v26 = vmul.f32 %v631_v23, %v1185_v32 }
 0xac7   :  { %v634_v29 = vadd.f32 %v633_v26, %v632_v25 }
 0xac9   :  { %v638_v33 = vadd.f32 %v637_v28, %v634_v29 }
 0xacb   :  { %vm639_vm4 = vcmp.gt.f32.partialorder %v638_v33, %v635_v34 }
 0xacc   :  { %v958_v36 = vsel %vm639_vm4, 1.0, %v1081_v3  ;;  %v647_v37 = vsel %vm639_vm4, 0.0, %v638_v33 }
 0xacd   :  { %649 = vst [vmem:[%s1654_s5 + $0x14] sm:$0x1] %v647_v37  ;;  %654 = vrot.lane.b32.xlu1 %v958_v36, %s1083_s10  ;;  %v645_v31 = vmul.f32 %v958_v36, %v644_v35  ;;  %648 = vst [vmem:[%s1653_s4 + $0x14] sm:$0x1] %v958_v36  ;;  %652 = vrot.lane.b32.xlu0 %v958_v36, %s1082_s27  ;;  %v661_v40 = vmul.f32 0.9, %v647_v37  ;;  %v657_v44 = vmul.f32 %v1490_v43, %v958_v36 }
 0xacf   :  { %v646_v32 = vadd.f32 %v645_v31, %v642_v24  ;;  %v662_v48 = vadd.f32 %v661_v40, %v651_v47 }
 0xad1   :  { %650 = vst [vmem:[%s1655_s6 + $0x14] sm:$0x1] %v646_v32  ;;  %v667_v42 = vmul.f32 0.9, %v646_v32  ;;  %v660_v52 = vadd.f32 1.0, %v646_v32 }
 0xad3   :  { %v668_v50 = vsub.f32 1.0, %v667_v42 }
 0xad5   :  { %v669_v53 = vmul.f32 0.2, %v668_v50 }
 0xb3f   :  { %v655_v38 = vpop.permute.xlu1 %654  ;;  %v653_v39 = vpop.permute.xlu0 %652 }
 0xb40   :  { %v656_v41 = vadd.f32 %v655_v38, %v653_v39  ;;  %v726_v38 = vld [vmem:[#allocation2 + $0x18] sm:$0x1] }
 0xb42   :  { %v658_v46 = vmul.f32 %v1496_v45, %v656_v41 }
 0xb44   :  { %v659_v49 = vadd.f32 %v658_v46, %v657_v44 }
 0xb46   :  { %v663_v51 = vadd.f32 %v662_v48, %v659_v49 }
 0xb48   :  { %vm664_vm5 = vcmp.gt.f32.partialorder %v663_v51, %v660_v52 }
 0xb49   :  { %v959_v54 = vsel %vm664_vm5, 1.0, %v1081_v3  ;;  %v672_v55 = vsel %vm664_vm5, 0.0, %v663_v51 }
 0xb4a   :  { %674 = vst [vmem:[%s1654_s5 + $0x15] sm:$0x1] %v672_v55  ;;  %679 = vrot.lane.b32.xlu1 %v959_v54, %s1083_s10  ;;  %v670_v56 = vmul.f32 %v959_v54, %v669_v53  ;;  %673 = vst [vmem:[%s1653_s4 + $0x15] sm:$0x1] %v959_v54  ;;  %677 = vrot.lane.b32.xlu0 %v959_v54, %s1082_s27  ;;  %v686_v60 = vmul.f32 0.9, %v672_v55  ;;  %v682_v63 = vmul.f32 %v1490_v43, %v959_v54 }
 0xb4c   :  { %v671_v57 = vadd.f32 %v670_v56, %v667_v42  ;;  %v687_v2 = vadd.f32 %v686_v60, %v676_v1 }
 0xb4e   :  { %675 = vst [vmem:[%s1655_s6 + $0x15] sm:$0x1] %v671_v57  ;;  %v692_v62 = vmul.f32 0.9, %v671_v57  ;;  %v685_v7 = vadd.f32 1.0, %v671_v57 }
 0xb50   :  { %v693_v5 = vsub.f32 1.0, %v692_v62 }
 0xb52   :  { %v694_v8 = vmul.f32 0.2, %v693_v5 }
 0xbbc   :  { %v680_v58 = vpop.permute.xlu1 %679  ;;  %v678_v59 = vpop.permute.xlu0 %677 }
 0xbbd   :  { %v681_v61 = vadd.f32 %v680_v58, %v678_v59  ;;  %v751_v58 = vld [vmem:[#allocation2 + $0x19] sm:$0x1] }
 0xbbf   :  { %v683_v0 = vmul.f32 %v1496_v45, %v681_v61 }
 0xbc1   :  { %v684_v4 = vadd.f32 %v683_v0, %v682_v63 }
 0xbc3   :  { %v688_v6 = vadd.f32 %v687_v2, %v684_v4 }
 0xbc5   :  { %vm689_vm6 = vcmp.gt.f32.partialorder %v688_v6, %v685_v7 }
 0xbc6   :  { %v960_v9 = vsel %vm689_vm6, 1.0, %v1081_v3  ;;  %v697_v10 = vsel %vm689_vm6, 0.0, %v688_v6 }
 0xbc7   :  { %699 = vst [vmem:[%s1654_s5 + $0x16] sm:$0x1] %v697_v10  ;;  %704 = vrot.lane.b32.xlu1 %v960_v9, %s1083_s10  ;;  %v695_v11 = vmul.f32 %v960_v9, %v694_v8  ;;  %698 = vst [vmem:[%s1653_s4 + $0x16] sm:$0x1] %v960_v9  ;;  %702 = vrot.lane.b32.xlu0 %v960_v9, %s1082_s27  ;;  %v711_v15 = vmul.f32 0.9, %v697_v10  ;;  %v707_v18 = vmul.f32 %v1490_v43, %v960_v9 }
 0xbc9   :  { %v696_v12 = vadd.f32 %v695_v11, %v692_v62  ;;  %v712_v21 = vadd.f32 %v711_v15, %v701_v20 }
 0xbcb   :  { %700 = vst [vmem:[%s1655_s6 + $0x16] sm:$0x1] %v696_v12  ;;  %v717_v17 = vmul.f32 0.9, %v696_v12  ;;  %v710_v25 = vadd.f32 1.0, %v696_v12 }
 0xbcd   :  { %v718_v23 = vsub.f32 1.0, %v717_v17 }
 0xbcf   :  { %v719_v26 = vmul.f32 0.2, %v718_v23 }
 0xc39   :  { %v705_v13 = vpop.permute.xlu1 %704  ;;  %v703_v14 = vpop.permute.xlu0 %702 }
 0xc3a   :  { %v706_v16 = vadd.f32 %v705_v13, %v703_v14  ;;  %v776_v13 = vld [vmem:[#allocation2 + $0x1a] sm:$0x1] }
 0xc3c   :  { %v708_v19 = vmul.f32 %v1496_v45, %v706_v16 }
 0xc3e   :  { %v709_v22 = vadd.f32 %v708_v19, %v707_v18 }
 0xc40   :  { %v713_v24 = vadd.f32 %v712_v21, %v709_v22 }
 0xc42   :  { %vm714_vm7 = vcmp.gt.f32.partialorder %v713_v24, %v710_v25 }
 0xc43   :  { %v961_v27 = vsel %vm714_vm7, 1.0, %v1081_v3  ;;  %v722_v28 = vsel %vm714_vm7, 0.0, %v713_v24 }
 0xc44   :  { %724 = vst [vmem:[%s1654_s5 + $0x17] sm:$0x1] %v722_v28  ;;  %729 = vrot.lane.b32.xlu1 %v961_v27, %s1083_s10  ;;  %v720_v29 = vmul.f32 %v961_v27, %v719_v26  ;;  %723 = vst [vmem:[%s1653_s4 + $0x17] sm:$0x1] %v961_v27  ;;  %727 = vrot.lane.b32.xlu0 %v961_v27, %s1082_s27  ;;  %v736_v35 = vmul.f32 0.9, %v722_v28  ;;  %v732_v31 = vmul.f32 %v1490_v43, %v961_v27 }
 0xc46   :  { %v721_v30 = vadd.f32 %v720_v29, %v717_v17  ;;  %v737_v39 = vadd.f32 %v736_v35, %v726_v38 }
 0xc48   :  { %725 = vst [vmem:[%s1655_s6 + $0x17] sm:$0x1] %v721_v30  ;;  %v742_v37 = vmul.f32 0.9, %v721_v30  ;;  %v735_v44 = vadd.f32 1.0, %v721_v30 }
 0xc4a   :  { %v743_v41 = vsub.f32 1.0, %v742_v37 }
 0xc4c   :  { %v744_v46 = vmul.f32 0.2, %v743_v41 }
 0xcb6   :  { %v730_v33 = vpop.permute.xlu1 %729  ;;  %v728_v34 = vpop.permute.xlu0 %727 }
 0xcb7   :  { %v731_v36 = vadd.f32 %v730_v33, %v728_v34  ;;  %v801_v33 = vld [vmem:[#allocation2 + $0x1b] sm:$0x1] }
 0xcb9   :  { %v733_v32 = vmul.f32 %v1496_v45, %v731_v36 }
 0xcbb   :  { %v734_v40 = vadd.f32 %v733_v32, %v732_v31 }
 0xcbd   :  { %v738_v42 = vadd.f32 %v737_v39, %v734_v40 }
 0xcbf   :  { %vm739_vm8 = vcmp.gt.f32.partialorder %v738_v42, %v735_v44 }
 0xcc0   :  { %v962_v47 = vsel %vm739_vm8, 1.0, %v1081_v3  ;;  %v747_v48 = vsel %vm739_vm8, 0.0, %v738_v42 }
 0xcc1   :  { %749 = vst [vmem:[%s1654_s5 + $0x18] sm:$0x1] %v747_v48  ;;  %754 = vrot.lane.b32.xlu1 %v962_v47, %s1083_s10  ;;  %v745_v49 = vmul.f32 %v962_v47, %v744_v46  ;;  %748 = vst [vmem:[%s1653_s4 + $0x18] sm:$0x1] %v962_v47  ;;  %752 = vrot.lane.b32.xlu0 %v962_v47, %s1082_s27  ;;  %v761_v53 = vmul.f32 0.9, %v747_v48  ;;  %v757_v56 = vmul.f32 %v1490_v43, %v962_v47 }
 0xcc3   :  { %v746_v50 = vadd.f32 %v745_v49, %v742_v37  ;;  %v762_v59 = vadd.f32 %v761_v53, %v751_v58 }
 0xcc5   :  { %750 = vst [vmem:[%s1655_s6 + $0x18] sm:$0x1] %v746_v50  ;;  %v767_v55 = vmul.f32 0.9, %v746_v50  ;;  %v760_v63 = vadd.f32 1.0, %v746_v50 }
 0xcc7   :  { %v768_v61 = vsub.f32 1.0, %v767_v55 }
 0xcc9   :  { %v769_v0 = vmul.f32 0.2, %v768_v61 }
 0xd33   :  { %v755_v51 = vpop.permute.xlu1 %754  ;;  %v753_v52 = vpop.permute.xlu0 %752 }
 0xd34   :  { %v756_v54 = vadd.f32 %v755_v51, %v753_v52  ;;  %v826_v51 = vld [vmem:[#allocation2 + $0x1c] sm:$0x1] }
 0xd36   :  { %v758_v57 = vmul.f32 %v1496_v45, %v756_v54 }
 0xd38   :  { %v759_v60 = vadd.f32 %v758_v57, %v757_v56 }
 0xd3a   :  { %v763_v62 = vadd.f32 %v762_v59, %v759_v60 }
 0xd3c   :  { %vm764_vm9 = vcmp.gt.f32.partialorder %v763_v62, %v760_v63 }
 0xd3d   :  { %v963_v1 = vsel %vm764_vm9, 1.0, %v1081_v3  ;;  %v772_v2 = vsel %vm764_vm9, 0.0, %v763_v62 }
 0xd3e   :  { %774 = vst [vmem:[%s1654_s5 + $0x19] sm:$0x1] %v772_v2  ;;  %779 = vrot.lane.b32.xlu1 %v963_v1, %s1083_s10  ;;  %v770_v4 = vmul.f32 %v963_v1, %v769_v0  ;;  %773 = vst [vmem:[%s1653_s4 + $0x19] sm:$0x1] %v963_v1  ;;  %777 = vrot.lane.b32.xlu0 %v963_v1, %s1082_s27  ;;  %v786_v8 = vmul.f32 0.9, %v772_v2  ;;  %v782_v11 = vmul.f32 %v1490_v43, %v963_v1 }
 0xd40   :  { %v771_v5 = vadd.f32 %v770_v4, %v767_v55  ;;  %v787_v14 = vadd.f32 %v786_v8, %v776_v13 }
 0xd42   :  { %775 = vst [vmem:[%s1655_s6 + $0x19] sm:$0x1] %v771_v5  ;;  %v792_v10 = vmul.f32 0.9, %v771_v5  ;;  %v785_v18 = vadd.f32 1.0, %v771_v5 }
 0xd44   :  { %v793_v16 = vsub.f32 1.0, %v792_v10 }
 0xd46   :  { %v794_v19 = vmul.f32 0.2, %v793_v16 }
 0xdb0   :  { %v780_v6 = vpop.permute.xlu1 %779  ;;  %v778_v7 = vpop.permute.xlu0 %777 }
 0xdb1   :  { %v781_v9 = vadd.f32 %v780_v6, %v778_v7  ;;  %v851_v6 = vld [vmem:[#allocation2 + $0x1d] sm:$0x1] }
 0xdb3   :  { %v783_v12 = vmul.f32 %v1496_v45, %v781_v9 }
 0xdb5   :  { %v784_v15 = vadd.f32 %v783_v12, %v782_v11 }
 0xdb7   :  { %v788_v17 = vadd.f32 %v787_v14, %v784_v15 }
 0xdb9   :  { %vm789_vm10 = vcmp.gt.f32.partialorder %v788_v17, %v785_v18 }
 0xdba   :  { %v964_v20 = vsel %vm789_vm10, 1.0, %v1081_v3  ;;  %v797_v21 = vsel %vm789_vm10, 0.0, %v788_v17 }
 0xdbb   :  { %799 = vst [vmem:[%s1654_s5 + $0x1a] sm:$0x1] %v797_v21  ;;  %804 = vrot.lane.b32.xlu1 %v964_v20, %s1083_s10  ;;  %v795_v22 = vmul.f32 %v964_v20, %v794_v19  ;;  %798 = vst [vmem:[%s1653_s4 + $0x1a] sm:$0x1] %v964_v20  ;;  %802 = vrot.lane.b32.xlu0 %v964_v20, %s1082_s27  ;;  %v811_v26 = vmul.f32 0.9, %v797_v21  ;;  %v807_v29 = vmul.f32 %v1490_v43, %v964_v20 }
 0xdbd   :  { %v796_v23 = vadd.f32 %v795_v22, %v792_v10  ;;  %v812_v34 = vadd.f32 %v811_v26, %v801_v33 }
 0xdbf   :  { %800 = vst [vmem:[%s1655_s6 + $0x1a] sm:$0x1] %v796_v23  ;;  %v817_v28 = vmul.f32 0.9, %v796_v23  ;;  %v810_v31 = vadd.f32 1.0, %v796_v23 }
 0xdc1   :  { %v818_v36 = vsub.f32 1.0, %v817_v28 }
 0xdc3   :  { %v819_v32 = vmul.f32 0.2, %v818_v36 }
 0xe2d   :  { %v805_v24 = vpop.permute.xlu1 %804  ;;  %v803_v25 = vpop.permute.xlu0 %802 }
 0xe2e   :  { %v806_v27 = vadd.f32 %v805_v24, %v803_v25  ;;  %v876_v24 = vld [vmem:[#allocation2 + $0x1e] sm:$0x1] }
 0xe30   :  { %v808_v30 = vmul.f32 %v1496_v45, %v806_v27 }
 0xe32   :  { %v809_v35 = vadd.f32 %v808_v30, %v807_v29 }
 0xe34   :  { %v813_v37 = vadd.f32 %v812_v34, %v809_v35 }
 0xe36   :  { %vm814_vm11 = vcmp.gt.f32.partialorder %v813_v37, %v810_v31 }
 0xe37   :  { %v965_v38 = vsel %vm814_vm11, 1.0, %v1081_v3  ;;  %v822_v39 = vsel %vm814_vm11, 0.0, %v813_v37 }
 0xe38   :  { %824 = vst [vmem:[%s1654_s5 + $0x1b] sm:$0x1] %v822_v39  ;;  %829 = vrot.lane.b32.xlu1 %v965_v38, %s1083_s10  ;;  %v820_v40 = vmul.f32 %v965_v38, %v819_v32  ;;  %823 = vst [vmem:[%s1653_s4 + $0x1b] sm:$0x1] %v965_v38  ;;  %827 = vrot.lane.b32.xlu0 %v965_v38, %s1082_s27  ;;  %v836_v46 = vmul.f32 0.9, %v822_v39  ;;  %v832_v49 = vmul.f32 %v1490_v43, %v965_v38 }
 0xe3a   :  { %v821_v41 = vadd.f32 %v820_v40, %v817_v28  ;;  %v837_v52 = vadd.f32 %v836_v46, %v826_v51 }
 0xe3c   :  { %825 = vst [vmem:[%s1655_s6 + $0x1b] sm:$0x1] %v821_v41  ;;  %v842_v48 = vmul.f32 0.9, %v821_v41  ;;  %v835_v56 = vadd.f32 1.0, %v821_v41 }
 0xe3e   :  { %v843_v54 = vsub.f32 1.0, %v842_v48 }
 0xe40   :  { %v844_v57 = vmul.f32 0.2, %v843_v54 }
 0xeaa   :  { %v830_v42 = vpop.permute.xlu1 %829  ;;  %v828_v44 = vpop.permute.xlu0 %827 }
 0xeab   :  { %v831_v47 = vadd.f32 %v830_v42, %v828_v44  ;;  %v901_v42 = vld [vmem:[#allocation2 + $0x1f] sm:$0x1] }
 0xead   :  { %v833_v50 = vmul.f32 %v1496_v45, %v831_v47 }
 0xeaf   :  { %v834_v53 = vadd.f32 %v833_v50, %v832_v49 }
 0xeb1   :  { %v838_v55 = vadd.f32 %v837_v52, %v834_v53 }
 0xeb3   :  { %vm839_vm12 = vcmp.gt.f32.partialorder %v838_v55, %v835_v56 }
 0xeb4   :  { %v966_v58 = vsel %vm839_vm12, 1.0, %v1081_v3  ;;  %v847_v59 = vsel %vm839_vm12, 0.0, %v838_v55 }
 0xeb5   :  { %849 = vst [vmem:[%s1654_s5 + $0x1c] sm:$0x1] %v847_v59  ;;  %854 = vrot.lane.b32.xlu1 %v966_v58, %s1083_s10  ;;  %v845_v60 = vmul.f32 %v966_v58, %v844_v57  ;;  %848 = vst [vmem:[%s1653_s4 + $0x1c] sm:$0x1] %v966_v58  ;;  %852 = vrot.lane.b32.xlu0 %v966_v58, %s1082_s27  ;;  %v861_v0 = vmul.f32 0.9, %v847_v59  ;;  %v857_v4 = vmul.f32 %v1490_v43, %v966_v58 }
 0xeb7   :  { %v846_v61 = vadd.f32 %v845_v60, %v842_v48  ;;  %v862_v7 = vadd.f32 %v861_v0, %v851_v6 }
 0xeb9   :  { %850 = vst [vmem:[%s1655_s6 + $0x1c] sm:$0x1] %v846_v61  ;;  %v867_v2 = vmul.f32 0.9, %v846_v61  ;;  %v860_v11 = vadd.f32 1.0, %v846_v61 }
 0xebb   :  { %v868_v9 = vsub.f32 1.0, %v867_v2 }
 0xebd   :  { %v869_v12 = vmul.f32 0.2, %v868_v9 }
 0xf27   :  { %v855_v62 = vpop.permute.xlu1 %854  ;;  %v853_v63 = vpop.permute.xlu0 %852 }
 0xf28   :  { %v856_v1 = vadd.f32 %v855_v62, %v853_v63 }
 0xf2a   :  { %v858_v5 = vmul.f32 %v1496_v45, %v856_v1 }
 0xf2c   :  { %v859_v8 = vadd.f32 %v858_v5, %v857_v4 }
 0xf2e   :  { %v863_v10 = vadd.f32 %v862_v7, %v859_v8 }
 0xf30   :  { %vm864_vm13 = vcmp.gt.f32.partialorder %v863_v10, %v860_v11 }
 0xf31   :  { %v967_v13 = vsel %vm864_vm13, 1.0, %v1081_v3  ;;  %v872_v14 = vsel %vm864_vm13, 0.0, %v863_v10 }
 0xf32   :  { %874 = vst [vmem:[%s1654_s5 + $0x1d] sm:$0x1] %v872_v14  ;;  %879 = vrot.lane.b32.xlu1 %v967_v13, %s1083_s10  ;;  %v870_v15 = vmul.f32 %v967_v13, %v869_v12  ;;  %873 = vst [vmem:[%s1653_s4 + $0x1d] sm:$0x1] %v967_v13  ;;  %877 = vrot.lane.b32.xlu0 %v967_v13, %s1082_s27  ;;  %v886_v19 = vmul.f32 0.9, %v872_v14  ;;  %v882_v22 = vmul.f32 %v1490_v43, %v967_v13 }
 0xf34   :  { %v871_v16 = vadd.f32 %v870_v15, %v867_v2  ;;  %v887_v25 = vadd.f32 %v886_v19, %v876_v24 }
 0xf36   :  { %875 = vst [vmem:[%s1655_s6 + $0x1d] sm:$0x1] %v871_v16  ;;  %v892_v21 = vmul.f32 0.9, %v871_v16  ;;  %v885_v29 = vadd.f32 1.0, %v871_v16 }
 0xf38   :  { %v893_v27 = vsub.f32 1.0, %v892_v21 }
 0xf3a   :  { %v894_v30 = vmul.f32 0.2, %v893_v27 }
 0xfa4   :  { %v880_v17 = vpop.permute.xlu1 %879  ;;  %v878_v18 = vpop.permute.xlu0 %877 }
 0xfa5   :  { %v881_v20 = vadd.f32 %v880_v17, %v878_v18 }
 0xfa7   :  { %v883_v23 = vmul.f32 %v1496_v45, %v881_v20 }
 0xfa9   :  { %v884_v26 = vadd.f32 %v883_v23, %v882_v22 }
 0xfab   :  { %v888_v28 = vadd.f32 %v887_v25, %v884_v26 }
 0xfad   :  { %vm889_vm14 = vcmp.gt.f32.partialorder %v888_v28, %v885_v29 }
 0xfae   :  { %v968_v33 = vsel %vm889_vm14, 1.0, %v1081_v3  ;;  %v897_v34 = vsel %vm889_vm14, 0.0, %v888_v28 }
 0xfaf   :  { %899 = vst [vmem:[%s1654_s5 + $0x1e] sm:$0x1] %v897_v34  ;;  %904 = vrot.lane.b32.xlu1 %v968_v33, %s1083_s10  ;;  %v895_v35 = vmul.f32 %v968_v33, %v894_v30  ;;  %898 = vst [vmem:[%s1653_s4 + $0x1e] sm:$0x1] %v968_v33  ;;  %902 = vrot.lane.b32.xlu0 %v968_v33, %s1082_s27  ;;  %v911_v32 = vmul.f32 0.9, %v897_v34  ;;  %v907_v40 = vmul.f32 %v1490_v43, %v968_v33 }
 0xfb1   :  { %v896_v36 = vadd.f32 %v895_v35, %v892_v21  ;;  %v912_v44 = vadd.f32 %v911_v32, %v901_v42 }
 0xfb3   :  { %900 = vst [vmem:[%s1655_s6 + $0x1e] sm:$0x1] %v896_v36  ;;  %v917_v39 = vmul.f32 0.9, %v896_v36  ;;  %v910_v48 = vadd.f32 1.0, %v896_v36 }
 0xfb5   :  { %v918_v47 = vsub.f32 1.0, %v917_v39 }
 0xfb7   :  { %v919_v50 = vmul.f32 0.2, %v918_v47 }
0x1021   :  { %v905_v37 = vpop.permute.xlu1 %904  ;;  %v903_v31 = vpop.permute.xlu0 %902 }
0x1022   :  { %v906_v38 = vadd.f32 %v905_v37, %v903_v31 }
0x1024   :  { %v908_v41 = vmul.f32 %v1496_v45, %v906_v38 }
0x1026   :  { %v909_v46 = vadd.f32 %v908_v41, %v907_v40 }
0x1028   :  { %v913_v49 = vadd.f32 %v912_v44, %v909_v46 }
0x102a   :  { %vm914_vm15 = vcmp.gt.f32.partialorder %v913_v49, %v910_v48 }
0x102b   :  { %v969_v51 = vsel %vm914_vm15, 1.0, %v1081_v3  ;;  %v922_v52 = vsel %vm914_vm15, 0.0, %v913_v49 }
0x102c   :  { %v920_v53 = vmul.f32 %v969_v51, %v919_v50  ;;  %923 = vst [vmem:[%s1653_s4 + $0x1f] sm:$0x1] %v969_v51  ;;  %924 = vst [vmem:[%s1654_s5 + $0x1f] sm:$0x1] %v922_v52 }
0x102e   :  { %v921_v43 = vadd.f32 %v920_v53, %v917_v39 }
0x1030   :  { %925 = vst [vmem:[%s1655_s6 + $0x1f] sm:$0x1] %v921_v43 }

</bundles_post_ra>
